<compile_context>
chip_gen: v5e
topology: v5e:2x2
jax: 0.10.0
libtpu: 0.0.40
codegen_flags: <defaults>
</compile_context>

<pallas_src>
import functools

import jax
import jax.numpy as jnp
from jax import lax
from jax.experimental import pallas as pl
from jax.experimental.pallas import tpu as pltpu

BN_EPS = 1e-5
LANE = 128


def _round_up(x, m):
    return ((x + m - 1) // m) * m


def _vmem_budget():
    """(block working-set budget, vmem_limit_bytes) from physical VMEM."""
    phys = 128 * 1024 * 1024
    try:
        kind = jax.devices()[0].device_kind.lower()
        if "v7" in kind:
            phys = 64 * 1024 * 1024
    except Exception:  # pragma: no cover
        pass
    limit = int(phys * 0.75)     # leave headroom for compiler scratch/semaphores
    budget = int(phys * 0.55)    # target working set well under the limit
    return budget, limit


def _pick_tile_l(n, l, cpi, cpo, pool_k, budget_bytes, cap=None):
    """Largest length tile (multiple of 8*pool_k) whose double-buffered
    working set fits the VMEM budget.  Per-layer; no per-chip heuristics."""
    granule = 8 * pool_k
    fixed = 2 * 3 * cpi * cpo * 2 + (2 << 20)        # 2-buf bf16 weights + slack
    per_row = n * (12 * cpi + 22 * cpo)              # bf16 x/y 2-buf + f32 temps
    tl = max(budget_bytes - fixed, per_row * granule) // per_row
    tl = max(granule, (tl // granule) * granule)
    tl = min(tl, _round_up(l, granule))
    if cap is not None:
        tl = min(tl, max(granule, (cap // granule) * granule))
    return int(tl)


# ----------------------------------------------------------------------------
# BatchNorm affine (training-mode, global stats) computed in f32
# ----------------------------------------------------------------------------
def _bn_affine(sum_ref, ssq_ref, gamma_ref, beta_ref, count):
    mean = sum_ref[...] * (1.0 / count)
    var = jnp.maximum(ssq_ref[...] * (1.0 / count) - mean * mean, 0.0)
    inv = lax.rsqrt(var + BN_EPS)
    scale = gamma_ref[...] * inv
    shift = beta_ref[...] - mean * scale
    return scale, shift                                   # (1, 1, C) f32


# ----------------------------------------------------------------------------
# Pass 1: Conv1d(k=3,'same') with optional fused BN+ReLU of the previous layer
#         + per-tile partial BN statistics of this layer's output.
# ----------------------------------------------------------------------------
def _conv_body(x_ref, xl_ref, xr_ref, w_ref, y_ref, sum_ref, ssq_ref,
               scale, shift, *, n_valid_l, tile_l):
    t = pl.program_id(0)
    nb, _, cpi = x_ref.shape
    cpo = y_ref.shape[-1]
    base = t * tile_l

    # (N, TL+2, Cpi) window covering rows base-1 .. base+TL (k=3 'same' halo).
    xa = jnp.concatenate([xl_ref[:, 7:8, :], x_ref[...], xr_ref[:, 0:1, :]],
                         axis=1)
    row = lax.broadcasted_iota(jnp.int32, (1, tile_l + 2, 1), 1) + (base - 1)
    valid = (row >= 0) & (row < n_valid_l)     # handles zero-pad + halo clamps
    if scale is not None:                      # fused BN+ReLU of previous conv
        xa = jnp.maximum(xa.astype(jnp.float32) * scale + shift, 0.0)
    xa = jnp.where(valid, xa, 0.0).astype(jnp.bfloat16)

    # k=3 conv as 3 per-tap MXU matmuls, f32 accumulation (no 3x-wide im2col).
    acc = jnp.dot(xa[:, 0:tile_l, :].reshape(nb * tile_l, cpi), w_ref[0],
                  preferred_element_type=jnp.float32)
    acc += jnp.dot(xa[:, 1:tile_l + 1, :].reshape(nb * tile_l, cpi), w_ref[1],
                   preferred_element_type=jnp.float32)
    acc += jnp.dot(xa[:, 2:tile_l + 2, :].reshape(nb * tile_l, cpi), w_ref[2],
                   preferred_element_type=jnp.float32)
    acc = acc.reshape(nb, tile_l, cpo)

    # Per-tile partial BN statistics, masked to the valid length.
    out_row = lax.broadcasted_iota(jnp.int32, (1, tile_l, 1), 1) + base
    acc_m = jnp.where(out_row < n_valid_l, acc, 0.0)
    sum_ref[...] = jnp.sum(acc_m, axis=(0, 1)).reshape(1, 1, cpo)
    ssq_ref[...] = jnp.sum(acc_m * acc_m, axis=(0, 1)).reshape(1, 1, cpo)

    y_ref[...] = acc.astype(y_ref.dtype)       # raw conv output, bf16 in HBM


def _conv_kernel(x_ref, xl_ref, xr_ref, w_ref, y_ref, sum_ref, ssq_ref, *,
                 n_valid_l, tile_l):
    _conv_body(x_ref, xl_ref, xr_ref, w_ref, y_ref, sum_ref, ssq_ref,
               None, None, n_valid_l=n_valid_l, tile_l=tile_l)


def _conv_bn_fused_kernel(x_ref, xl_ref, xr_ref, w_ref, psum_ref, pssq_ref,
                          pg_ref, pb_ref, y_ref, sum_ref, ssq_ref, *,
                          n_valid_l, tile_l, prev_count):
    scale, shift = _bn_affine(psum_ref, pssq_ref, pg_ref, pb_ref, prev_count)
    _conv_body(x_ref, xl_ref, xr_ref, w_ref, y_ref, sum_ref, ssq_ref,
               scale, shift, n_valid_l=n_valid_l, tile_l=tile_l)


def _conv_pass(x, w3, prev_bn, *, n_valid_l, tile_l, vmem_limit):
    """x: (N, Lp, Cpi) bf16.  w3: (3, Cpi, Cpo) bf16.  prev_bn: None or
    (ssum, ssq, gamma, beta, count) of the previous layer (its BN+ReLU is
    fused onto the input inside this kernel).  Returns (y bf16, partial sum,
    partial sumsq) with partial stats shaped (n_tiles, 1, Cpo)."""
    n, lp, cpi = x.shape
    cpo = w3.shape[-1]
    n_tiles = lp // tile_l
    r = tile_l // 8
    max_blk = n_tiles * r - 1

    x_spec = pl.BlockSpec((n, tile_l, cpi), lambda t: (0, t, 0))
    xl_spec = pl.BlockSpec((n, 8, cpi),
                           lambda t: (0, jnp.maximum(t * r - 1, 0), 0))
    xr_spec = pl.BlockSpec((n, 8, cpi),
                           lambda t: (0, jnp.minimum((t + 1) * r, max_blk), 0))
    w_spec = pl.BlockSpec((3, cpi, cpo), lambda t: (0, 0, 0))
    cvec = pl.BlockSpec((1, 1, cpi), lambda t: (0, 0, 0))

    out_shape = (jax.ShapeDtypeStruct((n, lp, cpo), jnp.bfloat16),
                 jax.ShapeDtypeStruct((n_tiles, 1, cpo), jnp.float32),
                 jax.ShapeDtypeStruct((n_tiles, 1, cpo), jnp.float32))
    out_specs = [pl.BlockSpec((n, tile_l, cpo), lambda t: (0, t, 0)),
                 pl.BlockSpec((1, 1, cpo), lambda t: (t, 0, 0)),
                 pl.BlockSpec((1, 1, cpo), lambda t: (t, 0, 0))]

    cost = pl.CostEstimate(
        flops=2 * n * lp * 3 * cpi * cpo, transcendentals=0,
        bytes_accessed=2 * n * lp * (cpi + cpo) + 6 * cpi * cpo
        + 8 * n_tiles * cpo)

    if prev_bn is None:
        kern = functools.partial(_conv_kernel, n_valid_l=n_valid_l,
                                 tile_l=tile_l)
        in_specs = [x_spec, xl_spec, xr_spec, w_spec]
        args = (x, x, x, w3)
    else:
        ps, pq, pg, pb, pcount = prev_bn
        kern = functools.partial(_conv_bn_fused_kernel, n_valid_l=n_valid_l,
                                 tile_l=tile_l, prev_count=pcount)
        in_specs = [x_spec, xl_spec, xr_spec, w_spec, cvec, cvec, cvec, cvec]
        args = (x, x, x, w3, ps, pq, pg, pb)

    return pl.pallas_call(
        kern,
        out_shape=out_shape,
        grid_spec=pltpu.PrefetchScalarGridSpec(
            num_scalar_prefetch=0, grid=(n_tiles,),
            in_specs=in_specs, out_specs=out_specs),
        compiler_params=pltpu.CompilerParams(
            dimension_semantics=("parallel",), vmem_limit_bytes=vmem_limit),
        cost_estimate=cost,
    )(*args)


# ----------------------------------------------------------------------------
# Pass 2 (only for the last conv of a block): global BN + ReLU, fused MaxPool1d
# ----------------------------------------------------------------------------
def _bn_relu_kernel(y_ref, sum_ref, ssq_ref, g_ref, b_ref, out_ref, *,
                    n_valid_l, tile_l, count):
    t = pl.program_id(0)
    scale, shift = _bn_affine(sum_ref, ssq_ref, g_ref, b_ref, count)
    z = jnp.maximum(y_ref[...].astype(jnp.float32) * scale + shift, 0.0)
    row = lax.broadcasted_iota(jnp.int32, (1, tile_l, 1), 1) + t * tile_l
    out_ref[...] = jnp.where(row < n_valid_l, z, 0.0)


def _bn_relu_pool_kernel(y_ref, sum_ref, ssq_ref, g_ref, b_ref, out_ref,
                         pool_ref, *, n_valid_l, tile_l, count, pool_k):
    t = pl.program_id(0)
    scale, shift = _bn_affine(sum_ref, ssq_ref, g_ref, b_ref, count)
    z = jnp.maximum(y_ref[...].astype(jnp.float32) * scale + shift, 0.0)
    row = lax.broadcasted_iota(jnp.int32, (1, tile_l, 1), 1) + t * tile_l
    out_ref[...] = jnp.where(row < n_valid_l, z, 0.0)
    # Fused MaxPool1d(ceil_mode=True).  BN+ReLU is computed once (above); the
    # pool is strided re-reads of the just-written tile.  ReLU output >= 0 and
    # the invalid tail is zeroed, so max over zero-padded rows equals the
    # -inf-padded ceil_mode reference.
    tpool = tile_l // pool_k
    m = out_ref[:, pl.ds(0, tpool, stride=pool_k), :]
    for i in range(1, pool_k):
        m = jnp.maximum(m, out_ref[:, pl.ds(i, tpool, stride=pool_k), :])
    pool_ref[...] = m.astype(pool_ref.dtype)


def _finalize(y, ssum, ssq, gamma, beta, *, n_valid_l, tile_l, count, pool_k,
              vmem_limit):
    n, lp, cpo = y.shape
    n_tiles = lp // tile_l
    y_spec = pl.BlockSpec((n, tile_l, cpo), lambda t: (0, t, 0))
    cvec = pl.BlockSpec((1, 1, cpo), lambda t: (0, 0, 0))
    in_specs = [y_spec, cvec, cvec, cvec, cvec]
    out_spec_full = pl.BlockSpec((n, tile_l, cpo), lambda t: (0, t, 0))
    cparams = pltpu.CompilerParams(dimension_semantics=("parallel",),
                                   vmem_limit_bytes=vmem_limit)
    cost = pl.CostEstimate(flops=6 * n * lp * cpo, transcendentals=2 * cpo,
                           bytes_accessed=6 * n * lp * cpo + 16 * cpo)

    if pool_k is None:
        kern = functools.partial(_bn_relu_kernel, n_valid_l=n_valid_l,
                                 tile_l=tile_l, count=count)
        out = pl.pallas_call(
            kern, out_shape=jax.ShapeDtypeStruct((n, lp, cpo), jnp.float32),
            grid_spec=pltpu.PrefetchScalarGridSpec(
                num_scalar_prefetch=0, grid=(n_tiles,),
                in_specs=in_specs, out_specs=out_spec_full),
            compiler_params=cparams, cost_estimate=cost,
        )(y, ssum, ssq, gamma, beta)
        return out, None

    tpool = tile_l // pool_k
    kern = functools.partial(_bn_relu_pool_kernel, n_valid_l=n_valid_l,
                             tile_l=tile_l, count=count, pool_k=pool_k)
    out, pooled = pl.pallas_call(
        kern,
        out_shape=(jax.ShapeDtypeStruct((n, lp, cpo), jnp.float32),
                   jax.ShapeDtypeStruct((n, lp // pool_k, cpo), jnp.bfloat16)),
        grid_spec=pltpu.PrefetchScalarGridSpec(
            num_scalar_prefetch=0, grid=(n_tiles,),
            in_specs=in_specs,
            out_specs=[out_spec_full,
                       pl.BlockSpec((n, tpool, cpo), lambda t: (0, t, 0))]),
        compiler_params=cparams, cost_estimate=cost,
    )(y, ssum, ssq, gamma, beta)
    return out, pooled


# ----------------------------------------------------------------------------
# Encoder: parameters + forward
# ----------------------------------------------------------------------------
def make_encoder_params(key, in_channels, out_channels, downhill):
    """downhill CNNBlocks (2 convs each) + one final CNNBlocks.  Weights are
    stored tap-major (K=3, Cin, Cout); gamma=1, beta=0 (PyTorch init)."""
    blocks = []
    ci, co = in_channels, out_channels
    for _ in range(downhill + 1):
        layers = []
        c_in = ci
        for _ in range(2):
            key, sub = jax.random.split(key)
            w = jax.random.normal(sub, (3, c_in, co), jnp.float32) * 0.1
            layers.append((w, jnp.ones((co,), jnp.float32),
                           jnp.zeros((co,), jnp.float32)))
            c_in = co
        blocks.append(layers)
        ci, co = co, co * 2
    return blocks


def encoder_forward(x_ncl, params, maxpool_kernel_sizes, tile_l_cap=None):
    """Returns (x, route_connection) in the PyTorch NCL layout."""
    n, cin0, l0 = x_ncl.shape
    downhill = len(maxpool_kernel_sizes)
    budget, vmem_limit = _vmem_budget()

    # Single boundary transpose + bf16 cast; everything internal is NLC bf16.
    x_nlc = jnp.transpose(x_ncl, (0, 2, 1)).astype(jnp.bfloat16)

    routes = []
    cur = None                     # current activation, (N, Lp, Cp) bf16
    cur_l, cur_c = l0, cin0

    for bi, layers in enumerate(params):
        do_pool = bi < downhill
        pool_k = maxpool_kernel_sizes[bi] if do_pool else 1
        cout = layers[0][0].shape[2]
        cpi0 = _round_up(cur_c, LANE)
        cpo = _round_up(cout, LANE)
        tile_l = _pick_tile_l(n, cur_l, max(cpi0, cpo), cpo, pool_k, budget,
                              tile_l_cap)
        lp = _round_up(cur_l, tile_l)

        if cur is None:
            # TODO(synk): the stem (Cin=4) still pads input channels to 128
            # lanes in HBM; a true-Cin last-dim block would cut stem x reads.
            cur = jnp.pad(x_nlc, ((0, 0), (0, lp - cur_l), (0, cpi0 - cur_c)))
        else:                       # channels already lane-padded; fix length
            have = cur.shape[1]
            if have < lp:
                cur = jnp.pad(cur, ((0, 0), (0, lp - have), (0, 0)))
            elif have > lp:
                cur = cur[:, :lp, :]

        count = float(n * cur_l)
        prev_bn = None
        y = cur
        for (w, g, b) in layers:
            cin_l, cout_l = w.shape[1], w.shape[2]
            cpi_l = _round_up(cin_l, LANE)
            cpo_l = _round_up(cout_l, LANE)
            w_p = jnp.pad(w, ((0, 0), (0, cpi_l - cin_l),
                              (0, cpo_l - cout_l))).astype(jnp.bfloat16)
            g_p = jnp.pad(g, (0, cpo_l - cout_l)).reshape(1, 1, cpo_l)
            b_p = jnp.pad(b, (0, cpo_l - cout_l)).reshape(1, 1, cpo_l)

            # Conv pass; the previous layer's BN+ReLU (if any) is fused here.
            y, ps, pq = _conv_pass(y, w_p, prev_bn, n_valid_l=cur_l,
                                   tile_l=tile_l, vmem_limit=vmem_limit)
            ssum = jnp.sum(ps, axis=0, keepdims=True)     # (1,1,Cpo) global
            ssq = jnp.sum(pq, axis=0, keepdims=True)
            prev_bn = (ssum, ssq, g_p, b_p, count)

        # Finalize the block's last conv: BN + ReLU (+ fused ceil-mode pool).
        out_full, pooled = _finalize(
            y, prev_bn[0], prev_bn[1], prev_bn[2], prev_bn[3],
            n_valid_l=cur_l, tile_l=tile_l, count=count,
            pool_k=(pool_k if do_pool else None), vmem_limit=vmem_limit)

        # Skip connection in the PyTorch NCL layout (boundary transpose).
        routes.append(jnp.transpose(out_full[:, :cur_l, :cout], (0, 2, 1)))

        if do_pool:
            cur = pooled
            cur_l = -(-cur_l // pool_k)
        cur_c = cout

    return routes[-1], routes


# ----------------------------------------------------------------------------
# Pure-JAX f32 reference for correctness checking
# ----------------------------------------------------------------------------
def _ref_conv_bn_relu(x_nlc, w, g, b):
    y = lax.conv_general_dilated(x_nlc, w, window_strides=(1,), padding="SAME",
                                 dimension_numbers=("NWC", "WIO", "NWC"))
    mean = jnp.mean(y, axis=(0, 1), keepdims=True)
    var = jnp.mean((y - mean) ** 2, axis=(0, 1), keepdims=True)
    y = (y - mean) / jnp.sqrt(var + BN_EPS) * g + b
    return jnp.maximum(y, 0.0)


def _ref_maxpool(x_nlc, k):
    n, l, c = x_nlc.shape
    lout = -(-l // k)
    pad = lout * k - l
    if pad:
        x_nlc = jnp.pad(x_nlc, ((0, 0), (0, pad), (0, 0)),
                        constant_values=-jnp.inf)
    return jnp.max(x_nlc.reshape(n, lout, k, c), axis=2)


def _ref_encoder_forward(x_ncl, params, maxpool_kernel_sizes):
    x = jnp.transpose(x_ncl, (0, 2, 1))
    routes = []
    downhill = len(maxpool_kernel_sizes)
    for i, layers in enumerate(params):
        for (w, g, b) in layers:
            x = _ref_conv_bn_relu(x, w, g, b)
        routes.append(jnp.transpose(x, (0, 2, 1)))
        if i < downhill:
            x = _ref_maxpool(x, maxpool_kernel_sizes[i])
    return routes[-1], routes


# ----------------------------------------------------------------------------
if __name__ == "__main__":
    # Small but non-trivial: multiple length tiles (with the cap), an odd pool
    # size (ceil_mode path), and channel padding to 128 lanes.
    N, Cin, L = 2, 4, 64
    out_channels = 8
    downhill = 2
    maxpool_kernel_sizes = [2, 3]

    key = jax.random.PRNGKey(0)
    kx, kp = jax.random.split(key)
    x = jax.random.normal(kx, (N, Cin, L), jnp.float32)           # PyTorch NCL
    params = make_encoder_params(kp, Cin, out_channels, downhill)

    ref_out, ref_routes = _ref_encoder_forward(x, params, maxpool_kernel_sizes)

    # Run both the multi-tile path (forced small tiles) and the default
    # footprint-sized single-tile path.
    for cap in (16, None):
        run = jax.jit(functools.partial(
            encoder_forward, params=params,
            maxpool_kernel_sizes=maxpool_kernel_sizes, tile_l_cap=cap))
        out, routes = run(x)
        out = jax.block_until_ready(out)
        routes = [jax.block_until_ready(r) for r in routes]

        # bf16 weights/activations with f32 accumulation and f32 BN math:
        # compare against the f32 reference with a loosened tolerance.
        assert out.shape == ref_out.shape, (out.shape, ref_out.shape)
        assert jnp.allclose(out, ref_out, atol=1e-1, rtol=1e-1)
        for a, r in zip(routes, ref_routes):
            assert a.shape == r.shape, (a.shape, r.shape)
            assert jnp.allclose(a, r, atol=1e-1, rtol=1e-1)

    print("KERNEL_OK")
</pallas_src>

<mosaic_0001>
module attributes {stable_mosaic.version = 11 : i64} {
  func.func @_conv_kernel(%arg0: i32, %arg1: memref<2x16x128xbf16, #tpu.memory_space<vmem>>, %arg2: memref<2x8x128xbf16, #tpu.memory_space<vmem>>, %arg3: memref<2x8x128xbf16, #tpu.memory_space<vmem>>, %arg4: memref<3x128x128xbf16, #tpu.memory_space<vmem>>, %arg5: memref<2x16x128xbf16, #tpu.memory_space<vmem>>, %arg6: memref<1x1x128xf32, #tpu.memory_space<vmem>>, %arg7: memref<1x1x128xf32, #tpu.memory_space<vmem>>) attributes {dimension_semantics = [#tpu.dimension_semantics<parallel>], iteration_bounds = array<i64: 4>, scalar_prefetch = 0 : i64, scratch_operands = 0 : i64, tpu.core_type = #tpu.core_type<tc>, window_params = [{transform_indices = @transform_0, window_bounds = array<i64: 2, 16, 128>}, {transform_indices = @transform_1, window_bounds = array<i64: 2, 8, 128>}, {transform_indices = @transform_2, window_bounds = array<i64: 2, 8, 128>}, {pipeline_mode = #tpu.pipeline_mode<synchronous>, transform_indices = @transform_3, window_bounds = array<i64: 3, 128, 128>}, {transform_indices = @transform_4, window_bounds = array<i64: 2, 16, 128>}, {transform_indices = @transform_5, window_bounds = array<i64: 1, 1, 128>}, {transform_indices = @transform_6, window_bounds = array<i64: 1, 1, 128>}]} {
    %c16_i32 = arith.constant 16 : i32
    %0 = arith.muli %arg0, %c16_i32 : i32
    %c0 = arith.constant 0 : index
    %c7 = arith.constant 7 : index
    %c0_0 = arith.constant 0 : index
    %1 = vector.load %arg2[%c0, %c7, %c0_0] : memref<2x8x128xbf16, #tpu.memory_space<vmem>>, vector<2x1x128xbf16>
    %c0_1 = arith.constant 0 : index
    %c0_2 = arith.constant 0 : index
    %c0_3 = arith.constant 0 : index
    %2 = vector.load %arg1[%c0_1, %c0_2, %c0_3] : memref<2x16x128xbf16, #tpu.memory_space<vmem>>, vector<2x16x128xbf16>
    %c0_4 = arith.constant 0 : index
    %c0_5 = arith.constant 0 : index
    %c0_6 = arith.constant 0 : index
    %3 = vector.load %arg3[%c0_4, %c0_5, %c0_6] : memref<2x8x128xbf16, #tpu.memory_space<vmem>>, vector<2x1x128xbf16>
    %4 = tpu.concatenate %1, %2, %3 in 1 : vector<2x1x128xbf16>, vector<2x16x128xbf16>, vector<2x1x128xbf16> -> vector<2x18x128xbf16>
    %5 = tpu.iota {dimensions = array<i32: 1>} : vector<1x18x1xi32>
    %c1_i32 = arith.constant 1 : i32
    %6 = arith.subi %0, %c1_i32 : i32
    %7 = vector.broadcast %6 : i32 to vector<1x18x1xi32>
    %8 = arith.addi %5, %7 : vector<1x18x1xi32>
    %c0_i32 = arith.constant 0 : i32
    %9 = vector.broadcast %c0_i32 : i32 to vector<1x18x1xi32>
    %10 = arith.cmpi sge, %8, %9 : vector<1x18x1xi32>
    %c64_i32 = arith.constant 64 : i32
    %11 = vector.broadcast %c64_i32 : i32 to vector<1x18x1xi32>
    %12 = arith.cmpi slt, %8, %11 : vector<1x18x1xi32>
    %13 = arith.andi %10, %12 : vector<1x18x1xi1>
    %cst = arith.constant 0.000000e+00 : f32
    %14 = arith.truncf %cst : f32 to bf16
    %15 = vector.shape_cast %13 : vector<1x18x1xi1> to vector<1x18x1xi1>
    %16 = vector.broadcast %15 : vector<1x18x1xi1> to vector<2x18x128xi1>
    %17 = vector.broadcast %14 : bf16 to vector<2x18x128xbf16>
    %18 = arith.select %16, %4, %17 : vector<2x18x128xi1>, vector<2x18x128xbf16>
    %19 = vector.extract_strided_slice %18 {offsets = [0, 0, 0], sizes = [2, 16, 128], strides = [1, 1, 1]} : vector<2x18x128xbf16> to vector<2x16x128xbf16>
    %20 = vector.shape_cast %19 : vector<2x16x128xbf16> to vector<32x128xbf16>
    %c0_7 = arith.constant 0 : index
    %c0_8 = arith.constant 0 : index
    %c0_9 = arith.constant 0 : index
    %21 = vector.load %arg4[%c0_7, %c0_8, %c0_9] : memref<3x128x128xbf16, #tpu.memory_space<vmem>>, vector<1x128x128xbf16>
    %22 = vector.shape_cast %21 : vector<1x128x128xbf16> to vector<128x128xbf16>
    %cst_10 = arith.constant dense<0.000000e+00> : vector<32x128xf32>
    %23 = tpu.matmul %20, %22, %cst_10 {dimension_numbers = #tpu.dot_dimension_numbers<[1], [0], [0], [1], [0, 0, 1, 1], [], []>} : vector<32x128xbf16>, vector<128x128xbf16>, vector<32x128xf32> -> vector<32x128xf32>
    %24 = vector.extract_strided_slice %18 {offsets = [0, 1, 0], sizes = [2, 16, 128], strides = [1, 1, 1]} : vector<2x18x128xbf16> to vector<2x16x128xbf16>
    %25 = vector.shape_cast %24 : vector<2x16x128xbf16> to vector<32x128xbf16>
    %c1 = arith.constant 1 : index
    %c0_11 = arith.constant 0 : index
    %c0_12 = arith.constant 0 : index
    %26 = vector.load %arg4[%c1, %c0_11, %c0_12] : memref<3x128x128xbf16, #tpu.memory_space<vmem>>, vector<1x128x128xbf16>
    %27 = vector.shape_cast %26 : vector<1x128x128xbf16> to vector<128x128xbf16>
    %cst_13 = arith.constant dense<0.000000e+00> : vector<32x128xf32>
    %28 = tpu.matmul %25, %27, %cst_13 {dimension_numbers = #tpu.dot_dimension_numbers<[1], [0], [0], [1], [0, 0, 1, 1], [], []>} : vector<32x128xbf16>, vector<128x128xbf16>, vector<32x128xf32> -> vector<32x128xf32>
    %29 = arith.addf %23, %28 : vector<32x128xf32>
    %30 = vector.extract_strided_slice %18 {offsets = [0, 2, 0], sizes = [2, 16, 128], strides = [1, 1, 1]} : vector<2x18x128xbf16> to vector<2x16x128xbf16>
    %31 = vector.shape_cast %30 : vector<2x16x128xbf16> to vector<32x128xbf16>
    %c2 = arith.constant 2 : index
    %c0_14 = arith.constant 0 : index
    %c0_15 = arith.constant 0 : index
    %32 = vector.load %arg4[%c2, %c0_14, %c0_15] : memref<3x128x128xbf16, #tpu.memory_space<vmem>>, vector<1x128x128xbf16>
    %33 = vector.shape_cast %32 : vector<1x128x128xbf16> to vector<128x128xbf16>
    %cst_16 = arith.constant dense<0.000000e+00> : vector<32x128xf32>
    %34 = tpu.matmul %31, %33, %cst_16 {dimension_numbers = #tpu.dot_dimension_numbers<[1], [0], [0], [1], [0, 0, 1, 1], [], []>} : vector<32x128xbf16>, vector<128x128xbf16>, vector<32x128xf32> -> vector<32x128xf32>
    %35 = arith.addf %29, %34 : vector<32x128xf32>
    %36 = vector.shape_cast %35 : vector<32x128xf32> to vector<2x16x128xf32>
    %37 = tpu.iota {dimensions = array<i32: 1>} : vector<1x16x1xi32>
    %38 = vector.broadcast %0 : i32 to vector<1x16x1xi32>
    %39 = arith.addi %37, %38 : vector<1x16x1xi32>
    %c64_i32_17 = arith.constant 64 : i32
    %40 = vector.broadcast %c64_i32_17 : i32 to vector<1x16x1xi32>
    %41 = arith.cmpi slt, %39, %40 : vector<1x16x1xi32>
    %cst_18 = arith.constant 0.000000e+00 : f32
    %42 = vector.shape_cast %41 : vector<1x16x1xi1> to vector<1x16x1xi1>
    %43 = vector.broadcast %42 : vector<1x16x1xi1> to vector<2x16x128xi1>
    %44 = vector.broadcast %cst_18 : f32 to vector<2x16x128xf32>
    %45 = arith.select %43, %36, %44 : vector<2x16x128xi1>, vector<2x16x128xf32>
    %cst_19 = arith.constant dense<0.000000e+00> : vector<128xf32>
    %46 = vector.multi_reduction <add>, %45, %cst_19 [0, 1] : vector<2x16x128xf32> to vector<128xf32>
    %47 = vector.shape_cast %46 : vector<128xf32> to vector<1x1x128xf32>
    %c0_20 = arith.constant 0 : index
    %c0_21 = arith.constant 0 : index
    %c0_22 = arith.constant 0 : index
    %48 = vector.load %arg6[%c0_20, %c0_21, %c0_22] : memref<1x1x128xf32, #tpu.memory_space<vmem>>, vector<1x1x128xf32>
    tpu.vector_store %arg6[%c0_20, %c0_21, %c0_22], %47 {strides = array<i32>} : memref<1x1x128xf32, #tpu.memory_space<vmem>>, vector<1x1x128xf32>,
    %49 = arith.mulf %45, %45 : vector<2x16x128xf32>
    %cst_23 = arith.constant dense<0.000000e+00> : vector<128xf32>
    %50 = vector.multi_reduction <add>, %49, %cst_23 [0, 1] : vector<2x16x128xf32> to vector<128xf32>
    %51 = vector.shape_cast %50 : vector<128xf32> to vector<1x1x128xf32>
    %c0_24 = arith.constant 0 : index
    %c0_25 = arith.constant 0 : index
    %c0_26 = arith.constant 0 : index
    %52 = vector.load %arg7[%c0_24, %c0_25, %c0_26] : memref<1x1x128xf32, #tpu.memory_space<vmem>>, vector<1x1x128xf32>
    tpu.vector_store %arg7[%c0_24, %c0_25, %c0_26], %51 {strides = array<i32>} : memref<1x1x128xf32, #tpu.memory_space<vmem>>, vector<1x1x128xf32>,
    %53 = arith.truncf %36 : vector<2x16x128xf32> to vector<2x16x128xbf16>
    %c0_27 = arith.constant 0 : index
    %c0_28 = arith.constant 0 : index
    %c0_29 = arith.constant 0 : index
    %54 = vector.load %arg5[%c0_27, %c0_28, %c0_29] : memref<2x16x128xbf16, #tpu.memory_space<vmem>>, vector<2x16x128xbf16>
    tpu.vector_store %arg5[%c0_27, %c0_28, %c0_29], %53 {strides = array<i32>} : memref<2x16x128xbf16, #tpu.memory_space<vmem>>, vector<2x16x128xbf16>,
    return
  }
  func.func @transform_0(%arg0: i32) -> (i32, i32, i32) {
    %c0_i32 = arith.constant 0 : i32
    %c0_i32_0 = arith.constant 0 : i32
    %c0_i32_1 = arith.constant 0 : i32
    return %c0_i32, %arg0, %c0_i32_0 : i32, i32, i32
  }
  func.func @transform_1(%arg0: i32) -> (i32, i32, i32) {
    %c2_i32 = arith.constant 2 : i32
    %0 = arith.muli %arg0, %c2_i32 : i32
    %c1_i32 = arith.constant 1 : i32
    %1 = arith.subi %0, %c1_i32 : i32
    %c0_i32 = arith.constant 0 : i32
    %2 = arith.maxsi %1, %c0_i32 : i32
    %c0_i32_0 = arith.constant 0 : i32
    %c0_i32_1 = arith.constant 0 : i32
    %c0_i32_2 = arith.constant 0 : i32
    return %c0_i32_0, %2, %c0_i32_1 : i32, i32, i32
  }
  func.func @transform_2(%arg0: i32) -> (i32, i32, i32) {
    %c1_i32 = arith.constant 1 : i32
    %0 = arith.addi %arg0, %c1_i32 : i32
    %c2_i32 = arith.constant 2 : i32
    %1 = arith.muli %0, %c2_i32 : i32
    %c7_i32 = arith.constant 7 : i32
    %2 = arith.minsi %1, %c7_i32 : i32
    %c0_i32 = arith.constant 0 : i32
    %c0_i32_0 = arith.constant 0 : i32
    %c0_i32_1 = arith.constant 0 : i32
    return %c0_i32, %2, %c0_i32_0 : i32, i32, i32
  }
  func.func @transform_3(%arg0: i32) -> (i32, i32, i32) {
    %c0_i32 = arith.constant 0 : i32
    %c0_i32_0 = arith.constant 0 : i32
    %c0_i32_1 = arith.constant 0 : i32
    %c0_i32_2 = arith.constant 0 : i32
    return %c0_i32, %c0_i32_0, %c0_i32_1 : i32, i32, i32
  }
  func.func @transform_4(%arg0: i32) -> (i32, i32, i32) {
    %c0_i32 = arith.constant 0 : i32
    %c0_i32_0 = arith.constant 0 : i32
    %c0_i32_1 = arith.constant 0 : i32
    return %c0_i32, %arg0, %c0_i32_0 : i32, i32, i32
  }
  func.func @transform_5(%arg0: i32) -> (i32, i32, i32) {
    %c0_i32 = arith.constant 0 : i32
    %c0_i32_0 = arith.constant 0 : i32
    %c0_i32_1 = arith.constant 0 : i32
    return %arg0, %c0_i32, %c0_i32_0 : i32, i32, i32
  }
  func.func @transform_6(%arg0: i32) -> (i32, i32, i32) {
    %c0_i32 = arith.constant 0 : i32
    %c0_i32_0 = arith.constant 0 : i32
    %c0_i32_1 = arith.constant 0 : i32
    return %arg0, %c0_i32, %c0_i32_0 : i32, i32, i32
  }
}

module attributes {stable_mosaic.version = 11 : i64} {
  func.func @_bn_relu_pool_kernel(%arg0: i32, %arg1: memref<2x16x128xbf16, #tpu.memory_space<vmem>>, %arg2: memref<1x1x128xf32, #tpu.memory_space<vmem>>, %arg3: memref<1x1x128xf32, #tpu.memory_space<vmem>>, %arg4: memref<1x1x128xf32, #tpu.memory_space<vmem>>, %arg5: memref<1x1x128xf32, #tpu.memory_space<vmem>>, %arg6: memref<2x16x128xf32, #tpu.memory_space<vmem>>, %arg7: memref<2x8x128xbf16, #tpu.memory_space<vmem>>) attributes {dimension_semantics = [#tpu.dimension_semantics<parallel>], iteration_bounds = array<i64: 4>, scalar_prefetch = 0 : i64, scratch_operands = 0 : i64, tpu.core_type = #tpu.core_type<tc>, window_params = [{transform_indices = @transform_0, window_bounds = array<i64: 2, 16, 128>}, {pipeline_mode = #tpu.pipeline_mode<synchronous>, transform_indices = @transform_1, window_bounds = array<i64: 1, 1, 128>}, {pipeline_mode = #tpu.pipeline_mode<synchronous>, transform_indices = @transform_2, window_bounds = array<i64: 1, 1, 128>}, {pipeline_mode = #tpu.pipeline_mode<synchronous>, transform_indices = @transform_3, window_bounds = array<i64: 1, 1, 128>}, {pipeline_mode = #tpu.pipeline_mode<synchronous>, transform_indices = @transform_4, window_bounds = array<i64: 1, 1, 128>}, {transform_indices = @transform_5, window_bounds = array<i64: 2, 16, 128>}, {transform_indices = @transform_6, window_bounds = array<i64: 2, 8, 128>}]} {
    %c0 = arith.constant 0 : index
    %c0_0 = arith.constant 0 : index
    %c0_1 = arith.constant 0 : index
    %0 = vector.load %arg2[%c0, %c0_0, %c0_1] : memref<1x1x128xf32, #tpu.memory_space<vmem>>, vector<1x1x128xf32>
    %cst = arith.constant 7.812500e-03 : f32
    %1 = vector.broadcast %cst : f32 to vector<1x1x128xf32>
    %2 = arith.mulf %0, %1 : vector<1x1x128xf32>
    %c0_2 = arith.constant 0 : index
    %c0_3 = arith.constant 0 : index
    %c0_4 = arith.constant 0 : index
    %3 = vector.load %arg3[%c0_2, %c0_3, %c0_4] : memref<1x1x128xf32, #tpu.memory_space<vmem>>, vector<1x1x128xf32>
    %cst_5 = arith.constant 7.812500e-03 : f32
    %4 = vector.broadcast %cst_5 : f32 to vector<1x1x128xf32>
    %5 = arith.mulf %3, %4 : vector<1x1x128xf32>
    %6 = arith.mulf %2, %2 : vector<1x1x128xf32>
    %7 = arith.subf %5, %6 : vector<1x1x128xf32>
    %cst_6 = arith.constant 0.000000e+00 : f32
    %8 = vector.broadcast %cst_6 : f32 to vector<1x1x128xf32>
    %9 = arith.maximumf %7, %8 : vector<1x1x128xf32>
    %cst_7 = arith.constant 9.99999974E-6 : f32
    %10 = vector.broadcast %cst_7 : f32 to vector<1x1x128xf32>
    %11 = arith.addf %9, %10 : vector<1x1x128xf32>
    %12 = math.rsqrt %11 : vector<1x1x128xf32>
    %c0_8 = arith.constant 0 : index
    %c0_9 = arith.constant 0 : index
    %c0_10 = arith.constant 0 : index
    %13 = vector.load %arg4[%c0_8, %c0_9, %c0_10] : memref<1x1x128xf32, #tpu.memory_space<vmem>>, vector<1x1x128xf32>
    %14 = arith.mulf %13, %12 : vector<1x1x128xf32>
    %c0_11 = arith.constant 0 : index
    %c0_12 = arith.constant 0 : index
    %c0_13 = arith.constant 0 : index
    %15 = vector.load %arg5[%c0_11, %c0_12, %c0_13] : memref<1x1x128xf32, #tpu.memory_space<vmem>>, vector<1x1x128xf32>
    %16 = arith.mulf %2, %14 : vector<1x1x128xf32>
    %17 = arith.subf %15, %16 : vector<1x1x128xf32>
    %c0_14 = arith.constant 0 : index
    %c0_15 = arith.constant 0 : index
    %c0_16 = arith.constant 0 : index
    %18 = vector.load %arg1[%c0_14, %c0_15, %c0_16] : memref<2x16x128xbf16, #tpu.memory_space<vmem>>, vector<2x16x128xbf16>
    %19 = arith.extf %18 : vector<2x16x128xbf16> to vector<2x16x128xf32>
    %20 = vector.broadcast %14 : vector<1x1x128xf32> to vector<2x16x128xf32>
    %21 = arith.mulf %19, %20 : vector<2x16x128xf32>
    %22 = vector.broadcast %17 : vector<1x1x128xf32> to vector<2x16x128xf32>
    %23 = arith.addf %21, %22 : vector<2x16x128xf32>
    %cst_17 = arith.constant 0.000000e+00 : f32
    %24 = vector.broadcast %cst_17 : f32 to vector<2x16x128xf32>
    %25 = arith.maximumf %23, %24 : vector<2x16x128xf32>
    %26 = tpu.iota {dimensions = array<i32: 1>} : vector<1x16x1xi32>
    %c16_i32 = arith.constant 16 : i32
    %27 = arith.muli %arg0, %c16_i32 : i32
    %28 = vector.broadcast %27 : i32 to vector<1x16x1xi32>
    %29 = arith.addi %26, %28 : vector<1x16x1xi32>
    %c64_i32 = arith.constant 64 : i32
    %30 = vector.broadcast %c64_i32 : i32 to vector<1x16x1xi32>
    %31 = arith.cmpi slt, %29, %30 : vector<1x16x1xi32>
    %cst_18 = arith.constant 0.000000e+00 : f32
    %32 = vector.shape_cast %31 : vector<1x16x1xi1> to vector<1x16x1xi1>
    %33 = vector.broadcast %32 : vector<1x16x1xi1> to vector<2x16x128xi1>
    %34 = vector.broadcast %cst_18 : f32 to vector<2x16x128xf32>
    %35 = arith.select %33, %25, %34 : vector<2x16x128xi1>, vector<2x16x128xf32>
    %c0_19 = arith.constant 0 : index
    %c0_20 = arith.constant 0 : index
    %c0_21 = arith.constant 0 : index
    %36 = vector.load %arg6[%c0_19, %c0_20, %c0_21] : memref<2x16x128xf32, #tpu.memory_space<vmem>>, vector<2x16x128xf32>
    tpu.vector_store %arg6[%c0_19, %c0_20, %c0_21], %35 {strides = array<i32>} : memref<2x16x128xf32, #tpu.memory_space<vmem>>, vector<2x16x128xf32>,
    %c0_22 = arith.constant 0 : index
    %c0_23 = arith.constant 0 : index
    %c0_24 = arith.constant 0 : index
    %37 = tpu.strided_load %arg6[%c0_22, %c0_23, %c0_24] {strides = array<i32: 1, 2, 1>} : memref<2x16x128xf32, #tpu.memory_space<vmem>>, vector<2x8x128xf32>
    %c0_25 = arith.constant 0 : index
    %c1 = arith.constant 1 : index
    %c0_26 = arith.constant 0 : index
    %38 = tpu.strided_load %arg6[%c0_25, %c1, %c0_26] {strides = array<i32: 1, 2, 1>} : memref<2x16x128xf32, #tpu.memory_space<vmem>>, vector<2x8x128xf32>
    %39 = arith.maximumf %37, %38 : vector<2x8x128xf32>
    %40 = arith.truncf %39 : vector<2x8x128xf32> to vector<2x8x128xbf16>
    %c0_27 = arith.constant 0 : index
    %c0_28 = arith.constant 0 : index
    %c0_29 = arith.constant 0 : index
    %41 = vector.load %arg7[%c0_27, %c0_28, %c0_29] : memref<2x8x128xbf16, #tpu.memory_space<vmem>>, vector<2x8x128xbf16>
    tpu.vector_store %arg7[%c0_27, %c0_28, %c0_29], %40 {strides = array<i32>} : memref<2x8x128xbf16, #tpu.memory_space<vmem>>, vector<2x8x128xbf16>,
    return
  }
  func.func @transform_0(%arg0: i32) -> (i32, i32, i32) {
    %c0_i32 = arith.constant 0 : i32
    %c0_i32_0 = arith.constant 0 : i32
    %c0_i32_1 = arith.constant 0 : i32
    return %c0_i32, %arg0, %c0_i32_0 : i32, i32, i32
  }
  func.func @transform_1(%arg0: i32) -> (i32, i32, i32) {
    %c0_i32 = arith.constant 0 : i32
    %c0_i32_0 = arith.constant 0 : i32
    %c0_i32_1 = arith.constant 0 : i32
    %c0_i32_2 = arith.constant 0 : i32
    return %c0_i32, %c0_i32_0, %c0_i32_1 : i32, i32, i32
  }
  func.func @transform_2(%arg0: i32) -> (i32, i32, i32) {
    %c0_i32 = arith.constant 0 : i32
    %c0_i32_0 = arith.constant 0 : i32
    %c0_i32_1 = arith.constant 0 : i32
    %c0_i32_2 = arith.constant 0 : i32
    return %c0_i32, %c0_i32_0, %c0_i32_1 : i32, i32, i32
  }
  func.func @transform_3(%arg0: i32) -> (i32, i32, i32) {
    %c0_i32 = arith.constant 0 : i32
    %c0_i32_0 = arith.constant 0 : i32
    %c0_i32_1 = arith.constant 0 : i32
    %c0_i32_2 = arith.constant 0 : i32
    return %c0_i32, %c0_i32_0, %c0_i32_1 : i32, i32, i32
  }
  func.func @transform_4(%arg0: i32) -> (i32, i32, i32) {
    %c0_i32 = arith.constant 0 : i32
    %c0_i32_0 = arith.constant 0 : i32
    %c0_i32_1 = arith.constant 0 : i32
    %c0_i32_2 = arith.constant 0 : i32
    return %c0_i32, %c0_i32_0, %c0_i32_1 : i32, i32, i32
  }
  func.func @transform_5(%arg0: i32) -> (i32, i32, i32) {
    %c0_i32 = arith.constant 0 : i32
    %c0_i32_0 = arith.constant 0 : i32
    %c0_i32_1 = arith.constant 0 : i32
    return %c0_i32, %arg0, %c0_i32_0 : i32, i32, i32
  }
  func.func @transform_6(%arg0: i32) -> (i32, i32, i32) {
    %c0_i32 = arith.constant 0 : i32
    %c0_i32_0 = arith.constant 0 : i32
    %c0_i32_1 = arith.constant 0 : i32
    return %c0_i32, %arg0, %c0_i32_0 : i32, i32, i32
  }
}

module attributes {stable_mosaic.version = 11 : i64} {
  func.func @_conv_bn_fused_kernel(%arg0: i32, %arg1: memref<2x16x128xbf16, #tpu.memory_space<vmem>>, %arg2: memref<2x8x128xbf16, #tpu.memory_space<vmem>>, %arg3: memref<2x8x128xbf16, #tpu.memory_space<vmem>>, %arg4: memref<3x128x128xbf16, #tpu.memory_space<vmem>>, %arg5: memref<1x1x128xf32, #tpu.memory_space<vmem>>, %arg6: memref<1x1x128xf32, #tpu.memory_space<vmem>>, %arg7: memref<1x1x128xf32, #tpu.memory_space<vmem>>, %arg8: memref<1x1x128xf32, #tpu.memory_space<vmem>>, %arg9: memref<2x16x128xbf16, #tpu.memory_space<vmem>>, %arg10: memref<1x1x128xf32, #tpu.memory_space<vmem>>, %arg11: memref<1x1x128xf32, #tpu.memory_space<vmem>>) attributes {dimension_semantics = [#tpu.dimension_semantics<parallel>], iteration_bounds = array<i64: 4>, scalar_prefetch = 0 : i64, scratch_operands = 0 : i64, tpu.core_type = #tpu.core_type<tc>, window_params = [{transform_indices = @transform_0, window_bounds = array<i64: 2, 16, 128>}, {transform_indices = @transform_1, window_bounds = array<i64: 2, 8, 128>}, {transform_indices = @transform_2, window_bounds = array<i64: 2, 8, 128>}, {pipeline_mode = #tpu.pipeline_mode<synchronous>, transform_indices = @transform_3, window_bounds = array<i64: 3, 128, 128>}, {pipeline_mode = #tpu.pipeline_mode<synchronous>, transform_indices = @transform_4, window_bounds = array<i64: 1, 1, 128>}, {pipeline_mode = #tpu.pipeline_mode<synchronous>, transform_indices = @transform_5, window_bounds = array<i64: 1, 1, 128>}, {pipeline_mode = #tpu.pipeline_mode<synchronous>, transform_indices = @transform_6, window_bounds = array<i64: 1, 1, 128>}, {pipeline_mode = #tpu.pipeline_mode<synchronous>, transform_indices = @transform_7, window_bounds = array<i64: 1, 1, 128>}, {transform_indices = @transform_8, window_bounds = array<i64: 2, 16, 128>}, {transform_indices = @transform_9, window_bounds = array<i64: 1, 1, 128>}, {transform_indices = @transform_10, window_bounds = array<i64: 1, 1, 128>}]} {
    %c0 = arith.constant 0 : index
    %c0_0 = arith.constant 0 : index
    %c0_1 = arith.constant 0 : index
    %0 = vector.load %arg5[%c0, %c0_0, %c0_1] : memref<1x1x128xf32, #tpu.memory_space<vmem>>, vector<1x1x128xf32>
    %cst = arith.constant 7.812500e-03 : f32
    %1 = vector.broadcast %cst : f32 to vector<1x1x128xf32>
    %2 = arith.mulf %0, %1 : vector<1x1x128xf32>
    %c0_2 = arith.constant 0 : index
    %c0_3 = arith.constant 0 : index
    %c0_4 = arith.constant 0 : index
    %3 = vector.load %arg6[%c0_2, %c0_3, %c0_4] : memref<1x1x128xf32, #tpu.memory_space<vmem>>, vector<1x1x128xf32>
    %cst_5 = arith.constant 7.812500e-03 : f32
    %4 = vector.broadcast %cst_5 : f32 to vector<1x1x128xf32>
    %5 = arith.mulf %3, %4 : vector<1x1x128xf32>
    %6 = arith.mulf %2, %2 : vector<1x1x128xf32>
    %7 = arith.subf %5, %6 : vector<1x1x128xf32>
    %cst_6 = arith.constant 0.000000e+00 : f32
    %8 = vector.broadcast %cst_6 : f32 to vector<1x1x128xf32>
    %9 = arith.maximumf %7, %8 : vector<1x1x128xf32>
    %cst_7 = arith.constant 9.99999974E-6 : f32
    %10 = vector.broadcast %cst_7 : f32 to vector<1x1x128xf32>
    %11 = arith.addf %9, %10 : vector<1x1x128xf32>
    %12 = math.rsqrt %11 : vector<1x1x128xf32>
    %c0_8 = arith.constant 0 : index
    %c0_9 = arith.constant 0 : index
    %c0_10 = arith.constant 0 : index
    %13 = vector.load %arg7[%c0_8, %c0_9, %c0_10] : memref<1x1x128xf32, #tpu.memory_space<vmem>>, vector<1x1x128xf32>
    %14 = arith.mulf %13, %12 : vector<1x1x128xf32>
    %c0_11 = arith.constant 0 : index
    %c0_12 = arith.constant 0 : index
    %c0_13 = arith.constant 0 : index
    %15 = vector.load %arg8[%c0_11, %c0_12, %c0_13] : memref<1x1x128xf32, #tpu.memory_space<vmem>>, vector<1x1x128xf32>
    %16 = arith.mulf %2, %14 : vector<1x1x128xf32>
    %17 = arith.subf %15, %16 : vector<1x1x128xf32>
    %c16_i32 = arith.constant 16 : i32
    %18 = arith.muli %arg0, %c16_i32 : i32
    %c0_14 = arith.constant 0 : index
    %c7 = arith.constant 7 : index
    %c0_15 = arith.constant 0 : index
    %19 = vector.load %arg2[%c0_14, %c7, %c0_15] : memref<2x8x128xbf16, #tpu.memory_space<vmem>>, vector<2x1x128xbf16>
    %c0_16 = arith.constant 0 : index
    %c0_17 = arith.constant 0 : index
    %c0_18 = arith.constant 0 : index
    %20 = vector.load %arg1[%c0_16, %c0_17, %c0_18] : memref<2x16x128xbf16, #tpu.memory_space<vmem>>, vector<2x16x128xbf16>
    %c0_19 = arith.constant 0 : index
    %c0_20 = arith.constant 0 : index
    %c0_21 = arith.constant 0 : index
    %21 = vector.load %arg3[%c0_19, %c0_20, %c0_21] : memref<2x8x128xbf16, #tpu.memory_space<vmem>>, vector<2x1x128xbf16>
    %22 = tpu.concatenate %19, %20, %21 in 1 : vector<2x1x128xbf16>, vector<2x16x128xbf16>, vector<2x1x128xbf16> -> vector<2x18x128xbf16>
    %23 = tpu.iota {dimensions = array<i32: 1>} : vector<1x18x1xi32>
    %c1_i32 = arith.constant 1 : i32
    %24 = arith.subi %18, %c1_i32 : i32
    %25 = vector.broadcast %24 : i32 to vector<1x18x1xi32>
    %26 = arith.addi %23, %25 : vector<1x18x1xi32>
    %c0_i32 = arith.constant 0 : i32
    %27 = vector.broadcast %c0_i32 : i32 to vector<1x18x1xi32>
    %28 = arith.cmpi sge, %26, %27 : vector<1x18x1xi32>
    %c64_i32 = arith.constant 64 : i32
    %29 = vector.broadcast %c64_i32 : i32 to vector<1x18x1xi32>
    %30 = arith.cmpi slt, %26, %29 : vector<1x18x1xi32>
    %31 = arith.andi %28, %30 : vector<1x18x1xi1>
    %32 = arith.extf %22 : vector<2x18x128xbf16> to vector<2x18x128xf32>
    %33 = vector.broadcast %14 : vector<1x1x128xf32> to vector<2x18x128xf32>
    %34 = arith.mulf %32, %33 : vector<2x18x128xf32>
    %35 = vector.broadcast %17 : vector<1x1x128xf32> to vector<2x18x128xf32>
    %36 = arith.addf %34, %35 : vector<2x18x128xf32>
    %cst_22 = arith.constant 0.000000e+00 : f32
    %37 = vector.broadcast %cst_22 : f32 to vector<2x18x128xf32>
    %38 = arith.maximumf %36, %37 : vector<2x18x128xf32>
    %cst_23 = arith.constant 0.000000e+00 : f32
    %39 = vector.shape_cast %31 : vector<1x18x1xi1> to vector<1x18x1xi1>
    %40 = vector.broadcast %39 : vector<1x18x1xi1> to vector<2x18x128xi1>
    %41 = vector.broadcast %cst_23 : f32 to vector<2x18x128xf32>
    %42 = arith.select %40, %38, %41 : vector<2x18x128xi1>, vector<2x18x128xf32>
    %43 = arith.truncf %42 : vector<2x18x128xf32> to vector<2x18x128xbf16>
    %44 = vector.extract_strided_slice %43 {offsets = [0, 0, 0], sizes = [2, 16, 128], strides = [1, 1, 1]} : vector<2x18x128xbf16> to vector<2x16x128xbf16>
    %45 = vector.shape_cast %44 : vector<2x16x128xbf16> to vector<32x128xbf16>
    %c0_24 = arith.constant 0 : index
    %c0_25 = arith.constant 0 : index
    %c0_26 = arith.constant 0 : index
    %46 = vector.load %arg4[%c0_24, %c0_25, %c0_26] : memref<3x128x128xbf16, #tpu.memory_space<vmem>>, vector<1x128x128xbf16>
    %47 = vector.shape_cast %46 : vector<1x128x128xbf16> to vector<128x128xbf16>
    %cst_27 = arith.constant dense<0.000000e+00> : vector<32x128xf32>
    %48 = tpu.matmul %45, %47, %cst_27 {dimension_numbers = #tpu.dot_dimension_numbers<[1], [0], [0], [1], [0, 0, 1, 1], [], []>} : vector<32x128xbf16>, vector<128x128xbf16>, vector<32x128xf32> -> vector<32x128xf32>
    %49 = vector.extract_strided_slice %43 {offsets = [0, 1, 0], sizes = [2, 16, 128], strides = [1, 1, 1]} : vector<2x18x128xbf16> to vector<2x16x128xbf16>
    %50 = vector.shape_cast %49 : vector<2x16x128xbf16> to vector<32x128xbf16>
    %c1 = arith.constant 1 : index
    %c0_28 = arith.constant 0 : index
    %c0_29 = arith.constant 0 : index
    %51 = vector.load %arg4[%c1, %c0_28, %c0_29] : memref<3x128x128xbf16, #tpu.memory_space<vmem>>, vector<1x128x128xbf16>
    %52 = vector.shape_cast %51 : vector<1x128x128xbf16> to vector<128x128xbf16>
    %cst_30 = arith.constant dense<0.000000e+00> : vector<32x128xf32>
    %53 = tpu.matmul %50, %52, %cst_30 {dimension_numbers = #tpu.dot_dimension_numbers<[1], [0], [0], [1], [0, 0, 1, 1], [], []>} : vector<32x128xbf16>, vector<128x128xbf16>, vector<32x128xf32> -> vector<32x128xf32>
    %54 = arith.addf %48, %53 : vector<32x128xf32>
    %55 = vector.extract_strided_slice %43 {offsets = [0, 2, 0], sizes = [2, 16, 128], strides = [1, 1, 1]} : vector<2x18x128xbf16> to vector<2x16x128xbf16>
    %56 = vector.shape_cast %55 : vector<2x16x128xbf16> to vector<32x128xbf16>
    %c2 = arith.constant 2 : index
    %c0_31 = arith.constant 0 : index
    %c0_32 = arith.constant 0 : index
    %57 = vector.load %arg4[%c2, %c0_31, %c0_32] : memref<3x128x128xbf16, #tpu.memory_space<vmem>>, vector<1x128x128xbf16>
    %58 = vector.shape_cast %57 : vector<1x128x128xbf16> to vector<128x128xbf16>
    %cst_33 = arith.constant dense<0.000000e+00> : vector<32x128xf32>
    %59 = tpu.matmul %56, %58, %cst_33 {dimension_numbers = #tpu.dot_dimension_numbers<[1], [0], [0], [1], [0, 0, 1, 1], [], []>} : vector<32x128xbf16>, vector<128x128xbf16>, vector<32x128xf32> -> vector<32x128xf32>
    %60 = arith.addf %54, %59 : vector<32x128xf32>
    %61 = vector.shape_cast %60 : vector<32x128xf32> to vector<2x16x128xf32>
    %62 = tpu.iota {dimensions = array<i32: 1>} : vector<1x16x1xi32>
    %63 = vector.broadcast %18 : i32 to vector<1x16x1xi32>
    %64 = arith.addi %62, %63 : vector<1x16x1xi32>
    %c64_i32_34 = arith.constant 64 : i32
    %65 = vector.broadcast %c64_i32_34 : i32 to vector<1x16x1xi32>
    %66 = arith.cmpi slt, %64, %65 : vector<1x16x1xi32>
    %cst_35 = arith.constant 0.000000e+00 : f32
    %67 = vector.shape_cast %66 : vector<1x16x1xi1> to vector<1x16x1xi1>
    %68 = vector.broadcast %67 : vector<1x16x1xi1> to vector<2x16x128xi1>
    %69 = vector.broadcast %cst_35 : f32 to vector<2x16x128xf32>
    %70 = arith.select %68, %61, %69 : vector<2x16x128xi1>, vector<2x16x128xf32>
    %cst_36 = arith.constant dense<0.000000e+00> : vector<128xf32>
    %71 = vector.multi_reduction <add>, %70, %cst_36 [0, 1] : vector<2x16x128xf32> to vector<128xf32>
    %72 = vector.shape_cast %71 : vector<128xf32> to vector<1x1x128xf32>
    %c0_37 = arith.constant 0 : index
    %c0_38 = arith.constant 0 : index
    %c0_39 = arith.constant 0 : index
    %73 = vector.load %arg10[%c0_37, %c0_38, %c0_39] : memref<1x1x128xf32, #tpu.memory_space<vmem>>, vector<1x1x128xf32>
    tpu.vector_store %arg10[%c0_37, %c0_38, %c0_39], %72 {strides = array<i32>} : memref<1x1x128xf32, #tpu.memory_space<vmem>>, vector<1x1x128xf32>,
    %74 = arith.mulf %70, %70 : vector<2x16x128xf32>
    %cst_40 = arith.constant dense<0.000000e+00> : vector<128xf32>
    %75 = vector.multi_reduction <add>, %74, %cst_40 [0, 1] : vector<2x16x128xf32> to vector<128xf32>
    %76 = vector.shape_cast %75 : vector<128xf32> to vector<1x1x128xf32>
    %c0_41 = arith.constant 0 : index
    %c0_42 = arith.constant 0 : index
    %c0_43 = arith.constant 0 : index
    %77 = vector.load %arg11[%c0_41, %c0_42, %c0_43] : memref<1x1x128xf32, #tpu.memory_space<vmem>>, vector<1x1x128xf32>
    tpu.vector_store %arg11[%c0_41, %c0_42, %c0_43], %76 {strides = array<i32>} : memref<1x1x128xf32, #tpu.memory_space<vmem>>, vector<1x1x128xf32>,
    %78 = arith.truncf %61 : vector<2x16x128xf32> to vector<2x16x128xbf16>
    %c0_44 = arith.constant 0 : index
    %c0_45 = arith.constant 0 : index
    %c0_46 = arith.constant 0 : index
    %79 = vector.load %arg9[%c0_44, %c0_45, %c0_46] : memref<2x16x128xbf16, #tpu.memory_space<vmem>>, vector<2x16x128xbf16>
    tpu.vector_store %arg9[%c0_44, %c0_45, %c0_46], %78 {strides = array<i32>} : memref<2x16x128xbf16, #tpu.memory_space<vmem>>, vector<2x16x128xbf16>,
    return
  }
  func.func @transform_0(%arg0: i32) -> (i32, i32, i32) {
    %c0_i32 = arith.constant 0 : i32
    %c0_i32_0 = arith.constant 0 : i32
    %c0_i32_1 = arith.constant 0 : i32
    return %c0_i32, %arg0, %c0_i32_0 : i32, i32, i32
  }
  func.func @transform_1(%arg0: i32) -> (i32, i32, i32) {
    %c2_i32 = arith.constant 2 : i32
    %0 = arith.muli %arg0, %c2_i32 : i32
    %c1_i32 = arith.constant 1 : i32
    %1 = arith.subi %0, %c1_i32 : i32
    %c0_i32 = arith.constant 0 : i32
    %2 = arith.maxsi %1, %c0_i32 : i32
    %c0_i32_0 = arith.constant 0 : i32
    %c0_i32_1 = arith.constant 0 : i32
    %c0_i32_2 = arith.constant 0 : i32
    return %c0_i32_0, %2, %c0_i32_1 : i32, i32, i32
  }
  func.func @transform_2(%arg0: i32) -> (i32, i32, i32) {
    %c1_i32 = arith.constant 1 : i32
    %0 = arith.addi %arg0, %c1_i32 : i32
    %c2_i32 = arith.constant 2 : i32
    %1 = arith.muli %0, %c2_i32 : i32
    %c7_i32 = arith.constant 7 : i32
    %2 = arith.minsi %1, %c7_i32 : i32
    %c0_i32 = arith.constant 0 : i32
    %c0_i32_0 = arith.constant 0 : i32
    %c0_i32_1 = arith.constant 0 : i32
    return %c0_i32, %2, %c0_i32_0 : i32, i32, i32
  }
  func.func @transform_3(%arg0: i32) -> (i32, i32, i32) {
    %c0_i32 = arith.constant 0 : i32
    %c0_i32_0 = arith.constant 0 : i32
    %c0_i32_1 = arith.constant 0 : i32
    %c0_i32_2 = arith.constant 0 : i32
    return %c0_i32, %c0_i32_0, %c0_i32_1 : i32, i32, i32
  }
  func.func @transform_4(%arg0: i32) -> (i32, i32, i32) {
    %c0_i32 = arith.constant 0 : i32
    %c0_i32_0 = arith.constant 0 : i32
    %c0_i32_1 = arith.constant 0 : i32
    %c0_i32_2 = arith.constant 0 : i32
    return %c0_i32, %c0_i32_0, %c0_i32_1 : i32, i32, i32
  }
  func.func @transform_5(%arg0: i32) -> (i32, i32, i32) {
    %c0_i32 = arith.constant 0 : i32
    %c0_i32_0 = arith.constant 0 : i32
    %c0_i32_1 = arith.constant 0 : i32
    %c0_i32_2 = arith.constant 0 : i32
    return %c0_i32, %c0_i32_0, %c0_i32_1 : i32, i32, i32
  }
  func.func @transform_6(%arg0: i32) -> (i32, i32, i32) {
    %c0_i32 = arith.constant 0 : i32
    %c0_i32_0 = arith.constant 0 : i32
    %c0_i32_1 = arith.constant 0 : i32
    %c0_i32_2 = arith.constant 0 : i32
    return %c0_i32, %c0_i32_0, %c0_i32_1 : i32, i32, i32
  }
  func.func @transform_7(%arg0: i32) -> (i32, i32, i32) {
    %c0_i32 = arith.constant 0 : i32
    %c0_i32_0 = arith.constant 0 : i32
    %c0_i32_1 = arith.constant 0 : i32
    %c0_i32_2 = arith.constant 0 : i32
    return %c0_i32, %c0_i32_0, %c0_i32_1 : i32, i32, i32
  }
  func.func @transform_8(%arg0: i32) -> (i32, i32, i32) {
    %c0_i32 = arith.constant 0 : i32
    %c0_i32_0 = arith.constant 0 : i32
    %c0_i32_1 = arith.constant 0 : i32
    return %c0_i32, %arg0, %c0_i32_0 : i32, i32, i32
  }
  func.func @transform_9(%arg0: i32) -> (i32, i32, i32) {
    %c0_i32 = arith.constant 0 : i32
    %c0_i32_0 = arith.constant 0 : i32
    %c0_i32_1 = arith.constant 0 : i32
    return %arg0, %c0_i32, %c0_i32_0 : i32, i32, i32
  }
  func.func @transform_10(%arg0: i32) -> (i32, i32, i32) {
    %c0_i32 = arith.constant 0 : i32
    %c0_i32_0 = arith.constant 0 : i32
    %c0_i32_1 = arith.constant 0 : i32
    return %arg0, %c0_i32, %c0_i32_0 : i32, i32, i32
  }
}

module attributes {stable_mosaic.version = 11 : i64} {
  func.func @_conv_kernel(%arg0: i32, %arg1: memref<2x24x128xbf16, #tpu.memory_space<vmem>>, %arg2: memref<2x8x128xbf16, #tpu.memory_space<vmem>>, %arg3: memref<2x8x128xbf16, #tpu.memory_space<vmem>>, %arg4: memref<3x128x128xbf16, #tpu.memory_space<vmem>>, %arg5: memref<2x24x128xbf16, #tpu.memory_space<vmem>>, %arg6: memref<1x1x128xf32, #tpu.memory_space<vmem>>, %arg7: memref<1x1x128xf32, #tpu.memory_space<vmem>>) attributes {dimension_semantics = [#tpu.dimension_semantics<parallel>], iteration_bounds = array<i64: 2>, scalar_prefetch = 0 : i64, scratch_operands = 0 : i64, tpu.core_type = #tpu.core_type<tc>, window_params = [{transform_indices = @transform_0, window_bounds = array<i64: 2, 24, 128>}, {transform_indices = @transform_1, window_bounds = array<i64: 2, 8, 128>}, {transform_indices = @transform_2, window_bounds = array<i64: 2, 8, 128>}, {pipeline_mode = #tpu.pipeline_mode<synchronous>, transform_indices = @transform_3, window_bounds = array<i64: 3, 128, 128>}, {transform_indices = @transform_4, window_bounds = array<i64: 2, 24, 128>}, {transform_indices = @transform_5, window_bounds = array<i64: 1, 1, 128>}, {transform_indices = @transform_6, window_bounds = array<i64: 1, 1, 128>}]} {
    %c24_i32 = arith.constant 24 : i32
    %0 = arith.muli %arg0, %c24_i32 : i32
    %c0 = arith.constant 0 : index
    %c7 = arith.constant 7 : index
    %c0_0 = arith.constant 0 : index
    %1 = vector.load %arg2[%c0, %c7, %c0_0] : memref<2x8x128xbf16, #tpu.memory_space<vmem>>, vector<2x1x128xbf16>
    %c0_1 = arith.constant 0 : index
    %c0_2 = arith.constant 0 : index
    %c0_3 = arith.constant 0 : index
    %2 = vector.load %arg1[%c0_1, %c0_2, %c0_3] : memref<2x24x128xbf16, #tpu.memory_space<vmem>>, vector<2x24x128xbf16>
    %c0_4 = arith.constant 0 : index
    %c0_5 = arith.constant 0 : index
    %c0_6 = arith.constant 0 : index
    %3 = vector.load %arg3[%c0_4, %c0_5, %c0_6] : memref<2x8x128xbf16, #tpu.memory_space<vmem>>, vector<2x1x128xbf16>
    %4 = tpu.concatenate %1, %2, %3 in 1 : vector<2x1x128xbf16>, vector<2x24x128xbf16>, vector<2x1x128xbf16> -> vector<2x26x128xbf16>
    %5 = tpu.iota {dimensions = array<i32: 1>} : vector<1x26x1xi32>
    %c1_i32 = arith.constant 1 : i32
    %6 = arith.subi %0, %c1_i32 : i32
    %7 = vector.broadcast %6 : i32 to vector<1x26x1xi32>
    %8 = arith.addi %5, %7 : vector<1x26x1xi32>
    %c0_i32 = arith.constant 0 : i32
    %9 = vector.broadcast %c0_i32 : i32 to vector<1x26x1xi32>
    %10 = arith.cmpi sge, %8, %9 : vector<1x26x1xi32>
    %c32_i32 = arith.constant 32 : i32
    %11 = vector.broadcast %c32_i32 : i32 to vector<1x26x1xi32>
    %12 = arith.cmpi slt, %8, %11 : vector<1x26x1xi32>
    %13 = arith.andi %10, %12 : vector<1x26x1xi1>
    %cst = arith.constant 0.000000e+00 : f32
    %14 = arith.truncf %cst : f32 to bf16
    %15 = vector.shape_cast %13 : vector<1x26x1xi1> to vector<1x26x1xi1>
    %16 = vector.broadcast %15 : vector<1x26x1xi1> to vector<2x26x128xi1>
    %17 = vector.broadcast %14 : bf16 to vector<2x26x128xbf16>
    %18 = arith.select %16, %4, %17 : vector<2x26x128xi1>, vector<2x26x128xbf16>
    %19 = vector.extract_strided_slice %18 {offsets = [0, 0, 0], sizes = [2, 24, 128], strides = [1, 1, 1]} : vector<2x26x128xbf16> to vector<2x24x128xbf16>
    %20 = vector.shape_cast %19 : vector<2x24x128xbf16> to vector<48x128xbf16>
    %c0_7 = arith.constant 0 : index
    %c0_8 = arith.constant 0 : index
    %c0_9 = arith.constant 0 : index
    %21 = vector.load %arg4[%c0_7, %c0_8, %c0_9] : memref<3x128x128xbf16, #tpu.memory_space<vmem>>, vector<1x128x128xbf16>
    %22 = vector.shape_cast %21 : vector<1x128x128xbf16> to vector<128x128xbf16>
    %cst_10 = arith.constant dense<0.000000e+00> : vector<48x128xf32>
    %23 = tpu.matmul %20, %22, %cst_10 {dimension_numbers = #tpu.dot_dimension_numbers<[1], [0], [0], [1], [0, 0, 1, 1], [], []>} : vector<48x128xbf16>, vector<128x128xbf16>, vector<48x128xf32> -> vector<48x128xf32>
    %24 = vector.extract_strided_slice %18 {offsets = [0, 1, 0], sizes = [2, 24, 128], strides = [1, 1, 1]} : vector<2x26x128xbf16> to vector<2x24x128xbf16>
    %25 = vector.shape_cast %24 : vector<2x24x128xbf16> to vector<48x128xbf16>
    %c1 = arith.constant 1 : index
    %c0_11 = arith.constant 0 : index
    %c0_12 = arith.constant 0 : index
    %26 = vector.load %arg4[%c1, %c0_11, %c0_12] : memref<3x128x128xbf16, #tpu.memory_space<vmem>>, vector<1x128x128xbf16>
    %27 = vector.shape_cast %26 : vector<1x128x128xbf16> to vector<128x128xbf16>
    %cst_13 = arith.constant dense<0.000000e+00> : vector<48x128xf32>
    %28 = tpu.matmul %25, %27, %cst_13 {dimension_numbers = #tpu.dot_dimension_numbers<[1], [0], [0], [1], [0, 0, 1, 1], [], []>} : vector<48x128xbf16>, vector<128x128xbf16>, vector<48x128xf32> -> vector<48x128xf32>
    %29 = arith.addf %23, %28 : vector<48x128xf32>
    %30 = vector.extract_strided_slice %18 {offsets = [0, 2, 0], sizes = [2, 24, 128], strides = [1, 1, 1]} : vector<2x26x128xbf16> to vector<2x24x128xbf16>
    %31 = vector.shape_cast %30 : vector<2x24x128xbf16> to vector<48x128xbf16>
    %c2 = arith.constant 2 : index
    %c0_14 = arith.constant 0 : index
    %c0_15 = arith.constant 0 : index
    %32 = vector.load %arg4[%c2, %c0_14, %c0_15] : memref<3x128x128xbf16, #tpu.memory_space<vmem>>, vector<1x128x128xbf16>
    %33 = vector.shape_cast %32 : vector<1x128x128xbf16> to vector<128x128xbf16>
    %cst_16 = arith.constant dense<0.000000e+00> : vector<48x128xf32>
    %34 = tpu.matmul %31, %33, %cst_16 {dimension_numbers = #tpu.dot_dimension_numbers<[1], [0], [0], [1], [0, 0, 1, 1], [], []>} : vector<48x128xbf16>, vector<128x128xbf16>, vector<48x128xf32> -> vector<48x128xf32>
    %35 = arith.addf %29, %34 : vector<48x128xf32>
    %36 = vector.shape_cast %35 : vector<48x128xf32> to vector<2x24x128xf32>
    %37 = tpu.iota {dimensions = array<i32: 1>} : vector<1x24x1xi32>
    %38 = vector.broadcast %0 : i32 to vector<1x24x1xi32>
    %39 = arith.addi %37, %38 : vector<1x24x1xi32>
    %c32_i32_17 = arith.constant 32 : i32
    %40 = vector.broadcast %c32_i32_17 : i32 to vector<1x24x1xi32>
    %41 = arith.cmpi slt, %39, %40 : vector<1x24x1xi32>
    %cst_18 = arith.constant 0.000000e+00 : f32
    %42 = vector.shape_cast %41 : vector<1x24x1xi1> to vector<1x24x1xi1>
    %43 = vector.broadcast %42 : vector<1x24x1xi1> to vector<2x24x128xi1>
    %44 = vector.broadcast %cst_18 : f32 to vector<2x24x128xf32>
    %45 = arith.select %43, %36, %44 : vector<2x24x128xi1>, vector<2x24x128xf32>
    %cst_19 = arith.constant dense<0.000000e+00> : vector<128xf32>
    %46 = vector.multi_reduction <add>, %45, %cst_19 [0, 1] : vector<2x24x128xf32> to vector<128xf32>
    %47 = vector.shape_cast %46 : vector<128xf32> to vector<1x1x128xf32>
    %c0_20 = arith.constant 0 : index
    %c0_21 = arith.constant 0 : index
    %c0_22 = arith.constant 0 : index
    %48 = vector.load %arg6[%c0_20, %c0_21, %c0_22] : memref<1x1x128xf32, #tpu.memory_space<vmem>>, vector<1x1x128xf32>
    tpu.vector_store %arg6[%c0_20, %c0_21, %c0_22], %47 {strides = array<i32>} : memref<1x1x128xf32, #tpu.memory_space<vmem>>, vector<1x1x128xf32>,
    %49 = arith.mulf %45, %45 : vector<2x24x128xf32>
    %cst_23 = arith.constant dense<0.000000e+00> : vector<128xf32>
    %50 = vector.multi_reduction <add>, %49, %cst_23 [0, 1] : vector<2x24x128xf32> to vector<128xf32>
    %51 = vector.shape_cast %50 : vector<128xf32> to vector<1x1x128xf32>
    %c0_24 = arith.constant 0 : index
    %c0_25 = arith.constant 0 : index
    %c0_26 = arith.constant 0 : index
    %52 = vector.load %arg7[%c0_24, %c0_25, %c0_26] : memref<1x1x128xf32, #tpu.memory_space<vmem>>, vector<1x1x128xf32>
    tpu.vector_store %arg7[%c0_24, %c0_25, %c0_26], %51 {strides = array<i32>} : memref<1x1x128xf32, #tpu.memory_space<vmem>>, vector<1x1x128xf32>,
    %53 = arith.truncf %36 : vector<2x24x128xf32> to vector<2x24x128xbf16>
    %c0_27 = arith.constant 0 : index
    %c0_28 = arith.constant 0 : index
    %c0_29 = arith.constant 0 : index
    %54 = vector.load %arg5[%c0_27, %c0_28, %c0_29] : memref<2x24x128xbf16, #tpu.memory_space<vmem>>, vector<2x24x128xbf16>
    tpu.vector_store %arg5[%c0_27, %c0_28, %c0_29], %53 {strides = array<i32>} : memref<2x24x128xbf16, #tpu.memory_space<vmem>>, vector<2x24x128xbf16>,
    return
  }
  func.func @transform_0(%arg0: i32) -> (i32, i32, i32) {
    %c0_i32 = arith.constant 0 : i32
    %c0_i32_0 = arith.constant 0 : i32
    %c0_i32_1 = arith.constant 0 : i32
    return %c0_i32, %arg0, %c0_i32_0 : i32, i32, i32
  }
  func.func @transform_1(%arg0: i32) -> (i32, i32, i32) {
    %c3_i32 = arith.constant 3 : i32
    %0 = arith.muli %arg0, %c3_i32 : i32
    %c1_i32 = arith.constant 1 : i32
    %1 = arith.subi %0, %c1_i32 : i32
    %c0_i32 = arith.constant 0 : i32
    %2 = arith.maxsi %1, %c0_i32 : i32
    %c0_i32_0 = arith.constant 0 : i32
    %c0_i32_1 = arith.constant 0 : i32
    %c0_i32_2 = arith.constant 0 : i32
    return %c0_i32_0, %2, %c0_i32_1 : i32, i32, i32
  }
  func.func @transform_2(%arg0: i32) -> (i32, i32, i32) {
    %c1_i32 = arith.constant 1 : i32
    %0 = arith.addi %arg0, %c1_i32 : i32
    %c3_i32 = arith.constant 3 : i32
    %1 = arith.muli %0, %c3_i32 : i32
    %c5_i32 = arith.constant 5 : i32
    %2 = arith.minsi %1, %c5_i32 : i32
    %c0_i32 = arith.constant 0 : i32
    %c0_i32_0 = arith.constant 0 : i32
    %c0_i32_1 = arith.constant 0 : i32
    return %c0_i32, %2, %c0_i32_0 : i32, i32, i32
  }
  func.func @transform_3(%arg0: i32) -> (i32, i32, i32) {
    %c0_i32 = arith.constant 0 : i32
    %c0_i32_0 = arith.constant 0 : i32
    %c0_i32_1 = arith.constant 0 : i32
    %c0_i32_2 = arith.constant 0 : i32
    return %c0_i32, %c0_i32_0, %c0_i32_1 : i32, i32, i32
  }
  func.func @transform_4(%arg0: i32) -> (i32, i32, i32) {
    %c0_i32 = arith.constant 0 : i32
    %c0_i32_0 = arith.constant 0 : i32
    %c0_i32_1 = arith.constant 0 : i32
    return %c0_i32, %arg0, %c0_i32_0 : i32, i32, i32
  }
  func.func @transform_5(%arg0: i32) -> (i32, i32, i32) {
    %c0_i32 = arith.constant 0 : i32
    %c0_i32_0 = arith.constant 0 : i32
    %c0_i32_1 = arith.constant 0 : i32
    return %arg0, %c0_i32, %c0_i32_0 : i32, i32, i32
  }
  func.func @transform_6(%arg0: i32) -> (i32, i32, i32) {
    %c0_i32 = arith.constant 0 : i32
    %c0_i32_0 = arith.constant 0 : i32
    %c0_i32_1 = arith.constant 0 : i32
    return %arg0, %c0_i32, %c0_i32_0 : i32, i32, i32
  }
}

module attributes {stable_mosaic.version = 11 : i64} {
  func.func @_bn_relu_pool_kernel(%arg0: i32, %arg1: memref<2x24x128xbf16, #tpu.memory_space<vmem>>, %arg2: memref<1x1x128xf32, #tpu.memory_space<vmem>>, %arg3: memref<1x1x128xf32, #tpu.memory_space<vmem>>, %arg4: memref<1x1x128xf32, #tpu.memory_space<vmem>>, %arg5: memref<1x1x128xf32, #tpu.memory_space<vmem>>, %arg6: memref<2x24x128xf32, #tpu.memory_space<vmem>>, %arg7: memref<2x8x128xbf16, #tpu.memory_space<vmem>>) attributes {dimension_semantics = [#tpu.dimension_semantics<parallel>], iteration_bounds = array<i64: 2>, scalar_prefetch = 0 : i64, scratch_operands = 0 : i64, tpu.core_type = #tpu.core_type<tc>, window_params = [{transform_indices = @transform_0, window_bounds = array<i64: 2, 24, 128>}, {pipeline_mode = #tpu.pipeline_mode<synchronous>, transform_indices = @transform_1, window_bounds = array<i64: 1, 1, 128>}, {pipeline_mode = #tpu.pipeline_mode<synchronous>, transform_indices = @transform_2, window_bounds = array<i64: 1, 1, 128>}, {pipeline_mode = #tpu.pipeline_mode<synchronous>, transform_indices = @transform_3, window_bounds = array<i64: 1, 1, 128>}, {pipeline_mode = #tpu.pipeline_mode<synchronous>, transform_indices = @transform_4, window_bounds = array<i64: 1, 1, 128>}, {transform_indices = @transform_5, window_bounds = array<i64: 2, 24, 128>}, {transform_indices = @transform_6, window_bounds = array<i64: 2, 8, 128>}]} {
    %c0 = arith.constant 0 : index
    %c0_0 = arith.constant 0 : index
    %c0_1 = arith.constant 0 : index
    %0 = vector.load %arg2[%c0, %c0_0, %c0_1] : memref<1x1x128xf32, #tpu.memory_space<vmem>>, vector<1x1x128xf32>
    %cst = arith.constant 1.562500e-02 : f32
    %1 = vector.broadcast %cst : f32 to vector<1x1x128xf32>
    %2 = arith.mulf %0, %1 : vector<1x1x128xf32>
    %c0_2 = arith.constant 0 : index
    %c0_3 = arith.constant 0 : index
    %c0_4 = arith.constant 0 : index
    %3 = vector.load %arg3[%c0_2, %c0_3, %c0_4] : memref<1x1x128xf32, #tpu.memory_space<vmem>>, vector<1x1x128xf32>
    %cst_5 = arith.constant 1.562500e-02 : f32
    %4 = vector.broadcast %cst_5 : f32 to vector<1x1x128xf32>
    %5 = arith.mulf %3, %4 : vector<1x1x128xf32>
    %6 = arith.mulf %2, %2 : vector<1x1x128xf32>
    %7 = arith.subf %5, %6 : vector<1x1x128xf32>
    %cst_6 = arith.constant 0.000000e+00 : f32
    %8 = vector.broadcast %cst_6 : f32 to vector<1x1x128xf32>
    %9 = arith.maximumf %7, %8 : vector<1x1x128xf32>
    %cst_7 = arith.constant 9.99999974E-6 : f32
    %10 = vector.broadcast %cst_7 : f32 to vector<1x1x128xf32>
    %11 = arith.addf %9, %10 : vector<1x1x128xf32>
    %12 = math.rsqrt %11 : vector<1x1x128xf32>
    %c0_8 = arith.constant 0 : index
    %c0_9 = arith.constant 0 : index
    %c0_10 = arith.constant 0 : index
    %13 = vector.load %arg4[%c0_8, %c0_9, %c0_10] : memref<1x1x128xf32, #tpu.memory_space<vmem>>, vector<1x1x128xf32>
    %14 = arith.mulf %13, %12 : vector<1x1x128xf32>
    %c0_11 = arith.constant 0 : index
    %c0_12 = arith.constant 0 : index
    %c0_13 = arith.constant 0 : index
    %15 = vector.load %arg5[%c0_11, %c0_12, %c0_13] : memref<1x1x128xf32, #tpu.memory_space<vmem>>, vector<1x1x128xf32>
    %16 = arith.mulf %2, %14 : vector<1x1x128xf32>
    %17 = arith.subf %15, %16 : vector<1x1x128xf32>
    %c0_14 = arith.constant 0 : index
    %c0_15 = arith.constant 0 : index
    %c0_16 = arith.constant 0 : index
    %18 = vector.load %arg1[%c0_14, %c0_15, %c0_16] : memref<2x24x128xbf16, #tpu.memory_space<vmem>>, vector<2x24x128xbf16>
    %19 = arith.extf %18 : vector<2x24x128xbf16> to vector<2x24x128xf32>
    %20 = vector.broadcast %14 : vector<1x1x128xf32> to vector<2x24x128xf32>
    %21 = arith.mulf %19, %20 : vector<2x24x128xf32>
    %22 = vector.broadcast %17 : vector<1x1x128xf32> to vector<2x24x128xf32>
    %23 = arith.addf %21, %22 : vector<2x24x128xf32>
    %cst_17 = arith.constant 0.000000e+00 : f32
    %24 = vector.broadcast %cst_17 : f32 to vector<2x24x128xf32>
    %25 = arith.maximumf %23, %24 : vector<2x24x128xf32>
    %26 = tpu.iota {dimensions = array<i32: 1>} : vector<1x24x1xi32>
    %c24_i32 = arith.constant 24 : i32
    %27 = arith.muli %arg0, %c24_i32 : i32
    %28 = vector.broadcast %27 : i32 to vector<1x24x1xi32>
    %29 = arith.addi %26, %28 : vector<1x24x1xi32>
    %c32_i32 = arith.constant 32 : i32
    %30 = vector.broadcast %c32_i32 : i32 to vector<1x24x1xi32>
    %31 = arith.cmpi slt, %29, %30 : vector<1x24x1xi32>
    %cst_18 = arith.constant 0.000000e+00 : f32
    %32 = vector.shape_cast %31 : vector<1x24x1xi1> to vector<1x24x1xi1>
    %33 = vector.broadcast %32 : vector<1x24x1xi1> to vector<2x24x128xi1>
    %34 = vector.broadcast %cst_18 : f32 to vector<2x24x128xf32>
    %35 = arith.select %33, %25, %34 : vector<2x24x128xi1>, vector<2x24x128xf32>
    %c0_19 = arith.constant 0 : index
    %c0_20 = arith.constant 0 : index
    %c0_21 = arith.constant 0 : index
    %36 = vector.load %arg6[%c0_19, %c0_20, %c0_21] : memref<2x24x128xf32, #tpu.memory_space<vmem>>, vector<2x24x128xf32>
    tpu.vector_store %arg6[%c0_19, %c0_20, %c0_21], %35 {strides = array<i32>} : memref<2x24x128xf32, #tpu.memory_space<vmem>>, vector<2x24x128xf32>,
    %c0_22 = arith.constant 0 : index
    %c0_23 = arith.constant 0 : index
    %c0_24 = arith.constant 0 : index
    %37 = tpu.strided_load %arg6[%c0_22, %c0_23, %c0_24] {strides = array<i32: 1, 3, 1>} : memref<2x24x128xf32, #tpu.memory_space<vmem>>, vector<2x8x128xf32>
    %c0_25 = arith.constant 0 : index
    %c1 = arith.constant 1 : index
    %c0_26 = arith.constant 0 : index
    %38 = tpu.strided_load %arg6[%c0_25, %c1, %c0_26] {strides = array<i32: 1, 3, 1>} : memref<2x24x128xf32, #tpu.memory_space<vmem>>, vector<2x8x128xf32>
    %39 = arith.maximumf %37, %38 : vector<2x8x128xf32>
    %c0_27 = arith.constant 0 : index
    %c2 = arith.constant 2 : index
    %c0_28 = arith.constant 0 : index
    %40 = tpu.strided_load %arg6[%c0_27, %c2, %c0_28] {strides = array<i32: 1, 3, 1>} : memref<2x24x128xf32, #tpu.memory_space<vmem>>, vector<2x8x128xf32>
    %41 = arith.maximumf %39, %40 : vector<2x8x128xf32>
    %42 = arith.truncf %41 : vector<2x8x128xf32> to vector<2x8x128xbf16>
    %c0_29 = arith.constant 0 : index
    %c0_30 = arith.constant 0 : index
    %c0_31 = arith.constant 0 : index
    %43 = vector.load %arg7[%c0_29, %c0_30, %c0_31] : memref<2x8x128xbf16, #tpu.memory_space<vmem>>, vector<2x8x128xbf16>
    tpu.vector_store %arg7[%c0_29, %c0_30, %c0_31], %42 {strides = array<i32>} : memref<2x8x128xbf16, #tpu.memory_space<vmem>>, vector<2x8x128xbf16>,
    return
  }
  func.func @transform_0(%arg0: i32) -> (i32, i32, i32) {
    %c0_i32 = arith.constant 0 : i32
    %c0_i32_0 = arith.constant 0 : i32
    %c0_i32_1 = arith.constant 0 : i32
    return %c0_i32, %arg0, %c0_i32_0 : i32, i32, i32
  }
  func.func @transform_1(%arg0: i32) -> (i32, i32, i32) {
    %c0_i32 = arith.constant 0 : i32
    %c0_i32_0 = arith.constant 0 : i32
    %c0_i32_1 = arith.constant 0 : i32
    %c0_i32_2 = arith.constant 0 : i32
    return %c0_i32, %c0_i32_0, %c0_i32_1 : i32, i32, i32
  }
  func.func @transform_2(%arg0: i32) -> (i32, i32, i32) {
    %c0_i32 = arith.constant 0 : i32
    %c0_i32_0 = arith.constant 0 : i32
    %c0_i32_1 = arith.constant 0 : i32
    %c0_i32_2 = arith.constant 0 : i32
    return %c0_i32, %c0_i32_0, %c0_i32_1 : i32, i32, i32
  }
  func.func @transform_3(%arg0: i32) -> (i32, i32, i32) {
    %c0_i32 = arith.constant 0 : i32
    %c0_i32_0 = arith.constant 0 : i32
    %c0_i32_1 = arith.constant 0 : i32
    %c0_i32_2 = arith.constant 0 : i32
    return %c0_i32, %c0_i32_0, %c0_i32_1 : i32, i32, i32
  }
  func.func @transform_4(%arg0: i32) -> (i32, i32, i32) {
    %c0_i32 = arith.constant 0 : i32
    %c0_i32_0 = arith.constant 0 : i32
    %c0_i32_1 = arith.constant 0 : i32
    %c0_i32_2 = arith.constant 0 : i32
    return %c0_i32, %c0_i32_0, %c0_i32_1 : i32, i32, i32
  }
  func.func @transform_5(%arg0: i32) -> (i32, i32, i32) {
    %c0_i32 = arith.constant 0 : i32
    %c0_i32_0 = arith.constant 0 : i32
    %c0_i32_1 = arith.constant 0 : i32
    return %c0_i32, %arg0, %c0_i32_0 : i32, i32, i32
  }
  func.func @transform_6(%arg0: i32) -> (i32, i32, i32) {
    %c0_i32 = arith.constant 0 : i32
    %c0_i32_0 = arith.constant 0 : i32
    %c0_i32_1 = arith.constant 0 : i32
    return %c0_i32, %arg0, %c0_i32_0 : i32, i32, i32
  }
}

module attributes {stable_mosaic.version = 11 : i64} {
  func.func @_conv_kernel(%arg0: i32, %arg1: memref<2x16x128xbf16, #tpu.memory_space<vmem>>, %arg2: memref<2x8x128xbf16, #tpu.memory_space<vmem>>, %arg3: memref<2x8x128xbf16, #tpu.memory_space<vmem>>, %arg4: memref<3x128x128xbf16, #tpu.memory_space<vmem>>, %arg5: memref<2x16x128xbf16, #tpu.memory_space<vmem>>, %arg6: memref<1x1x128xf32, #tpu.memory_space<vmem>>, %arg7: memref<1x1x128xf32, #tpu.memory_space<vmem>>) attributes {dimension_semantics = [#tpu.dimension_semantics<parallel>], iteration_bounds = array<i64: 1>, scalar_prefetch = 0 : i64, scratch_operands = 0 : i64, tpu.core_type = #tpu.core_type<tc>, window_params = [{transform_indices = @transform_0, window_bounds = array<i64: 2, 16, 128>}, {transform_indices = @transform_1, window_bounds = array<i64: 2, 8, 128>}, {transform_indices = @transform_2, window_bounds = array<i64: 2, 8, 128>}, {pipeline_mode = #tpu.pipeline_mode<synchronous>, transform_indices = @transform_3, window_bounds = array<i64: 3, 128, 128>}, {transform_indices = @transform_4, window_bounds = array<i64: 2, 16, 128>}, {transform_indices = @transform_5, window_bounds = array<i64: 1, 1, 128>}, {transform_indices = @transform_6, window_bounds = array<i64: 1, 1, 128>}]} {
    %c16_i32 = arith.constant 16 : i32
    %0 = arith.muli %arg0, %c16_i32 : i32
    %c0 = arith.constant 0 : index
    %c7 = arith.constant 7 : index
    %c0_0 = arith.constant 0 : index
    %1 = vector.load %arg2[%c0, %c7, %c0_0] : memref<2x8x128xbf16, #tpu.memory_space<vmem>>, vector<2x1x128xbf16>
    %c0_1 = arith.constant 0 : index
    %c0_2 = arith.constant 0 : index
    %c0_3 = arith.constant 0 : index
    %2 = vector.load %arg1[%c0_1, %c0_2, %c0_3] : memref<2x16x128xbf16, #tpu.memory_space<vmem>>, vector<2x16x128xbf16>
    %c0_4 = arith.constant 0 : index
    %c0_5 = arith.constant 0 : index
    %c0_6 = arith.constant 0 : index
    %3 = vector.load %arg3[%c0_4, %c0_5, %c0_6] : memref<2x8x128xbf16, #tpu.memory_space<vmem>>, vector<2x1x128xbf16>
    %4 = tpu.concatenate %1, %2, %3 in 1 : vector<2x1x128xbf16>, vector<2x16x128xbf16>, vector<2x1x128xbf16> -> vector<2x18x128xbf16>
    %5 = tpu.iota {dimensions = array<i32: 1>} : vector<1x18x1xi32>
    %c1_i32 = arith.constant 1 : i32
    %6 = arith.subi %0, %c1_i32 : i32
    %7 = vector.broadcast %6 : i32 to vector<1x18x1xi32>
    %8 = arith.addi %5, %7 : vector<1x18x1xi32>
    %c0_i32 = arith.constant 0 : i32
    %9 = vector.broadcast %c0_i32 : i32 to vector<1x18x1xi32>
    %10 = arith.cmpi sge, %8, %9 : vector<1x18x1xi32>
    %c11_i32 = arith.constant 11 : i32
    %11 = vector.broadcast %c11_i32 : i32 to vector<1x18x1xi32>
    %12 = arith.cmpi slt, %8, %11 : vector<1x18x1xi32>
    %13 = arith.andi %10, %12 : vector<1x18x1xi1>
    %cst = arith.constant 0.000000e+00 : f32
    %14 = arith.truncf %cst : f32 to bf16
    %15 = vector.shape_cast %13 : vector<1x18x1xi1> to vector<1x18x1xi1>
    %16 = vector.broadcast %15 : vector<1x18x1xi1> to vector<2x18x128xi1>
    %17 = vector.broadcast %14 : bf16 to vector<2x18x128xbf16>
    %18 = arith.select %16, %4, %17 : vector<2x18x128xi1>, vector<2x18x128xbf16>
    %19 = vector.extract_strided_slice %18 {offsets = [0, 0, 0], sizes = [2, 16, 128], strides = [1, 1, 1]} : vector<2x18x128xbf16> to vector<2x16x128xbf16>
    %20 = vector.shape_cast %19 : vector<2x16x128xbf16> to vector<32x128xbf16>
    %c0_7 = arith.constant 0 : index
    %c0_8 = arith.constant 0 : index
    %c0_9 = arith.constant 0 : index
    %21 = vector.load %arg4[%c0_7, %c0_8, %c0_9] : memref<3x128x128xbf16, #tpu.memory_space<vmem>>, vector<1x128x128xbf16>
    %22 = vector.shape_cast %21 : vector<1x128x128xbf16> to vector<128x128xbf16>
    %cst_10 = arith.constant dense<0.000000e+00> : vector<32x128xf32>
    %23 = tpu.matmul %20, %22, %cst_10 {dimension_numbers = #tpu.dot_dimension_numbers<[1], [0], [0], [1], [0, 0, 1, 1], [], []>} : vector<32x128xbf16>, vector<128x128xbf16>, vector<32x128xf32> -> vector<32x128xf32>
    %24 = vector.extract_strided_slice %18 {offsets = [0, 1, 0], sizes = [2, 16, 128], strides = [1, 1, 1]} : vector<2x18x128xbf16> to vector<2x16x128xbf16>
    %25 = vector.shape_cast %24 : vector<2x16x128xbf16> to vector<32x128xbf16>
    %c1 = arith.constant 1 : index
    %c0_11 = arith.constant 0 : index
    %c0_12 = arith.constant 0 : index
    %26 = vector.load %arg4[%c1, %c0_11, %c0_12] : memref<3x128x128xbf16, #tpu.memory_space<vmem>>, vector<1x128x128xbf16>
    %27 = vector.shape_cast %26 : vector<1x128x128xbf16> to vector<128x128xbf16>
    %cst_13 = arith.constant dense<0.000000e+00> : vector<32x128xf32>
    %28 = tpu.matmul %25, %27, %cst_13 {dimension_numbers = #tpu.dot_dimension_numbers<[1], [0], [0], [1], [0, 0, 1, 1], [], []>} : vector<32x128xbf16>, vector<128x128xbf16>, vector<32x128xf32> -> vector<32x128xf32>
    %29 = arith.addf %23, %28 : vector<32x128xf32>
    %30 = vector.extract_strided_slice %18 {offsets = [0, 2, 0], sizes = [2, 16, 128], strides = [1, 1, 1]} : vector<2x18x128xbf16> to vector<2x16x128xbf16>
    %31 = vector.shape_cast %30 : vector<2x16x128xbf16> to vector<32x128xbf16>
    %c2 = arith.constant 2 : index
    %c0_14 = arith.constant 0 : index
    %c0_15 = arith.constant 0 : index
    %32 = vector.load %arg4[%c2, %c0_14, %c0_15] : memref<3x128x128xbf16, #tpu.memory_space<vmem>>, vector<1x128x128xbf16>
    %33 = vector.shape_cast %32 : vector<1x128x128xbf16> to vector<128x128xbf16>
    %cst_16 = arith.constant dense<0.000000e+00> : vector<32x128xf32>
    %34 = tpu.matmul %31, %33, %cst_16 {dimension_numbers = #tpu.dot_dimension_numbers<[1], [0], [0], [1], [0, 0, 1, 1], [], []>} : vector<32x128xbf16>, vector<128x128xbf16>, vector<32x128xf32> -> vector<32x128xf32>
    %35 = arith.addf %29, %34 : vector<32x128xf32>
    %36 = vector.shape_cast %35 : vector<32x128xf32> to vector<2x16x128xf32>
    %37 = tpu.iota {dimensions = array<i32: 1>} : vector<1x16x1xi32>
    %38 = vector.broadcast %0 : i32 to vector<1x16x1xi32>
    %39 = arith.addi %37, %38 : vector<1x16x1xi32>
    %c11_i32_17 = arith.constant 11 : i32
    %40 = vector.broadcast %c11_i32_17 : i32 to vector<1x16x1xi32>
    %41 = arith.cmpi slt, %39, %40 : vector<1x16x1xi32>
    %cst_18 = arith.constant 0.000000e+00 : f32
    %42 = vector.shape_cast %41 : vector<1x16x1xi1> to vector<1x16x1xi1>
    %43 = vector.broadcast %42 : vector<1x16x1xi1> to vector<2x16x128xi1>
    %44 = vector.broadcast %cst_18 : f32 to vector<2x16x128xf32>
    %45 = arith.select %43, %36, %44 : vector<2x16x128xi1>, vector<2x16x128xf32>
    %cst_19 = arith.constant dense<0.000000e+00> : vector<128xf32>
    %46 = vector.multi_reduction <add>, %45, %cst_19 [0, 1] : vector<2x16x128xf32> to vector<128xf32>
    %47 = vector.shape_cast %46 : vector<128xf32> to vector<1x1x128xf32>
    %c0_20 = arith.constant 0 : index
    %c0_21 = arith.constant 0 : index
    %c0_22 = arith.constant 0 : index
    %48 = vector.load %arg6[%c0_20, %c0_21, %c0_22] : memref<1x1x128xf32, #tpu.memory_space<vmem>>, vector<1x1x128xf32>
    tpu.vector_store %arg6[%c0_20, %c0_21, %c0_22], %47 {strides = array<i32>} : memref<1x1x128xf32, #tpu.memory_space<vmem>>, vector<1x1x128xf32>,
    %49 = arith.mulf %45, %45 : vector<2x16x128xf32>
    %cst_23 = arith.constant dense<0.000000e+00> : vector<128xf32>
    %50 = vector.multi_reduction <add>, %49, %cst_23 [0, 1] : vector<2x16x128xf32> to vector<128xf32>
    %51 = vector.shape_cast %50 : vector<128xf32> to vector<1x1x128xf32>
    %c0_24 = arith.constant 0 : index
    %c0_25 = arith.constant 0 : index
    %c0_26 = arith.constant 0 : index
    %52 = vector.load %arg7[%c0_24, %c0_25, %c0_26] : memref<1x1x128xf32, #tpu.memory_space<vmem>>, vector<1x1x128xf32>
    tpu.vector_store %arg7[%c0_24, %c0_25, %c0_26], %51 {strides = array<i32>} : memref<1x1x128xf32, #tpu.memory_space<vmem>>, vector<1x1x128xf32>,
    %53 = arith.truncf %36 : vector<2x16x128xf32> to vector<2x16x128xbf16>
    %c0_27 = arith.constant 0 : index
    %c0_28 = arith.constant 0 : index
    %c0_29 = arith.constant 0 : index
    %54 = vector.load %arg5[%c0_27, %c0_28, %c0_29] : memref<2x16x128xbf16, #tpu.memory_space<vmem>>, vector<2x16x128xbf16>
    tpu.vector_store %arg5[%c0_27, %c0_28, %c0_29], %53 {strides = array<i32>} : memref<2x16x128xbf16, #tpu.memory_space<vmem>>, vector<2x16x128xbf16>,
    return
  }
  func.func @transform_0(%arg0: i32) -> (i32, i32, i32) {
    %c0_i32 = arith.constant 0 : i32
    %c0_i32_0 = arith.constant 0 : i32
    %c0_i32_1 = arith.constant 0 : i32
    return %c0_i32, %arg0, %c0_i32_0 : i32, i32, i32
  }
  func.func @transform_1(%arg0: i32) -> (i32, i32, i32) {
    %c2_i32 = arith.constant 2 : i32
    %0 = arith.muli %arg0, %c2_i32 : i32
    %c1_i32 = arith.constant 1 : i32
    %1 = arith.subi %0, %c1_i32 : i32
    %c0_i32 = arith.constant 0 : i32
    %2 = arith.maxsi %1, %c0_i32 : i32
    %c0_i32_0 = arith.constant 0 : i32
    %c0_i32_1 = arith.constant 0 : i32
    %c0_i32_2 = arith.constant 0 : i32
    return %c0_i32_0, %2, %c0_i32_1 : i32, i32, i32
  }
  func.func @transform_2(%arg0: i32) -> (i32, i32, i32) {
    %c1_i32 = arith.constant 1 : i32
    %0 = arith.addi %arg0, %c1_i32 : i32
    %c2_i32 = arith.constant 2 : i32
    %1 = arith.muli %0, %c2_i32 : i32
    %c1_i32_0 = arith.constant 1 : i32
    %2 = arith.minsi %1, %c1_i32_0 : i32
    %c0_i32 = arith.constant 0 : i32
    %c0_i32_1 = arith.constant 0 : i32
    %c0_i32_2 = arith.constant 0 : i32
    return %c0_i32, %2, %c0_i32_1 : i32, i32, i32
  }
  func.func @transform_3(%arg0: i32) -> (i32, i32, i32) {
    %c0_i32 = arith.constant 0 : i32
    %c0_i32_0 = arith.constant 0 : i32
    %c0_i32_1 = arith.constant 0 : i32
    %c0_i32_2 = arith.constant 0 : i32
    return %c0_i32, %c0_i32_0, %c0_i32_1 : i32, i32, i32
  }
  func.func @transform_4(%arg0: i32) -> (i32, i32, i32) {
    %c0_i32 = arith.constant 0 : i32
    %c0_i32_0 = arith.constant 0 : i32
    %c0_i32_1 = arith.constant 0 : i32
    return %c0_i32, %arg0, %c0_i32_0 : i32, i32, i32
  }
  func.func @transform_5(%arg0: i32) -> (i32, i32, i32) {
    %c0_i32 = arith.constant 0 : i32
    %c0_i32_0 = arith.constant 0 : i32
    %c0_i32_1 = arith.constant 0 : i32
    return %arg0, %c0_i32, %c0_i32_0 : i32, i32, i32
  }
  func.func @transform_6(%arg0: i32) -> (i32, i32, i32) {
    %c0_i32 = arith.constant 0 : i32
    %c0_i32_0 = arith.constant 0 : i32
    %c0_i32_1 = arith.constant 0 : i32
    return %arg0, %c0_i32, %c0_i32_0 : i32, i32, i32
  }
}

module attributes {stable_mosaic.version = 11 : i64} {
  func.func @_conv_bn_fused_kernel(%arg0: i32, %arg1: memref<2x16x128xbf16, #tpu.memory_space<vmem>>, %arg2: memref<2x8x128xbf16, #tpu.memory_space<vmem>>, %arg3: memref<2x8x128xbf16, #tpu.memory_space<vmem>>, %arg4: memref<3x128x128xbf16, #tpu.memory_space<vmem>>, %arg5: memref<1x1x128xf32, #tpu.memory_space<vmem>>, %arg6: memref<1x1x128xf32, #tpu.memory_space<vmem>>, %arg7: memref<1x1x128xf32, #tpu.memory_space<vmem>>, %arg8: memref<1x1x128xf32, #tpu.memory_space<vmem>>, %arg9: memref<2x16x128xbf16, #tpu.memory_space<vmem>>, %arg10: memref<1x1x128xf32, #tpu.memory_space<vmem>>, %arg11: memref<1x1x128xf32, #tpu.memory_space<vmem>>) attributes {dimension_semantics = [#tpu.dimension_semantics<parallel>], iteration_bounds = array<i64: 1>, scalar_prefetch = 0 : i64, scratch_operands = 0 : i64, tpu.core_type = #tpu.core_type<tc>, window_params = [{transform_indices = @transform_0, window_bounds = array<i64: 2, 16, 128>}, {transform_indices = @transform_1, window_bounds = array<i64: 2, 8, 128>}, {transform_indices = @transform_2, window_bounds = array<i64: 2, 8, 128>}, {pipeline_mode = #tpu.pipeline_mode<synchronous>, transform_indices = @transform_3, window_bounds = array<i64: 3, 128, 128>}, {pipeline_mode = #tpu.pipeline_mode<synchronous>, transform_indices = @transform_4, window_bounds = array<i64: 1, 1, 128>}, {pipeline_mode = #tpu.pipeline_mode<synchronous>, transform_indices = @transform_5, window_bounds = array<i64: 1, 1, 128>}, {pipeline_mode = #tpu.pipeline_mode<synchronous>, transform_indices = @transform_6, window_bounds = array<i64: 1, 1, 128>}, {pipeline_mode = #tpu.pipeline_mode<synchronous>, transform_indices = @transform_7, window_bounds = array<i64: 1, 1, 128>}, {transform_indices = @transform_8, window_bounds = array<i64: 2, 16, 128>}, {transform_indices = @transform_9, window_bounds = array<i64: 1, 1, 128>}, {transform_indices = @transform_10, window_bounds = array<i64: 1, 1, 128>}]} {
    %c0 = arith.constant 0 : index
    %c0_0 = arith.constant 0 : index
    %c0_1 = arith.constant 0 : index
    %0 = vector.load %arg5[%c0, %c0_0, %c0_1] : memref<1x1x128xf32, #tpu.memory_space<vmem>>, vector<1x1x128xf32>
    %cst = arith.constant 0.0454545468 : f32
    %1 = vector.broadcast %cst : f32 to vector<1x1x128xf32>
    %2 = arith.mulf %0, %1 : vector<1x1x128xf32>
    %c0_2 = arith.constant 0 : index
    %c0_3 = arith.constant 0 : index
    %c0_4 = arith.constant 0 : index
    %3 = vector.load %arg6[%c0_2, %c0_3, %c0_4] : memref<1x1x128xf32, #tpu.memory_space<vmem>>, vector<1x1x128xf32>
    %cst_5 = arith.constant 0.0454545468 : f32
    %4 = vector.broadcast %cst_5 : f32 to vector<1x1x128xf32>
    %5 = arith.mulf %3, %4 : vector<1x1x128xf32>
    %6 = arith.mulf %2, %2 : vector<1x1x128xf32>
    %7 = arith.subf %5, %6 : vector<1x1x128xf32>
    %cst_6 = arith.constant 0.000000e+00 : f32
    %8 = vector.broadcast %cst_6 : f32 to vector<1x1x128xf32>
    %9 = arith.maximumf %7, %8 : vector<1x1x128xf32>
    %cst_7 = arith.constant 9.99999974E-6 : f32
    %10 = vector.broadcast %cst_7 : f32 to vector<1x1x128xf32>
    %11 = arith.addf %9, %10 : vector<1x1x128xf32>
    %12 = math.rsqrt %11 : vector<1x1x128xf32>
    %c0_8 = arith.constant 0 : index
    %c0_9 = arith.constant 0 : index
    %c0_10 = arith.constant 0 : index
    %13 = vector.load %arg7[%c0_8, %c0_9, %c0_10] : memref<1x1x128xf32, #tpu.memory_space<vmem>>, vector<1x1x128xf32>
    %14 = arith.mulf %13, %12 : vector<1x1x128xf32>
    %c0_11 = arith.constant 0 : index
    %c0_12 = arith.constant 0 : index
    %c0_13 = arith.constant 0 : index
    %15 = vector.load %arg8[%c0_11, %c0_12, %c0_13] : memref<1x1x128xf32, #tpu.memory_space<vmem>>, vector<1x1x128xf32>
    %16 = arith.mulf %2, %14 : vector<1x1x128xf32>
    %17 = arith.subf %15, %16 : vector<1x1x128xf32>
    %c16_i32 = arith.constant 16 : i32
    %18 = arith.muli %arg0, %c16_i32 : i32
    %c0_14 = arith.constant 0 : index
    %c7 = arith.constant 7 : index
    %c0_15 = arith.constant 0 : index
    %19 = vector.load %arg2[%c0_14, %c7, %c0_15] : memref<2x8x128xbf16, #tpu.memory_space<vmem>>, vector<2x1x128xbf16>
    %c0_16 = arith.constant 0 : index
    %c0_17 = arith.constant 0 : index
    %c0_18 = arith.constant 0 : index
    %20 = vector.load %arg1[%c0_16, %c0_17, %c0_18] : memref<2x16x128xbf16, #tpu.memory_space<vmem>>, vector<2x16x128xbf16>
    %c0_19 = arith.constant 0 : index
    %c0_20 = arith.constant 0 : index
    %c0_21 = arith.constant 0 : index
    %21 = vector.load %arg3[%c0_19, %c0_20, %c0_21] : memref<2x8x128xbf16, #tpu.memory_space<vmem>>, vector<2x1x128xbf16>
    %22 = tpu.concatenate %19, %20, %21 in 1 : vector<2x1x128xbf16>, vector<2x16x128xbf16>, vector<2x1x128xbf16> -> vector<2x18x128xbf16>
    %23 = tpu.iota {dimensions = array<i32: 1>} : vector<1x18x1xi32>
    %c1_i32 = arith.constant 1 : i32
    %24 = arith.subi %18, %c1_i32 : i32
    %25 = vector.broadcast %24 : i32 to vector<1x18x1xi32>
    %26 = arith.addi %23, %25 : vector<1x18x1xi32>
    %c0_i32 = arith.constant 0 : i32
    %27 = vector.broadcast %c0_i32 : i32 to vector<1x18x1xi32>
    %28 = arith.cmpi sge, %26, %27 : vector<1x18x1xi32>
    %c11_i32 = arith.constant 11 : i32
    %29 = vector.broadcast %c11_i32 : i32 to vector<1x18x1xi32>
    %30 = arith.cmpi slt, %26, %29 : vector<1x18x1xi32>
    %31 = arith.andi %28, %30 : vector<1x18x1xi1>
    %32 = arith.extf %22 : vector<2x18x128xbf16> to vector<2x18x128xf32>
    %33 = vector.broadcast %14 : vector<1x1x128xf32> to vector<2x18x128xf32>
    %34 = arith.mulf %32, %33 : vector<2x18x128xf32>
    %35 = vector.broadcast %17 : vector<1x1x128xf32> to vector<2x18x128xf32>
    %36 = arith.addf %34, %35 : vector<2x18x128xf32>
    %cst_22 = arith.constant 0.000000e+00 : f32
    %37 = vector.broadcast %cst_22 : f32 to vector<2x18x128xf32>
    %38 = arith.maximumf %36, %37 : vector<2x18x128xf32>
    %cst_23 = arith.constant 0.000000e+00 : f32
    %39 = vector.shape_cast %31 : vector<1x18x1xi1> to vector<1x18x1xi1>
    %40 = vector.broadcast %39 : vector<1x18x1xi1> to vector<2x18x128xi1>
    %41 = vector.broadcast %cst_23 : f32 to vector<2x18x128xf32>
    %42 = arith.select %40, %38, %41 : vector<2x18x128xi1>, vector<2x18x128xf32>
    %43 = arith.truncf %42 : vector<2x18x128xf32> to vector<2x18x128xbf16>
    %44 = vector.extract_strided_slice %43 {offsets = [0, 0, 0], sizes = [2, 16, 128], strides = [1, 1, 1]} : vector<2x18x128xbf16> to vector<2x16x128xbf16>
    %45 = vector.shape_cast %44 : vector<2x16x128xbf16> to vector<32x128xbf16>
    %c0_24 = arith.constant 0 : index
    %c0_25 = arith.constant 0 : index
    %c0_26 = arith.constant 0 : index
    %46 = vector.load %arg4[%c0_24, %c0_25, %c0_26] : memref<3x128x128xbf16, #tpu.memory_space<vmem>>, vector<1x128x128xbf16>
    %47 = vector.shape_cast %46 : vector<1x128x128xbf16> to vector<128x128xbf16>
    %cst_27 = arith.constant dense<0.000000e+00> : vector<32x128xf32>
    %48 = tpu.matmul %45, %47, %cst_27 {dimension_numbers = #tpu.dot_dimension_numbers<[1], [0], [0], [1], [0, 0, 1, 1], [], []>} : vector<32x128xbf16>, vector<128x128xbf16>, vector<32x128xf32> -> vector<32x128xf32>
    %49 = vector.extract_strided_slice %43 {offsets = [0, 1, 0], sizes = [2, 16, 128], strides = [1, 1, 1]} : vector<2x18x128xbf16> to vector<2x16x128xbf16>
    %50 = vector.shape_cast %49 : vector<2x16x128xbf16> to vector<32x128xbf16>
    %c1 = arith.constant 1 : index
    %c0_28 = arith.constant 0 : index
    %c0_29 = arith.constant 0 : index
    %51 = vector.load %arg4[%c1, %c0_28, %c0_29] : memref<3x128x128xbf16, #tpu.memory_space<vmem>>, vector<1x128x128xbf16>
    %52 = vector.shape_cast %51 : vector<1x128x128xbf16> to vector<128x128xbf16>
    %cst_30 = arith.constant dense<0.000000e+00> : vector<32x128xf32>
    %53 = tpu.matmul %50, %52, %cst_30 {dimension_numbers = #tpu.dot_dimension_numbers<[1], [0], [0], [1], [0, 0, 1, 1], [], []>} : vector<32x128xbf16>, vector<128x128xbf16>, vector<32x128xf32> -> vector<32x128xf32>
    %54 = arith.addf %48, %53 : vector<32x128xf32>
    %55 = vector.extract_strided_slice %43 {offsets = [0, 2, 0], sizes = [2, 16, 128], strides = [1, 1, 1]} : vector<2x18x128xbf16> to vector<2x16x128xbf16>
    %56 = vector.shape_cast %55 : vector<2x16x128xbf16> to vector<32x128xbf16>
    %c2 = arith.constant 2 : index
    %c0_31 = arith.constant 0 : index
    %c0_32 = arith.constant 0 : index
    %57 = vector.load %arg4[%c2, %c0_31, %c0_32] : memref<3x128x128xbf16, #tpu.memory_space<vmem>>, vector<1x128x128xbf16>
    %58 = vector.shape_cast %57 : vector<1x128x128xbf16> to vector<128x128xbf16>
    %cst_33 = arith.constant dense<0.000000e+00> : vector<32x128xf32>
    %59 = tpu.matmul %56, %58, %cst_33 {dimension_numbers = #tpu.dot_dimension_numbers<[1], [0], [0], [1], [0, 0, 1, 1], [], []>} : vector<32x128xbf16>, vector<128x128xbf16>, vector<32x128xf32> -> vector<32x128xf32>
    %60 = arith.addf %54, %59 : vector<32x128xf32>
    %61 = vector.shape_cast %60 : vector<32x128xf32> to vector<2x16x128xf32>
    %62 = tpu.iota {dimensions = array<i32: 1>} : vector<1x16x1xi32>
    %63 = vector.broadcast %18 : i32 to vector<1x16x1xi32>
    %64 = arith.addi %62, %63 : vector<1x16x1xi32>
    %c11_i32_34 = arith.constant 11 : i32
    %65 = vector.broadcast %c11_i32_34 : i32 to vector<1x16x1xi32>
    %66 = arith.cmpi slt, %64, %65 : vector<1x16x1xi32>
    %cst_35 = arith.constant 0.000000e+00 : f32
    %67 = vector.shape_cast %66 : vector<1x16x1xi1> to vector<1x16x1xi1>
    %68 = vector.broadcast %67 : vector<1x16x1xi1> to vector<2x16x128xi1>
    %69 = vector.broadcast %cst_35 : f32 to vector<2x16x128xf32>
    %70 = arith.select %68, %61, %69 : vector<2x16x128xi1>, vector<2x16x128xf32>
    %cst_36 = arith.constant dense<0.000000e+00> : vector<128xf32>
    %71 = vector.multi_reduction <add>, %70, %cst_36 [0, 1] : vector<2x16x128xf32> to vector<128xf32>
    %72 = vector.shape_cast %71 : vector<128xf32> to vector<1x1x128xf32>
    %c0_37 = arith.constant 0 : index
    %c0_38 = arith.constant 0 : index
    %c0_39 = arith.constant 0 : index
    %73 = vector.load %arg10[%c0_37, %c0_38, %c0_39] : memref<1x1x128xf32, #tpu.memory_space<vmem>>, vector<1x1x128xf32>
    tpu.vector_store %arg10[%c0_37, %c0_38, %c0_39], %72 {strides = array<i32>} : memref<1x1x128xf32, #tpu.memory_space<vmem>>, vector<1x1x128xf32>,
    %74 = arith.mulf %70, %70 : vector<2x16x128xf32>
    %cst_40 = arith.constant dense<0.000000e+00> : vector<128xf32>
    %75 = vector.multi_reduction <add>, %74, %cst_40 [0, 1] : vector<2x16x128xf32> to vector<128xf32>
    %76 = vector.shape_cast %75 : vector<128xf32> to vector<1x1x128xf32>
    %c0_41 = arith.constant 0 : index
    %c0_42 = arith.constant 0 : index
    %c0_43 = arith.constant 0 : index
    %77 = vector.load %arg11[%c0_41, %c0_42, %c0_43] : memref<1x1x128xf32, #tpu.memory_space<vmem>>, vector<1x1x128xf32>
    tpu.vector_store %arg11[%c0_41, %c0_42, %c0_43], %76 {strides = array<i32>} : memref<1x1x128xf32, #tpu.memory_space<vmem>>, vector<1x1x128xf32>,
    %78 = arith.truncf %61 : vector<2x16x128xf32> to vector<2x16x128xbf16>
    %c0_44 = arith.constant 0 : index
    %c0_45 = arith.constant 0 : index
    %c0_46 = arith.constant 0 : index
    %79 = vector.load %arg9[%c0_44, %c0_45, %c0_46] : memref<2x16x128xbf16, #tpu.memory_space<vmem>>, vector<2x16x128xbf16>
    tpu.vector_store %arg9[%c0_44, %c0_45, %c0_46], %78 {strides = array<i32>} : memref<2x16x128xbf16, #tpu.memory_space<vmem>>, vector<2x16x128xbf16>,
    return
  }
  func.func @transform_0(%arg0: i32) -> (i32, i32, i32) {
    %c0_i32 = arith.constant 0 : i32
    %c0_i32_0 = arith.constant 0 : i32
    %c0_i32_1 = arith.constant 0 : i32
    return %c0_i32, %arg0, %c0_i32_0 : i32, i32, i32
  }
  func.func @transform_1(%arg0: i32) -> (i32, i32, i32) {
    %c2_i32 = arith.constant 2 : i32
    %0 = arith.muli %arg0, %c2_i32 : i32
    %c1_i32 = arith.constant 1 : i32
    %1 = arith.subi %0, %c1_i32 : i32
    %c0_i32 = arith.constant 0 : i32
    %2 = arith.maxsi %1, %c0_i32 : i32
    %c0_i32_0 = arith.constant 0 : i32
    %c0_i32_1 = arith.constant 0 : i32
    %c0_i32_2 = arith.constant 0 : i32
    return %c0_i32_0, %2, %c0_i32_1 : i32, i32, i32
  }
  func.func @transform_2(%arg0: i32) -> (i32, i32, i32) {
    %c1_i32 = arith.constant 1 : i32
    %0 = arith.addi %arg0, %c1_i32 : i32
    %c2_i32 = arith.constant 2 : i32
    %1 = arith.muli %0, %c2_i32 : i32
    %c1_i32_0 = arith.constant 1 : i32
    %2 = arith.minsi %1, %c1_i32_0 : i32
    %c0_i32 = arith.constant 0 : i32
    %c0_i32_1 = arith.constant 0 : i32
    %c0_i32_2 = arith.constant 0 : i32
    return %c0_i32, %2, %c0_i32_1 : i32, i32, i32
  }
  func.func @transform_3(%arg0: i32) -> (i32, i32, i32) {
    %c0_i32 = arith.constant 0 : i32
    %c0_i32_0 = arith.constant 0 : i32
    %c0_i32_1 = arith.constant 0 : i32
    %c0_i32_2 = arith.constant 0 : i32
    return %c0_i32, %c0_i32_0, %c0_i32_1 : i32, i32, i32
  }
  func.func @transform_4(%arg0: i32) -> (i32, i32, i32) {
    %c0_i32 = arith.constant 0 : i32
    %c0_i32_0 = arith.constant 0 : i32
    %c0_i32_1 = arith.constant 0 : i32
    %c0_i32_2 = arith.constant 0 : i32
    return %c0_i32, %c0_i32_0, %c0_i32_1 : i32, i32, i32
  }
  func.func @transform_5(%arg0: i32) -> (i32, i32, i32) {
    %c0_i32 = arith.constant 0 : i32
    %c0_i32_0 = arith.constant 0 : i32
    %c0_i32_1 = arith.constant 0 : i32
    %c0_i32_2 = arith.constant 0 : i32
    return %c0_i32, %c0_i32_0, %c0_i32_1 : i32, i32, i32
  }
  func.func @transform_6(%arg0: i32) -> (i32, i32, i32) {
    %c0_i32 = arith.constant 0 : i32
    %c0_i32_0 = arith.constant 0 : i32
    %c0_i32_1 = arith.constant 0 : i32
    %c0_i32_2 = arith.constant 0 : i32
    return %c0_i32, %c0_i32_0, %c0_i32_1 : i32, i32, i32
  }
  func.func @transform_7(%arg0: i32) -> (i32, i32, i32) {
    %c0_i32 = arith.constant 0 : i32
    %c0_i32_0 = arith.constant 0 : i32
    %c0_i32_1 = arith.constant 0 : i32
    %c0_i32_2 = arith.constant 0 : i32
    return %c0_i32, %c0_i32_0, %c0_i32_1 : i32, i32, i32
  }
  func.func @transform_8(%arg0: i32) -> (i32, i32, i32) {
    %c0_i32 = arith.constant 0 : i32
    %c0_i32_0 = arith.constant 0 : i32
    %c0_i32_1 = arith.constant 0 : i32
    return %c0_i32, %arg0, %c0_i32_0 : i32, i32, i32
  }
  func.func @transform_9(%arg0: i32) -> (i32, i32, i32) {
    %c0_i32 = arith.constant 0 : i32
    %c0_i32_0 = arith.constant 0 : i32
    %c0_i32_1 = arith.constant 0 : i32
    return %arg0, %c0_i32, %c0_i32_0 : i32, i32, i32
  }
  func.func @transform_10(%arg0: i32) -> (i32, i32, i32) {
    %c0_i32 = arith.constant 0 : i32
    %c0_i32_0 = arith.constant 0 : i32
    %c0_i32_1 = arith.constant 0 : i32
    return %arg0, %c0_i32, %c0_i32_0 : i32, i32, i32
  }
}

module attributes {stable_mosaic.version = 11 : i64} {
  func.func @_conv_bn_fused_kernel(%arg0: i32, %arg1: memref<2x24x128xbf16, #tpu.memory_space<vmem>>, %arg2: memref<2x8x128xbf16, #tpu.memory_space<vmem>>, %arg3: memref<2x8x128xbf16, #tpu.memory_space<vmem>>, %arg4: memref<3x128x128xbf16, #tpu.memory_space<vmem>>, %arg5: memref<1x1x128xf32, #tpu.memory_space<vmem>>, %arg6: memref<1x1x128xf32, #tpu.memory_space<vmem>>, %arg7: memref<1x1x128xf32, #tpu.memory_space<vmem>>, %arg8: memref<1x1x128xf32, #tpu.memory_space<vmem>>, %arg9: memref<2x24x128xbf16, #tpu.memory_space<vmem>>, %arg10: memref<1x1x128xf32, #tpu.memory_space<vmem>>, %arg11: memref<1x1x128xf32, #tpu.memory_space<vmem>>) attributes {dimension_semantics = [#tpu.dimension_semantics<parallel>], iteration_bounds = array<i64: 2>, scalar_prefetch = 0 : i64, scratch_operands = 0 : i64, tpu.core_type = #tpu.core_type<tc>, window_params = [{transform_indices = @transform_0, window_bounds = array<i64: 2, 24, 128>}, {transform_indices = @transform_1, window_bounds = array<i64: 2, 8, 128>}, {transform_indices = @transform_2, window_bounds = array<i64: 2, 8, 128>}, {pipeline_mode = #tpu.pipeline_mode<synchronous>, transform_indices = @transform_3, window_bounds = array<i64: 3, 128, 128>}, {pipeline_mode = #tpu.pipeline_mode<synchronous>, transform_indices = @transform_4, window_bounds = array<i64: 1, 1, 128>}, {pipeline_mode = #tpu.pipeline_mode<synchronous>, transform_indices = @transform_5, window_bounds = array<i64: 1, 1, 128>}, {pipeline_mode = #tpu.pipeline_mode<synchronous>, transform_indices = @transform_6, window_bounds = array<i64: 1, 1, 128>}, {pipeline_mode = #tpu.pipeline_mode<synchronous>, transform_indices = @transform_7, window_bounds = array<i64: 1, 1, 128>}, {transform_indices = @transform_8, window_bounds = array<i64: 2, 24, 128>}, {transform_indices = @transform_9, window_bounds = array<i64: 1, 1, 128>}, {transform_indices = @transform_10, window_bounds = array<i64: 1, 1, 128>}]} {
    %c0 = arith.constant 0 : index
    %c0_0 = arith.constant 0 : index
    %c0_1 = arith.constant 0 : index
    %0 = vector.load %arg5[%c0, %c0_0, %c0_1] : memref<1x1x128xf32, #tpu.memory_space<vmem>>, vector<1x1x128xf32>
    %cst = arith.constant 1.562500e-02 : f32
    %1 = vector.broadcast %cst : f32 to vector<1x1x128xf32>
    %2 = arith.mulf %0, %1 : vector<1x1x128xf32>
    %c0_2 = arith.constant 0 : index
    %c0_3 = arith.constant 0 : index
    %c0_4 = arith.constant 0 : index
    %3 = vector.load %arg6[%c0_2, %c0_3, %c0_4] : memref<1x1x128xf32, #tpu.memory_space<vmem>>, vector<1x1x128xf32>
    %cst_5 = arith.constant 1.562500e-02 : f32
    %4 = vector.broadcast %cst_5 : f32 to vector<1x1x128xf32>
    %5 = arith.mulf %3, %4 : vector<1x1x128xf32>
    %6 = arith.mulf %2, %2 : vector<1x1x128xf32>
    %7 = arith.subf %5, %6 : vector<1x1x128xf32>
    %cst_6 = arith.constant 0.000000e+00 : f32
    %8 = vector.broadcast %cst_6 : f32 to vector<1x1x128xf32>
    %9 = arith.maximumf %7, %8 : vector<1x1x128xf32>
    %cst_7 = arith.constant 9.99999974E-6 : f32
    %10 = vector.broadcast %cst_7 : f32 to vector<1x1x128xf32>
    %11 = arith.addf %9, %10 : vector<1x1x128xf32>
    %12 = math.rsqrt %11 : vector<1x1x128xf32>
    %c0_8 = arith.constant 0 : index
    %c0_9 = arith.constant 0 : index
    %c0_10 = arith.constant 0 : index
    %13 = vector.load %arg7[%c0_8, %c0_9, %c0_10] : memref<1x1x128xf32, #tpu.memory_space<vmem>>, vector<1x1x128xf32>
    %14 = arith.mulf %13, %12 : vector<1x1x128xf32>
    %c0_11 = arith.constant 0 : index
    %c0_12 = arith.constant 0 : index
    %c0_13 = arith.constant 0 : index
    %15 = vector.load %arg8[%c0_11, %c0_12, %c0_13] : memref<1x1x128xf32, #tpu.memory_space<vmem>>, vector<1x1x128xf32>
    %16 = arith.mulf %2, %14 : vector<1x1x128xf32>
    %17 = arith.subf %15, %16 : vector<1x1x128xf32>
    %c24_i32 = arith.constant 24 : i32
    %18 = arith.muli %arg0, %c24_i32 : i32
    %c0_14 = arith.constant 0 : index
    %c7 = arith.constant 7 : index
    %c0_15 = arith.constant 0 : index
    %19 = vector.load %arg2[%c0_14, %c7, %c0_15] : memref<2x8x128xbf16, #tpu.memory_space<vmem>>, vector<2x1x128xbf16>
    %c0_16 = arith.constant 0 : index
    %c0_17 = arith.constant 0 : index
    %c0_18 = arith.constant 0 : index
    %20 = vector.load %arg1[%c0_16, %c0_17, %c0_18] : memref<2x24x128xbf16, #tpu.memory_space<vmem>>, vector<2x24x128xbf16>
    %c0_19 = arith.constant 0 : index
    %c0_20 = arith.constant 0 : index
    %c0_21 = arith.constant 0 : index
    %21 = vector.load %arg3[%c0_19, %c0_20, %c0_21] : memref<2x8x128xbf16, #tpu.memory_space<vmem>>, vector<2x1x128xbf16>
    %22 = tpu.concatenate %19, %20, %21 in 1 : vector<2x1x128xbf16>, vector<2x24x128xbf16>, vector<2x1x128xbf16> -> vector<2x26x128xbf16>
    %23 = tpu.iota {dimensions = array<i32: 1>} : vector<1x26x1xi32>
    %c1_i32 = arith.constant 1 : i32
    %24 = arith.subi %18, %c1_i32 : i32
    %25 = vector.broadcast %24 : i32 to vector<1x26x1xi32>
    %26 = arith.addi %23, %25 : vector<1x26x1xi32>
    %c0_i32 = arith.constant 0 : i32
    %27 = vector.broadcast %c0_i32 : i32 to vector<1x26x1xi32>
    %28 = arith.cmpi sge, %26, %27 : vector<1x26x1xi32>
    %c32_i32 = arith.constant 32 : i32
    %29 = vector.broadcast %c32_i32 : i32 to vector<1x26x1xi32>
    %30 = arith.cmpi slt, %26, %29 : vector<1x26x1xi32>
    %31 = arith.andi %28, %30 : vector<1x26x1xi1>
    %32 = arith.extf %22 : vector<2x26x128xbf16> to vector<2x26x128xf32>
    %33 = vector.broadcast %14 : vector<1x1x128xf32> to vector<2x26x128xf32>
    %34 = arith.mulf %32, %33 : vector<2x26x128xf32>
    %35 = vector.broadcast %17 : vector<1x1x128xf32> to vector<2x26x128xf32>
    %36 = arith.addf %34, %35 : vector<2x26x128xf32>
    %cst_22 = arith.constant 0.000000e+00 : f32
    %37 = vector.broadcast %cst_22 : f32 to vector<2x26x128xf32>
    %38 = arith.maximumf %36, %37 : vector<2x26x128xf32>
    %cst_23 = arith.constant 0.000000e+00 : f32
    %39 = vector.shape_cast %31 : vector<1x26x1xi1> to vector<1x26x1xi1>
    %40 = vector.broadcast %39 : vector<1x26x1xi1> to vector<2x26x128xi1>
    %41 = vector.broadcast %cst_23 : f32 to vector<2x26x128xf32>
    %42 = arith.select %40, %38, %41 : vector<2x26x128xi1>, vector<2x26x128xf32>
    %43 = arith.truncf %42 : vector<2x26x128xf32> to vector<2x26x128xbf16>
    %44 = vector.extract_strided_slice %43 {offsets = [0, 0, 0], sizes = [2, 24, 128], strides = [1, 1, 1]} : vector<2x26x128xbf16> to vector<2x24x128xbf16>
    %45 = vector.shape_cast %44 : vector<2x24x128xbf16> to vector<48x128xbf16>
    %c0_24 = arith.constant 0 : index
    %c0_25 = arith.constant 0 : index
    %c0_26 = arith.constant 0 : index
    %46 = vector.load %arg4[%c0_24, %c0_25, %c0_26] : memref<3x128x128xbf16, #tpu.memory_space<vmem>>, vector<1x128x128xbf16>
    %47 = vector.shape_cast %46 : vector<1x128x128xbf16> to vector<128x128xbf16>
    %cst_27 = arith.constant dense<0.000000e+00> : vector<48x128xf32>
    %48 = tpu.matmul %45, %47, %cst_27 {dimension_numbers = #tpu.dot_dimension_numbers<[1], [0], [0], [1], [0, 0, 1, 1], [], []>} : vector<48x128xbf16>, vector<128x128xbf16>, vector<48x128xf32> -> vector<48x128xf32>
    %49 = vector.extract_strided_slice %43 {offsets = [0, 1, 0], sizes = [2, 24, 128], strides = [1, 1, 1]} : vector<2x26x128xbf16> to vector<2x24x128xbf16>
    %50 = vector.shape_cast %49 : vector<2x24x128xbf16> to vector<48x128xbf16>
    %c1 = arith.constant 1 : index
    %c0_28 = arith.constant 0 : index
    %c0_29 = arith.constant 0 : index
    %51 = vector.load %arg4[%c1, %c0_28, %c0_29] : memref<3x128x128xbf16, #tpu.memory_space<vmem>>, vector<1x128x128xbf16>
    %52 = vector.shape_cast %51 : vector<1x128x128xbf16> to vector<128x128xbf16>
    %cst_30 = arith.constant dense<0.000000e+00> : vector<48x128xf32>
    %53 = tpu.matmul %50, %52, %cst_30 {dimension_numbers = #tpu.dot_dimension_numbers<[1], [0], [0], [1], [0, 0, 1, 1], [], []>} : vector<48x128xbf16>, vector<128x128xbf16>, vector<48x128xf32> -> vector<48x128xf32>
    %54 = arith.addf %48, %53 : vector<48x128xf32>
    %55 = vector.extract_strided_slice %43 {offsets = [0, 2, 0], sizes = [2, 24, 128], strides = [1, 1, 1]} : vector<2x26x128xbf16> to vector<2x24x128xbf16>
    %56 = vector.shape_cast %55 : vector<2x24x128xbf16> to vector<48x128xbf16>
    %c2 = arith.constant 2 : index
    %c0_31 = arith.constant 0 : index
    %c0_32 = arith.constant 0 : index
    %57 = vector.load %arg4[%c2, %c0_31, %c0_32] : memref<3x128x128xbf16, #tpu.memory_space<vmem>>, vector<1x128x128xbf16>
    %58 = vector.shape_cast %57 : vector<1x128x128xbf16> to vector<128x128xbf16>
    %cst_33 = arith.constant dense<0.000000e+00> : vector<48x128xf32>
    %59 = tpu.matmul %56, %58, %cst_33 {dimension_numbers = #tpu.dot_dimension_numbers<[1], [0], [0], [1], [0, 0, 1, 1], [], []>} : vector<48x128xbf16>, vector<128x128xbf16>, vector<48x128xf32> -> vector<48x128xf32>
    %60 = arith.addf %54, %59 : vector<48x128xf32>
    %61 = vector.shape_cast %60 : vector<48x128xf32> to vector<2x24x128xf32>
    %62 = tpu.iota {dimensions = array<i32: 1>} : vector<1x24x1xi32>
    %63 = vector.broadcast %18 : i32 to vector<1x24x1xi32>
    %64 = arith.addi %62, %63 : vector<1x24x1xi32>
    %c32_i32_34 = arith.constant 32 : i32
    %65 = vector.broadcast %c32_i32_34 : i32 to vector<1x24x1xi32>
    %66 = arith.cmpi slt, %64, %65 : vector<1x24x1xi32>
    %cst_35 = arith.constant 0.000000e+00 : f32
    %67 = vector.shape_cast %66 : vector<1x24x1xi1> to vector<1x24x1xi1>
    %68 = vector.broadcast %67 : vector<1x24x1xi1> to vector<2x24x128xi1>
    %69 = vector.broadcast %cst_35 : f32 to vector<2x24x128xf32>
    %70 = arith.select %68, %61, %69 : vector<2x24x128xi1>, vector<2x24x128xf32>
    %cst_36 = arith.constant dense<0.000000e+00> : vector<128xf32>
    %71 = vector.multi_reduction <add>, %70, %cst_36 [0, 1] : vector<2x24x128xf32> to vector<128xf32>
    %72 = vector.shape_cast %71 : vector<128xf32> to vector<1x1x128xf32>
    %c0_37 = arith.constant 0 : index
    %c0_38 = arith.constant 0 : index
    %c0_39 = arith.constant 0 : index
    %73 = vector.load %arg10[%c0_37, %c0_38, %c0_39] : memref<1x1x128xf32, #tpu.memory_space<vmem>>, vector<1x1x128xf32>
    tpu.vector_store %arg10[%c0_37, %c0_38, %c0_39], %72 {strides = array<i32>} : memref<1x1x128xf32, #tpu.memory_space<vmem>>, vector<1x1x128xf32>,
    %74 = arith.mulf %70, %70 : vector<2x24x128xf32>
    %cst_40 = arith.constant dense<0.000000e+00> : vector<128xf32>
    %75 = vector.multi_reduction <add>, %74, %cst_40 [0, 1] : vector<2x24x128xf32> to vector<128xf32>
    %76 = vector.shape_cast %75 : vector<128xf32> to vector<1x1x128xf32>
    %c0_41 = arith.constant 0 : index
    %c0_42 = arith.constant 0 : index
    %c0_43 = arith.constant 0 : index
    %77 = vector.load %arg11[%c0_41, %c0_42, %c0_43] : memref<1x1x128xf32, #tpu.memory_space<vmem>>, vector<1x1x128xf32>
    tpu.vector_store %arg11[%c0_41, %c0_42, %c0_43], %76 {strides = array<i32>} : memref<1x1x128xf32, #tpu.memory_space<vmem>>, vector<1x1x128xf32>,
    %78 = arith.truncf %61 : vector<2x24x128xf32> to vector<2x24x128xbf16>
    %c0_44 = arith.constant 0 : index
    %c0_45 = arith.constant 0 : index
    %c0_46 = arith.constant 0 : index
    %79 = vector.load %arg9[%c0_44, %c0_45, %c0_46] : memref<2x24x128xbf16, #tpu.memory_space<vmem>>, vector<2x24x128xbf16>
    tpu.vector_store %arg9[%c0_44, %c0_45, %c0_46], %78 {strides = array<i32>} : memref<2x24x128xbf16, #tpu.memory_space<vmem>>, vector<2x24x128xbf16>,
    return
  }
  func.func @transform_0(%arg0: i32) -> (i32, i32, i32) {
    %c0_i32 = arith.constant 0 : i32
    %c0_i32_0 = arith.constant 0 : i32
    %c0_i32_1 = arith.constant 0 : i32
    return %c0_i32, %arg0, %c0_i32_0 : i32, i32, i32
  }
  func.func @transform_1(%arg0: i32) -> (i32, i32, i32) {
    %c3_i32 = arith.constant 3 : i32
    %0 = arith.muli %arg0, %c3_i32 : i32
    %c1_i32 = arith.constant 1 : i32
    %1 = arith.subi %0, %c1_i32 : i32
    %c0_i32 = arith.constant 0 : i32
    %2 = arith.maxsi %1, %c0_i32 : i32
    %c0_i32_0 = arith.constant 0 : i32
    %c0_i32_1 = arith.constant 0 : i32
    %c0_i32_2 = arith.constant 0 : i32
    return %c0_i32_0, %2, %c0_i32_1 : i32, i32, i32
  }
  func.func @transform_2(%arg0: i32) -> (i32, i32, i32) {
    %c1_i32 = arith.constant 1 : i32
    %0 = arith.addi %arg0, %c1_i32 : i32
    %c3_i32 = arith.constant 3 : i32
    %1 = arith.muli %0, %c3_i32 : i32
    %c5_i32 = arith.constant 5 : i32
    %2 = arith.minsi %1, %c5_i32 : i32
    %c0_i32 = arith.constant 0 : i32
    %c0_i32_0 = arith.constant 0 : i32
    %c0_i32_1 = arith.constant 0 : i32
    return %c0_i32, %2, %c0_i32_0 : i32, i32, i32
  }
  func.func @transform_3(%arg0: i32) -> (i32, i32, i32) {
    %c0_i32 = arith.constant 0 : i32
    %c0_i32_0 = arith.constant 0 : i32
    %c0_i32_1 = arith.constant 0 : i32
    %c0_i32_2 = arith.constant 0 : i32
    return %c0_i32, %c0_i32_0, %c0_i32_1 : i32, i32, i32
  }
  func.func @transform_4(%arg0: i32) -> (i32, i32, i32) {
    %c0_i32 = arith.constant 0 : i32
    %c0_i32_0 = arith.constant 0 : i32
    %c0_i32_1 = arith.constant 0 : i32
    %c0_i32_2 = arith.constant 0 : i32
    return %c0_i32, %c0_i32_0, %c0_i32_1 : i32, i32, i32
  }
  func.func @transform_5(%arg0: i32) -> (i32, i32, i32) {
    %c0_i32 = arith.constant 0 : i32
    %c0_i32_0 = arith.constant 0 : i32
    %c0_i32_1 = arith.constant 0 : i32
    %c0_i32_2 = arith.constant 0 : i32
    return %c0_i32, %c0_i32_0, %c0_i32_1 : i32, i32, i32
  }
  func.func @transform_6(%arg0: i32) -> (i32, i32, i32) {
    %c0_i32 = arith.constant 0 : i32
    %c0_i32_0 = arith.constant 0 : i32
    %c0_i32_1 = arith.constant 0 : i32
    %c0_i32_2 = arith.constant 0 : i32
    return %c0_i32, %c0_i32_0, %c0_i32_1 : i32, i32, i32
  }
  func.func @transform_7(%arg0: i32) -> (i32, i32, i32) {
    %c0_i32 = arith.constant 0 : i32
    %c0_i32_0 = arith.constant 0 : i32
    %c0_i32_1 = arith.constant 0 : i32
    %c0_i32_2 = arith.constant 0 : i32
    return %c0_i32, %c0_i32_0, %c0_i32_1 : i32, i32, i32
  }
  func.func @transform_8(%arg0: i32) -> (i32, i32, i32) {
    %c0_i32 = arith.constant 0 : i32
    %c0_i32_0 = arith.constant 0 : i32
    %c0_i32_1 = arith.constant 0 : i32
    return %c0_i32, %arg0, %c0_i32_0 : i32, i32, i32
  }
  func.func @transform_9(%arg0: i32) -> (i32, i32, i32) {
    %c0_i32 = arith.constant 0 : i32
    %c0_i32_0 = arith.constant 0 : i32
    %c0_i32_1 = arith.constant 0 : i32
    return %arg0, %c0_i32, %c0_i32_0 : i32, i32, i32
  }
  func.func @transform_10(%arg0: i32) -> (i32, i32, i32) {
    %c0_i32 = arith.constant 0 : i32
    %c0_i32_0 = arith.constant 0 : i32
    %c0_i32_1 = arith.constant 0 : i32
    return %arg0, %c0_i32, %c0_i32_0 : i32, i32, i32
  }
}

module attributes {stable_mosaic.version = 11 : i64} {
  func.func @_bn_relu_kernel(%arg0: i32, %arg1: memref<2x16x128xbf16, #tpu.memory_space<vmem>>, %arg2: memref<1x1x128xf32, #tpu.memory_space<vmem>>, %arg3: memref<1x1x128xf32, #tpu.memory_space<vmem>>, %arg4: memref<1x1x128xf32, #tpu.memory_space<vmem>>, %arg5: memref<1x1x128xf32, #tpu.memory_space<vmem>>, %arg6: memref<2x16x128xf32, #tpu.memory_space<vmem>>) attributes {dimension_semantics = [#tpu.dimension_semantics<parallel>], iteration_bounds = array<i64: 1>, scalar_prefetch = 0 : i64, scratch_operands = 0 : i64, tpu.core_type = #tpu.core_type<tc>, window_params = [{transform_indices = @transform_0, window_bounds = array<i64: 2, 16, 128>}, {pipeline_mode = #tpu.pipeline_mode<synchronous>, transform_indices = @transform_1, window_bounds = array<i64: 1, 1, 128>}, {pipeline_mode = #tpu.pipeline_mode<synchronous>, transform_indices = @transform_2, window_bounds = array<i64: 1, 1, 128>}, {pipeline_mode = #tpu.pipeline_mode<synchronous>, transform_indices = @transform_3, window_bounds = array<i64: 1, 1, 128>}, {pipeline_mode = #tpu.pipeline_mode<synchronous>, transform_indices = @transform_4, window_bounds = array<i64: 1, 1, 128>}, {transform_indices = @transform_5, window_bounds = array<i64: 2, 16, 128>}]} {
    %c0 = arith.constant 0 : index
    %c0_0 = arith.constant 0 : index
    %c0_1 = arith.constant 0 : index
    %0 = vector.load %arg2[%c0, %c0_0, %c0_1] : memref<1x1x128xf32, #tpu.memory_space<vmem>>, vector<1x1x128xf32>
    %cst = arith.constant 0.0454545468 : f32
    %1 = vector.broadcast %cst : f32 to vector<1x1x128xf32>
    %2 = arith.mulf %0, %1 : vector<1x1x128xf32>
    %c0_2 = arith.constant 0 : index
    %c0_3 = arith.constant 0 : index
    %c0_4 = arith.constant 0 : index
    %3 = vector.load %arg3[%c0_2, %c0_3, %c0_4] : memref<1x1x128xf32, #tpu.memory_space<vmem>>, vector<1x1x128xf32>
    %cst_5 = arith.constant 0.0454545468 : f32
    %4 = vector.broadcast %cst_5 : f32 to vector<1x1x128xf32>
    %5 = arith.mulf %3, %4 : vector<1x1x128xf32>
    %6 = arith.mulf %2, %2 : vector<1x1x128xf32>
    %7 = arith.subf %5, %6 : vector<1x1x128xf32>
    %cst_6 = arith.constant 0.000000e+00 : f32
    %8 = vector.broadcast %cst_6 : f32 to vector<1x1x128xf32>
    %9 = arith.maximumf %7, %8 : vector<1x1x128xf32>
    %cst_7 = arith.constant 9.99999974E-6 : f32
    %10 = vector.broadcast %cst_7 : f32 to vector<1x1x128xf32>
    %11 = arith.addf %9, %10 : vector<1x1x128xf32>
    %12 = math.rsqrt %11 : vector<1x1x128xf32>
    %c0_8 = arith.constant 0 : index
    %c0_9 = arith.constant 0 : index
    %c0_10 = arith.constant 0 : index
    %13 = vector.load %arg4[%c0_8, %c0_9, %c0_10] : memref<1x1x128xf32, #tpu.memory_space<vmem>>, vector<1x1x128xf32>
    %14 = arith.mulf %13, %12 : vector<1x1x128xf32>
    %c0_11 = arith.constant 0 : index
    %c0_12 = arith.constant 0 : index
    %c0_13 = arith.constant 0 : index
    %15 = vector.load %arg5[%c0_11, %c0_12, %c0_13] : memref<1x1x128xf32, #tpu.memory_space<vmem>>, vector<1x1x128xf32>
    %16 = arith.mulf %2, %14 : vector<1x1x128xf32>
    %17 = arith.subf %15, %16 : vector<1x1x128xf32>
    %c0_14 = arith.constant 0 : index
    %c0_15 = arith.constant 0 : index
    %c0_16 = arith.constant 0 : index
    %18 = vector.load %arg1[%c0_14, %c0_15, %c0_16] : memref<2x16x128xbf16, #tpu.memory_space<vmem>>, vector<2x16x128xbf16>
    %19 = arith.extf %18 : vector<2x16x128xbf16> to vector<2x16x128xf32>
    %20 = vector.broadcast %14 : vector<1x1x128xf32> to vector<2x16x128xf32>
    %21 = arith.mulf %19, %20 : vector<2x16x128xf32>
    %22 = vector.broadcast %17 : vector<1x1x128xf32> to vector<2x16x128xf32>
    %23 = arith.addf %21, %22 : vector<2x16x128xf32>
    %cst_17 = arith.constant 0.000000e+00 : f32
    %24 = vector.broadcast %cst_17 : f32 to vector<2x16x128xf32>
    %25 = arith.maximumf %23, %24 : vector<2x16x128xf32>
    %26 = tpu.iota {dimensions = array<i32: 1>} : vector<1x16x1xi32>
    %c16_i32 = arith.constant 16 : i32
    %27 = arith.muli %arg0, %c16_i32 : i32
    %28 = vector.broadcast %27 : i32 to vector<1x16x1xi32>
    %29 = arith.addi %26, %28 : vector<1x16x1xi32>
    %c11_i32 = arith.constant 11 : i32
    %30 = vector.broadcast %c11_i32 : i32 to vector<1x16x1xi32>
    %31 = arith.cmpi slt, %29, %30 : vector<1x16x1xi32>
    %cst_18 = arith.constant 0.000000e+00 : f32
    %32 = vector.shape_cast %31 : vector<1x16x1xi1> to vector<1x16x1xi1>
    %33 = vector.broadcast %32 : vector<1x16x1xi1> to vector<2x16x128xi1>
    %34 = vector.broadcast %cst_18 : f32 to vector<2x16x128xf32>
    %35 = arith.select %33, %25, %34 : vector<2x16x128xi1>, vector<2x16x128xf32>
    %c0_19 = arith.constant 0 : index
    %c0_20 = arith.constant 0 : index
    %c0_21 = arith.constant 0 : index
    %36 = vector.load %arg6[%c0_19, %c0_20, %c0_21] : memref<2x16x128xf32, #tpu.memory_space<vmem>>, vector<2x16x128xf32>
    tpu.vector_store %arg6[%c0_19, %c0_20, %c0_21], %35 {strides = array<i32>} : memref<2x16x128xf32, #tpu.memory_space<vmem>>, vector<2x16x128xf32>,
    return
  }
  func.func @transform_0(%arg0: i32) -> (i32, i32, i32) {
    %c0_i32 = arith.constant 0 : i32
    %c0_i32_0 = arith.constant 0 : i32
    %c0_i32_1 = arith.constant 0 : i32
    return %c0_i32, %arg0, %c0_i32_0 : i32, i32, i32
  }
  func.func @transform_1(%arg0: i32) -> (i32, i32, i32) {
    %c0_i32 = arith.constant 0 : i32
    %c0_i32_0 = arith.constant 0 : i32
    %c0_i32_1 = arith.constant 0 : i32
    %c0_i32_2 = arith.constant 0 : i32
    return %c0_i32, %c0_i32_0, %c0_i32_1 : i32, i32, i32
  }
  func.func @transform_2(%arg0: i32) -> (i32, i32, i32) {
    %c0_i32 = arith.constant 0 : i32
    %c0_i32_0 = arith.constant 0 : i32
    %c0_i32_1 = arith.constant 0 : i32
    %c0_i32_2 = arith.constant 0 : i32
    return %c0_i32, %c0_i32_0, %c0_i32_1 : i32, i32, i32
  }
  func.func @transform_3(%arg0: i32) -> (i32, i32, i32) {
    %c0_i32 = arith.constant 0 : i32
    %c0_i32_0 = arith.constant 0 : i32
    %c0_i32_1 = arith.constant 0 : i32
    %c0_i32_2 = arith.constant 0 : i32
    return %c0_i32, %c0_i32_0, %c0_i32_1 : i32, i32, i32
  }
  func.func @transform_4(%arg0: i32) -> (i32, i32, i32) {
    %c0_i32 = arith.constant 0 : i32
    %c0_i32_0 = arith.constant 0 : i32
    %c0_i32_1 = arith.constant 0 : i32
    %c0_i32_2 = arith.constant 0 : i32
    return %c0_i32, %c0_i32_0, %c0_i32_1 : i32, i32, i32
  }
  func.func @transform_5(%arg0: i32) -> (i32, i32, i32) {
    %c0_i32 = arith.constant 0 : i32
    %c0_i32_0 = arith.constant 0 : i32
    %c0_i32_1 = arith.constant 0 : i32
    return %c0_i32, %arg0, %c0_i32_0 : i32, i32, i32
  }
}

</mosaic_0001>

<bundles_post_ra>
// kernel: encoder_forward.11
= control target key start
LH: loop header
LB: loop body
LE: loop exit
PB: predicated region body
PF: predicated region fallthrough
CT: control target
= control target key end

     0   :  { %s710_s21 = smov 0   ;;  %s712_s22 = smov 0   ;;  %s787_s0 = inlined_call_operand.vmem [shape: bf16[2,64,128], index: 0, kind: input, shape index: {}]   ;;  %s788_s1 = inlined_call_operand.vmem [shape: f32[1,1,128], index: 1, kind: input, shape index: {}]   ;;  %s789_s2 = inlined_call_operand.vmem [shape: f32[1,1,128], index: 2, kind: input, shape index: {}]   ;;  %s790_s3 = inlined_call_operand.vmem [shape: f32[1,1,128], index: 3, kind: input, shape index: {}]   ;;  %s791_s4 = inlined_call_operand.vmem [shape: f32[1,1,128], index: 4, kind: input, shape index: {}]   ;;  %s792_s5 = inlined_call_operand.vmem [shape: f32[2,64,128], index: 5, kind: output, shape index: {0}]   ;;  %s793_s6 = inlined_call_operand.vmem [shape: bf16[2,32,128], index: 6, kind: output, shape index: {1}]  }
   0x1   :  { %s714_s23 = smov 0  }
   0x2 LB: > { %s723_s24 = sadd.s32 4294967295, %s673_s23   ;;  %s725_s25 = sadd.s32 1, %s673_s23   ;;  %s673_s23 = sphi %s714_s23, %s797_s23   ;;  %s669_s22 = sphi %s712_s22, %s796_s22   ;;  %s665_s21 = sphi %s710_s21, %s795_s21  }
   0x3   : > { %s21_s26 = ssub.s32 %s673_s23, %s725_s25  ;;  %s24_s27 = sadd.s32 1, %s669_s22 }
   0x4   : > { %p22_p0 = scmp.eq.s32.totalorder %s21_s26, 0  ;;  %p31_p1 = scmp.ne.s32.totalorder %s669_s22, %s665_s21 }
   0x5   : > { %p32_p2 = scmp.eq.s32.totalorder %s673_s23, 0  ;;  %p145_p3 = scmp.eq.s32.totalorder %s723_s24, 3 }
   0x6   : > { %s733_s28 = scalar_select %p22_p0, %s669_s22, %s24_s27  }
   0x7   : > { %p33_p4 = por %p32_p2, %p31_p1  ;;  %p735_p5 = por %p145_p3, %p31_p1 }
   0x8   : > { %p590_p6 = scmp.ge.s32.totalorder %s673_s23, 4 }
   0xa   : > { %205 = sbr.rel (%p590_p6) target bundleno = 21 (0x15), region = 32 }
   0xf   : > { %208 = sbr.rel (!%p33_p4) target bundleno = 21 (0x15), region = 36  ;;  %s210_s30 = sand.u32 (%p33_p4), 1, %s669_s22  }
  0x10   : > { %s609_s7 = sshll.u32 (%p33_p4), %s673_s23, 3  ;;  %s591_s8 = sshll.u32 (%p33_p4), %s210_s30, 4 }
  0x11   : > { %s215_s11 = scalar_lea.vmem (%p33_p4), %s787_s0, %s609_s7  ;;  %s212_s12 = scalar_lea.vmem (%p33_p4), [#allocation2], %s591_s8 }
  0x12   : > { %v232_v0 = vld [vmem:[%s215_s11] sm:$0xff] (%p33_p4)  }
  0x13   : > { %v236_v1 = vld [vmem:[%s215_s11 + $0x20] sm:$0xff] (%p33_p4)   ;;  %233 = vst [vmem:[%s212_s12] sm:$0xff] (%p33_p4), %v232_v0  }
  0x14   : > { %237 = vst [vmem:[%s212_s12 + $0x8] sm:$0xff] %v236_v1  }
  0x15 PF: > { %p594_p7 = scmp.ge.s32.totalorder %s673_s23, 1  ;;  %p270_p8 = scmp.lt.s32.totalorder %s673_s23, 5 }
  0x17   : > { %p271_p9 = pnand %p594_p7, %p270_p8 }
  0x18   : > { %s750_s17 = sand.u32 (!%p271_p9), 1, %s665_s21   ;;  %s598_s21 = sshll.u32 (!%p271_p9), %s723_s24, 4 }
  0x19   : > { %274 = sbr.rel (%p271_p9) target bundleno = 97 (0x61), region = 77  ;;  %s595_s18 = sshll.u32 (!%p271_p9), %s750_s17, 4 }
  0x1a   : > { %s279_s23 = scalar_lea.vmem (!%p271_p9), [#allocation2], %s595_s18  ;;  %s596_s30 = sshll.u32 (!%p271_p9), %s750_s17, 5 }
  0x1b   : > { %s302_s7 = scalar_lea.vmem (!%p271_p9), [#allocation3], %s596_s30  ;;  %s597_s8 = sshll.u32 (!%p271_p9), %s750_s17, 3 }
  0x1c   : > { %s308_s9 = scalar_lea.vmem (!%p271_p9), [#allocation4], %s597_s8 }
  0x1e   : > { %v311_v2 = vld [vmem:[%s788_s1] sm:$0x1]  ;;  %v360_v14 = vlaneseq  ;;  %v624_v20 = vld [vmem:[%s279_s23 + $0x8] sm:$0xff]   ;;  %v364_v31 = vstv %s598_s21  ;;  %s407_s12 = scalar_lea.vmem (%p735_p5), %s792_s5, %s598_s21 }
  0x1f   : > { %v313_v3 = vld [vmem:[%s789_s2] sm:$0x1]  ;;  %v312_v4 = vmul.f32 0.0078125, %v311_v2  ;;  %v617_v25 = vunpack.c.l.bf16 %v624_v20  ;;  %v618_v28 = vunpack.c.h.bf16 %v624_v20 }
  0x20   : > { %v314_v5 = vmul.f32 0.0078125, %v313_v3  ;;  %v329_v17 = vld [vmem:[%s790_s3] sm:$0x1]  ;;  %v361_v19 = vshrl.u32 %v360_v14, 7 }
  0x21   : > { %v315_v6 = vmul.f32 %v312_v4, %v312_v4  ;;  %v612_v18 = vld [vmem:[%s279_s23] sm:$0xff]  }
  0x22   : > { %v613_v23 = vunpack.c.l.bf16 %v612_v18  ;;  %v614_v24 = vunpack.c.h.bf16 %v612_v18  ;;  %v331_v26 = vld [vmem:[%s791_s4] sm:$0x1]  ;;  %v362_v27 = vadd.s32 8, %v361_v19  ;;  %v365_v36 = vadd.s32 %v364_v31, %v361_v19 }
  0x23   : > { %v316_v7 = vsub.f32 %v314_v5, %v315_v6 }
  0x24   : > { %v366_v37 = vadd.s32 %v364_v31, %v362_v27  ;;  %vm367_vm3 = vcmp.lt.s32.totalorder %v365_v36, 64 }
  0x25   : > { %v317_v8 = vmax.f32 %v316_v7, 0.0 }
  0x26   : > { %vm368_vm4 = vcmp.lt.s32.totalorder %v366_v37, 64 }
  0x27   : > { %v318_v9 = vadd.f32 1e-05, %v317_v8 }
  0x29   : > { %649 = vrsqrt.f32 %v318_v9  ;;  %vm325_vm0 = vweird.f32 %v318_v9 }
  0x2f   : > { %v650_v10 = vpop.eup %649 }
  0x30   : > { %v320_v11 = vmul.f32 %v650_v10, %v318_v9  ;;  %vm326_vm1 = vweird.f32 %v650_v10 }
  0x31   : > { %vm327_vm2 = vmor %vm325_vm0, %vm326_vm1 }
  0x32   : > { %v321_v12 = vmul.f32 %v650_v10, %v320_v11 }
  0x34   : > { %v322_v13 = vmul.f32 0.5, %v321_v12 }
  0x36   : > { %v323_v15 = vsub.f32 1.5, %v322_v13 }
  0x38   : > { %v324_v16 = vmul.f32 %v650_v10, %v323_v15 }
  0x3a   : > { %v328_v21 = vsel %vm327_vm2, %v650_v10, %v324_v16 }
  0x3b   : > { %v330_v22 = vmul.f32 %v329_v17, %v328_v21 }
  0x3d   : > { %v332_v29 = vmul.f32 %v330_v22, %v312_v4  ;;  %v343_v30 = vperm.slane %v330_v22, 0 }
  0x3f   : > { %v333_v32 = vsub.f32 %v331_v26, %v332_v29  ;;  %v345_v33 = vmul.f32 %v613_v23, %v343_v30  ;;  %v346_v34 = vmul.f32 %v614_v24, %v343_v30  ;;  %v347_v35 = vmul.f32 %v617_v25, %v343_v30 }
  0x40   : > { %v348_v38 = vmul.f32 %v618_v28, %v343_v30 }
  0x41   : > { %v350_v39 = vperm.slane %v333_v32, 0 }
  0x43   : > { %v352_v40 = vadd.f32 %v350_v39, %v345_v33  ;;  %v353_v41 = vadd.f32 %v350_v39, %v346_v34  ;;  %v354_v42 = vadd.f32 %v350_v39, %v347_v35  ;;  %v355_v43 = vadd.f32 %v350_v39, %v348_v38 }
  0x45   : > { %v356_v44 = vmax.f32 %v352_v40, 0.0  ;;  %v357_v45 = vmax.f32 %v353_v41, 0.0  ;;  %v358_v46 = vmax.f32 %v354_v42, 0.0  ;;  %v359_v47 = vmax.f32 %v355_v43, 0.0 }
  0x47   : > { %v373_v48 = vsel %vm367_vm3, %v356_v44, 0.0  ;;  %v374_v49 = vsel %vm368_vm4, %v357_v45, 0.0  ;;  %v375_v50 = vsel %vm367_vm3, %v358_v46, 0.0  ;;  %v376_v51 = vsel %vm368_vm4, %v359_v47, 0.0 }
  0x48   : > { %377 = vst [vmem:[%s302_s7] sm:$0xff] %v373_v48 }
  0x49   : > { %378 = vst [vmem:[%s302_s7 + $0x8] sm:$0xff] %v374_v49 }
  0x4a   : > { %379 = vst [vmem:[%s302_s7 + $0x10] sm:$0xff] %v375_v50 }
  0x4b   : > { %380 = vst [vmem:[%s302_s7 + $0x18] sm:$0xff] %v376_v51 }
  0x4f   : > { %v442_v59 = vld [vmem:[%s302_s7] sm:$0xff] (%p735_p5) }
  0x50   : > { %v381_v52 = vld [vmem:[%s302_s7] ss:$2 sm:$0xff]  ;;  %v600_v53 = vld [vmem:[%s302_s7 + $0x1] ss:$2 sm:$0xff]  ;;  %443 = vst [vmem:[%s407_s12] sm:$0xff] (%p735_p5), %v442_v59 }
  0x51   : > { %v388_v54 = vmax.f32 %v381_v52, %v600_v53  ;;  %v444_v60 = vld [vmem:[%s302_s7 + $0x8] sm:$0xff] (%p735_p5)  ;;  %v446_v61 = vld [vmem:[%s302_s7 + $0x10] sm:$0xff] (%p735_p5) }
  0x52   : > { %v599_v55 = vld [vmem:[%s302_s7 + $0x10] ss:$2 sm:$0xff]  ;;  %v601_v56 = vld [vmem:[%s302_s7 + $0x11] ss:$2 sm:$0xff]  ;;  %445 = vst [vmem:[%s407_s12 + $0x8] sm:$0xff] (%p735_p5), %v444_v60 }
  0x53   : > { %v389_v57 = vmax.f32 %v599_v55, %v601_v56  ;;  %404 = sbr.rel (!%p735_p5) target bundleno = 88 (0x58), region = 85  ;;  %v448_v62 = vld [vmem:[%s302_s7 + $0x18] sm:$0xff] (%p735_p5)  ;;  %447 = vst [vmem:[%s407_s12 + $0x40] sm:$0xff] (%p735_p5), %v446_v61 }
  0x54   : > { %449 = vst [vmem:[%s407_s12 + $0x48] sm:$0xff] (%p735_p5), %v448_v62 }
  0x55   : > { %v622_v58 = vpack.c.bf16 %v389_v57, %v388_v54 }
  0x57   : > { %623 = vst [vmem:[%s308_s9] sm:$0xff] %v622_v58  }
  0x58 PF: > { %455 = sbr.rel (!%p735_p5) target bundleno = 97 (0x61), region = 123  ;;  %s606_s13 = sshll.u32 (%p735_p5), %s723_s24, 2 }
  0x59   : > { %s457_s16 = scalar_lea.vmem (%p735_p5), %s793_s6, %s606_s13 }
  0x5e   : > { %v474_v63 = vld [vmem:[%s308_s9] sm:$0xf]  ;;  %v476_v0 = vld [vmem:[%s308_s9 + $0x4] sm:$0xf] }
  0x5f   : > { %475 = vst [vmem:[%s457_s16] sm:$0xf] %v474_v63 }
  0x60   : > { %477 = vst [vmem:[%s457_s16 + $0x10] sm:$0xf] %v476_v0 }
  0x61 PF: > { %p14_p10 = scmp.ge.s32.totalorder %s725_s25, 6   ;;  %s795_s21 = smov %s669_s22 }
  0x62   : > { %s796_s22 = smov %s733_s28  ;;  %s797_s23 = smov %s725_s25 }
  0x63   :  { %16 = sbr.rel (!%p14_p10) target bundleno = 2 (0x2), region = 210 }

// kernel: encoder_forward.9
= control target key start
LH: loop header
LB: loop body
LE: loop exit
PB: predicated region body
PF: predicated region fallthrough
CT: control target
= control target key end

     0   :  { %s1540_s21 = smov 0   ;;  %s1542_s22 = smov 0   ;;  %s1845_s0 = inlined_call_operand.vmem [shape: bf16[2,64,128], index: 0, kind: input, shape index: {}, may-alias: {0,1,2}]   ;;  %s1846_s1 = inlined_call_operand.vmem [shape: bf16[2,64,128], index: 1, kind: input, shape index: {}, may-alias: {0,1,2}]   ;;  %s1847_s2 = inlined_call_operand.vmem [shape: bf16[2,64,128], index: 2, kind: input, shape index: {}, may-alias: {0,1,2}]   ;;  %s1848_s3 = inlined_call_operand.vmem [shape: bf16[3,128,128], index: 3, kind: input, shape index: {}]   ;;  %s1849_s4 = inlined_call_operand.vmem [shape: bf16[2,64,128], index: 4, kind: output, shape index: {0}]   ;;  %s1850_s5 = inlined_call_operand.vmem [shape: f32[4,1,128], index: 5, kind: output, shape index: {1}]   ;;  %s1851_s6 = inlined_call_operand.vmem [shape: f32[4,1,128], index: 6, kind: output, shape index: {2}]  }
   0x1   :  { %s1544_s23 = smov 0   ;;  %s1546_s24 = smov 0  }
   0x2   :  { %s1548_s25 = smov 0   ;;  %s1550_s26 = smov 0  }
   0x3   :  { %s1552_s27 = smov 0  }
   0x4 LB: > { %1855 = sst [smem:[#allocation6_spill]] %s1498_s26  ;;  %s1576_s28 = sadd.s32 1, %s1502_s27   ;;  %s1502_s27 = sphi %s1552_s27, %s1872_s27   ;;  %s1498_s26 = sphi %s1550_s26, %s1876_s26   ;;  %s1494_s25 = sphi %s1548_s25, %s1875_s25   ;;  %s1490_s24 = sphi %s1546_s24, %s1880_s24   ;;  %s1486_s23 = sphi %s1544_s23, %s1879_s23   ;;  %s1482_s22 = sphi %s1542_s22, %s1878_s22   ;;  %s1478_s21 = sphi %s1540_s21, %s1877_s21  }
   0x5   : > { %1856 = sst [smem:[#allocation7_spill]] %s1576_s28  ;;  %s21_s29 = ssub.s32 %s1502_s27, %s1576_s28 }
   0x6   : > { %s24_s30 = sadd.s32 1, %s1498_s26  ;;  %p22_p0 = scmp.eq.s32.totalorder %s21_s29, 0 }
   0x7   : > { %p31_p1 = scmp.ne.s32.totalorder %s1498_s26, %s1494_s25  ;;  %p32_p2 = scmp.eq.s32.totalorder %s1502_s27, 0 }
   0x8   : > { %s1164_s7 = sshll.u32 %s1502_s27, 1  ;;  %s1598_s12 = sadd.s32 4294967295, %s1502_s27  }
   0x9   : > { %s1586_s8 = scalar_select %p22_p0, %s1498_s26, %s24_s30  }
   0xa   : > { %p1593_p3 = por %p32_p2, %p31_p1  ;;  %s1165_s10 = sadd.s32 4294967295, %s1164_s7 }
   0xb   : > { %1857 = sst [smem:[#allocation8_spill]] %s1586_s8  ;;  %p49_p4 = scmp.gt.s32.totalorder %s1165_s10, 0 }
   0xc   : > { %s1335_s11 = sadd.s32 2, %s1164_s7  ;;  %p65_p6 = scmp.ne.s32.totalorder %s1490_s24, %s1486_s23 }
   0xd   : > { %s1167_s13 = sadd.s32 4294967295, %s1335_s11  ;;  %s1882_s10 = smov (!%p49_p4, %s1165_s10), 0 }
   0xe   : > { %p53_p5 = scmp.gt.s32.totalorder %s1167_s13, 0  ;;  %p83_p7 = scmp.lt.s32.totalorder %s1335_s11, 7 }
   0xf   : > { %s1339_s14 = sadd.s32 2, %s1335_s11  ;;  %s58_s15 = sadd.s32 1, %s1490_s24 }
  0x10   : > { %s1884_s13 = smov (!%p53_p5, %s1167_s13), 0  ;;  %p1607_p8 = por %p65_p6, %p32_p2 }
  0x11   : > { %s55_s17 = ssub.s32 %s1882_s10, %s1884_s13  ;;  %p87_p9 = scmp.lt.s32.totalorder %s1339_s14, 7 }
  0x12   : > { %p56_p10 = scmp.eq.s32.totalorder %s55_s17, 0  ;;  %p99_p11 = scmp.ne.s32.totalorder %s1482_s22, %s1478_s21 }
  0x13   : > { %s1886_s11 = smov (!%p83_p7, %s1335_s11), 7  ;;  %s1888_s14 = smov (!%p87_p9, %s1339_s14), 7 }
  0x14   : > { %s1617_s18 = scalar_select %p56_p10, %s1490_s24, %s58_s15  }
  0x15   : > { %p1621_p12 = por %p99_p11, %p32_p2  ;;  %p150_p13 = scmp.eq.s32.totalorder %s1598_s12, 3 }
  0x16   : > { %1860 = sst [smem:[#allocation9_spill]] %s1617_s18  ;;  %s89_s20 = ssub.s32 %s1886_s11, %s1888_s14 }
  0x17   : > { %s92_s29 = sadd.s32 1, %s1482_s22  ;;  %p90_p0 = scmp.eq.s32.totalorder %s89_s20, 0 }
  0x18   : > { %p1631_p4 = por %p150_p13, %p31_p1  ;;  %p1171_p5 = scmp.ge.s32.totalorder %s1502_s27, 4 }
  0x19   : > { %s1636_s7 = scalar_select %p90_p0, %s1482_s22, %s92_s29  }
  0x1a   : > { %227 = sbr.rel (%p1171_p5) target bundleno = 49 (0x31), region = 20 }
  0x1b   : > { %1863 = sst [smem:[#allocation10_spill]] %s1636_s7 }
  0x1f   : > { %230 = sbr.rel (!%p1593_p3) target bundleno = 37 (0x25), region = 24  ;;  %s232_s13 = sand.u32 (%p1593_p3), 1, %s1498_s26  }
  0x20   : > { %s1340_s15 = sshll.u32 (%p1593_p3), %s1502_s27, 3  ;;  %s1172_s14 = sshll.u32 (%p1593_p3), %s232_s13, 4 }
  0x21   : > { %s237_s8 = scalar_lea.vmem (%p1593_p3), %s1845_s0, %s1340_s15  ;;  %s234_s18 = scalar_lea.vmem (%p1593_p3), [#allocation2], %s1172_s14 }
  0x22   : > { %v254_v0 = vld [vmem:[%s237_s8] sm:$0xff] (%p1593_p3)  }
  0x23   : > { %v258_v1 = vld [vmem:[%s237_s8 + $0x20] sm:$0xff] (%p1593_p3)   ;;  %255 = vst [vmem:[%s234_s18] sm:$0xff] (%p1593_p3), %v254_v0  }
  0x24   : > { %259 = vst [vmem:[%s234_s18 + $0x8] sm:$0xff] %v258_v1  }
  0x25 PF: > { %293 = sbr.rel (!%p1607_p8) target bundleno = 43 (0x2b), region = 65  ;;  %s295_s9 = sand.u32 (%p1607_p8), 1, %s1490_s24  }
  0x26   : > { %s1178_s29 = sshll.u32 (%p1607_p8), %s1882_s10, 2  ;;  %s1175_s26 = sshll.u32 (%p1607_p8), %s295_s9, 3 }
  0x27   : > { %s303_s28 = scalar_lea.vmem (%p1607_p8), %s1846_s1, %s1178_s29  ;;  %s297_s15 = scalar_lea.vmem (%p1607_p8), [#allocation3], %s1175_s26 }
  0x28   : > { %v320_v2 = vld [vmem:[%s303_s28] sm:$0xf] (%p1607_p8) }
  0x29   : > { %v322_v3 = vld [vmem:[%s303_s28 + $0x20] sm:$0xf] (%p1607_p8)  ;;  %321 = vst [vmem:[%s297_s15] sm:$0xf] (%p1607_p8), %v320_v2 }
  0x2a   : > { %323 = vst [vmem:[%s297_s15 + $0x4] sm:$0xf] %v322_v3 }
  0x2b PF: > { %351 = sbr.rel (!%p1621_p12) target bundleno = 49 (0x31), region = 106  ;;  %s353_s8 = sand.u32 (%p1621_p12), 1, %s1482_s22  }
  0x2c   : > { %s1181_s16 = sshll.u32 (%p1621_p12), %s1886_s11, 2  ;;  %s1179_s18 = sshll.u32 (%p1621_p12), %s353_s8, 3 }
  0x2d   : > { %s361_s17 = scalar_lea.vmem (%p1621_p12), %s1847_s2, %s1181_s16  ;;  %s355_s7 = scalar_lea.vmem (%p1621_p12), [#allocation4], %s1179_s18 }
  0x2e   : > { %v378_v4 = vld [vmem:[%s361_s17] sm:$0xf] (%p1621_p12) }
  0x2f   : > { %v380_v5 = vld [vmem:[%s361_s17 + $0x20] sm:$0xf] (%p1621_p12)  ;;  %379 = vst [vmem:[%s355_s7] sm:$0xf] (%p1621_p12), %v378_v4 }
  0x30   : > { %381 = vst [vmem:[%s355_s7 + $0x4] sm:$0xf] %v380_v5 }
  0x31 PF: > { %p1182_p1 = scmp.ge.s32.totalorder %s1502_s27, 1  ;;  %p408_p2 = scmp.lt.s32.totalorder %s1502_s27, 5 }
  0x33   : > { %p409_p3 = pnand %p1182_p1, %p408_p2 }
  0x34   : > { %s415_s29 = sand.u32 (!%p409_p3), 1, %s1494_s25   ;;  %s422_s27 = sand.u32 (!%p409_p3), 1, %s1486_s23  }
  0x35   : > { %412 = sbr.rel (%p409_p3) target bundleno = 268 (0x10c), region = 147  ;;  %s1673_s13 = sshll.u32 (!%p409_p3), %s415_s29, 4 }
  0x36   : > { %s1681_s10 = sshll.u32 (!%p409_p3), %s422_s27, 3  ;;  %s429_s14 = sand.u32 (!%p409_p3), 1, %s1478_s21  }
  0x37   : > { %s1187_s17 = sshll.u32 (!%p409_p3), %s1598_s12, 4  ;;  %s1690_s7 = sshll.u32 (!%p409_p3), %s429_s14, 3 }
  0x38   : > { %s1196_s21 = sadd.s32 (!%p409_p3), 4294967295, %s1187_s17  ;;  %s424_s29 = scalar_lea.vmem (!%p409_p3), [#allocation3], %s1681_s10 }
  0x39   : > { %s417_s27 = scalar_lea.vmem (!%p409_p3), [#allocation2], %s1673_s13  ;;  %s431_s15 = scalar_lea.vmem (!%p409_p3), [#allocation4], %s1690_s7 }
  0x3a   : > { %v1360_v6 = vld [vmem:[%s1848_s3 + $0x78] sm:$0xff]  ;;  %v564_v9 = vlaneseq  ;;  %v1359_v10 = vld [vmem:[%s1848_s3 + $0x70] sm:$0xff]  ;;  %v1358_v16 = vld [vmem:[%s1848_s3 + $0x68] sm:$0xff]  ;;  %v569_v19 = vstv %s1196_s21  ;;  %vm557_vm8 = vcmask 1040384   ;;  %vm558_vm10 = vsmask.f32 256 }
  0x3b   : > { %v1352_v7 = vld [vmem:[%s1848_s3 + $0x38] sm:$0xff]  ;;  %725 = vmatpush.bf16.msra.mxu0 %v1360_v6  ;;  %v1351_v11 = vld [vmem:[%s1848_s3 + $0x30] sm:$0xff]  ;;  %1383 = vmatpush.bf16.msra.mxu3 %v1360_v6  ;;  %v1350_v17 = vld [vmem:[%s1848_s3 + $0x28] sm:$0xff]  ;;  %v1504_v51 = vmov 0   ;;  %s1800_s21 = scalar_lea.vmem [#allocation5], %s1673_s13  ;;  %p481_p6 = scmp.lt.s32.totalorder %s1598_s12, 3 }
  0x3c   : > { %v1368_v8 = vld [vmem:[%s1848_s3 + $0xb8] sm:$0xff]  ;;  %792 = vmatpush.bf16.msra.mxu1 %v1352_v7  ;;  %v1683_v12 = vshrl.u32 %v564_v9, 7  ;;  %v1367_v13 = vld [vmem:[%s1848_s3 + $0xb0] sm:$0xff]  ;;  %v1366_v18 = vld [vmem:[%s1848_s3 + $0xa8] sm:$0xff]  ;;  %v601_v52 = vunpack.c.l.b16 %v1504_v51  ;;  %v602_v53 = vunpack.c.h.b16 %v1504_v51  ;;  %s1369_s8 = sshll.u32 (%p1631_p4), %s1598_s12, 3 }
  0x3d   : > { %889 = vmatpush.bf16.msra.mxu2 %v1368_v8  ;;  %v491_v20 = vld [vmem:[%s424_s29] sm:$0x8]  ;;  %v497_v22 = vld [vmem:[%s431_s15] sm:$0x1]  ;;  %v492_v27 = vld [vmem:[%s424_s29 + $0x4] sm:$0x8]  ;;  %s972_s10 = scalar_lea.vmem (%p1631_p4), %s1849_s4, %s1369_s8 }
  0x3e   : > { %v1693_v14 = vadd.s32 8, %v1683_v12  ;;  %v567_v15 = vadd.s32 16, %v1683_v12  ;;  %v1343_v21 = vld [vmem:[%s417_s27] sm:$0xff]  ;;  %v570_v23 = vadd.s32 %v569_v19, %v1683_v12  ;;  %v501_v26 = vunpack.c.l.b16 %v491_v20  ;;  %v1344_v28 = vld [vmem:[%s417_s27 + $0x8] sm:$0xff]  ;;  %vm1761_vm14 = vmand %vm557_vm8, %vm558_vm10  ;;  %s482_s13 = scalar_select %p481_p6, %s1598_s12, 3 }
  0x3f   : > { %726 = vmatpush.bf16.msra.mxu0 %v1359_v10  ;;  %1384 = vmatpush.bf16.msra.mxu3 %v1359_v10  ;;  %v1357_v29 = vld [vmem:[%s1848_s3 + $0x60] sm:$0xff]  ;;  %v526_v31 = vshrl.u32 %v1343_v21, 16  ;;  %v545_v32 = vunpack.c.l.b16 %v497_v22  ;;  %v529_v35 = vshll.u32 %v1343_v21, 16  ;;  %v498_v36 = vld [vmem:[%s431_s15 + $0x4] sm:$0x1]  ;;  %v502_v39 = vunpack.c.l.b16 %v492_v27 }
  0x40   : > { %793 = vmatpush.bf16.msra.mxu1 %v1351_v11  ;;  %v571_v24 = vadd.s32 %v569_v19, %v1693_v14  ;;  %v572_v25 = vadd.s32 %v569_v19, %v567_v15  ;;  %v1349_v30 = vld [vmem:[%s1848_s3 + $0x20] sm:$0xff]  ;;  %vm573_vm0 = vcmp.ge.s32.totalorder %v570_v23, 0  ;;  %v503_v34 = vpack.c.b16 %v501_v26, %v501_v26  ;;  %v1356_v44 = vld [vmem:[%s1848_s3 + $0x58] sm:$0xff]  ;;  %v1355_v63 = vld [vmem:[%s1848_s3 + $0x50] sm:$0xff]  ;;  %s483_s9 = scalar_lea.vmem %s1850_s5, %s482_s13  ;;  %s486_s15 = scalar_lea.vmem %s1851_s6, %s482_s13 }
  0x41   : > { %890 = vmatpush.bf16.msra.mxu2 %v1367_v13  ;;  %v1365_v33 = vld [vmem:[%s1848_s3 + $0xa0] sm:$0xff]  ;;  %vm576_vm3 = vcmp.lt.s32.totalorder %v570_v23, 64  ;;  %v528_v37 = vrot.slane %v526_v31, 7  ;;  %v533_v42 = vshrl.u32 %v1344_v28, 16  ;;  %v536_v43 = vshll.u32 %v1344_v28, 16  ;;  %v1348_v45 = vld [vmem:[%s1848_s3 + $0x18] sm:$0xff] }
  0x42   : > { %vm574_vm1 = vcmp.ge.s32.totalorder %v571_v24, 0  ;;  %vm575_vm2 = vcmp.ge.s32.totalorder %v572_v25, 0  ;;  %vm577_vm4 = vcmp.lt.s32.totalorder %v571_v24, 64  ;;  %vm578_vm5 = vcmp.lt.s32.totalorder %v572_v25, 64  ;;  %vm1721_vm6 = vmand %vm573_vm0, %vm576_vm3  ;;  %v1364_v50 = vld [vmem:[%s1848_s3 + $0x98] sm:$0xff]  ;;  %v1347_v0 = vld [vmem:[%s1848_s3 + $0x10] sm:$0xff] }
  0x43   : > { %727 = vmatpush.bf16.msra.mxu0 %v1358_v16  ;;  %1385 = vmatpush.bf16.msra.mxu3 %v1358_v16  ;;  %v506_v40 = vshrl.u32 %v503_v34, 16  ;;  %vm1726_vm7 = vmand %vm574_vm1, %vm577_vm4  ;;  %v547_v46 = vpack.c.b16 %v545_v32, %v545_v32  ;;  %v504_v48 = vpack.c.b16 %v502_v39, %v502_v39  ;;  %v546_v49 = vunpack.c.l.b16 %v498_v36  ;;  %v1363_v6 = vld [vmem:[%s1848_s3 + $0x90] sm:$0xff]  ;;  %v1354_v16 = vld [vmem:[%s1848_s3 + $0x48] sm:$0xff] }
  0x44   : > { %794 = vmatpush.bf16.msra.mxu1 %v1350_v17  ;;  %vm1737_vm9 = vmand %vm575_vm2, %vm578_vm5  ;;  %v535_v54 = vrot.slane %v533_v42, 7  ;;  %v531_v55 = vor.u32 %v529_v35, %v528_v37  ;;  %v1346_v17 = vld [vmem:[%s1848_s3 + $0x8] sm:$0xff]  ;;  %v1353_v26 = vld [vmem:[%s1848_s3 + $0x40] sm:$0xff]  ;;  %vm633_vm5 = vsmask.f32 7424 }
  0x45   : > { %891 = vmatpush.bf16.msra.mxu2 %v1366_v18  ;;  %vm588_vm11 = vmpackc.low %vm1721_vm6, %vm1721_vm6  ;;  %v510_v57 = vshrl.u32 %v504_v48, 16  ;;  %v548_v58 = vpack.c.b16 %v546_v49, %v546_v49  ;;  %v508_v59 = vrot.slane %v506_v40, 3  ;;  %v550_v1 = vshll.u32 %v547_v46, 16  ;;  %v1362_v19 = vld [vmem:[%s1848_s3 + $0x88] sm:$0xff]  ;;  %v1345_v27 = vld [vmem:[%s1848_s3] sm:$0xff] }
  0x46   : > { %vm589_vm12 = vmpackc.low %vm1726_vm7, %vm1726_vm7  ;;  %v591_v56 = vsel %vm588_vm11, 65537, %v1504_v51  ;;  %v538_v62 = vor.u32 %v536_v43, %v535_v54  ;;  %v1361_v32 = vld [vmem:[%s1848_s3 + $0x80] sm:$0xff]  ;;  %vm815_vm6 = vcmask 1046528  }
  0x47   : > { %728 = vmatpush.bf16.msra.mxu0 %v1357_v29  ;;  %1386 = vmatpush.bf16.msra.mxu3 %v1357_v29  ;;  %vm590_vm13 = vmpackc.low %vm1737_vm9, %vm1737_vm9  ;;  %v592_v60 = vsel %vm589_vm12, 65537, %v1504_v51  ;;  %v594_v61 = vunpack.c.l.b16 %v591_v56  ;;  %v512_v5 = vrot.slane %v510_v57, 3  ;;  %v553_v9 = vshll.u32 %v548_v58, 16 }
  0x48   : > { %795 = vmatpush.bf16.msra.mxu1 %v1349_v30  ;;  %v593_v3 = vsel %vm590_vm13, 65537, %v1504_v51  ;;  %v595_v4 = vunpack.c.l.b16 %v592_v60  ;;  %v560_v11 = vsel %vm1761_vm14, %v508_v59, %v531_v55  ;;  %v562_v18 = vsel %vm1761_vm14, %v528_v37, %v550_v1 }
  0x49   : > { %892 = vmatpush.bf16.msra.mxu2 %v1365_v33  ;;  %v596_v7 = vunpack.c.l.b16 %v593_v3  ;;  %v1197_v8 = vunpack.i.l.s16 %v594_v61  ;;  %v561_v15 = vsel %vm1761_vm14, %v512_v5, %v538_v62  ;;  %v563_v20 = vsel %vm1761_vm14, %v535_v54, %v553_v9 }
  0x4a   : > { %v1198_v10 = vunpack.i.l.s16 %v595_v4  ;;  %v912_v59 = vstv %s1187_s17 }
  0x4b   : > { %729 = vmatpush.bf16.msra.mxu0 %v1356_v44  ;;  %1387 = vmatpush.bf16.msra.mxu3 %v1356_v44  ;;  %vm603_vm15 = vcmp.ne.s32.totalorder %v1197_v8, %v601_v52  ;;  %v1199_v13 = vunpack.i.l.s16 %v596_v7  ;;  %v914_v62 = vadd.s32 %v912_v59, %v1693_v14 }
  0x4c   : > { %796 = vmatpush.bf16.msra.mxu1 %v1348_v45  ;;  %vm604_vm0 = vcmp.ne.s32.totalorder %v1198_v10, %v602_v53 }
  0x4d   : > { %893 = vmatpush.bf16.msra.mxu2 %v1364_v50  ;;  %vm605_vm1 = vmpackc.low %vm604_vm0, %vm603_vm15  ;;  %vm610_vm2 = vcmp.ne.s32.totalorder %v1199_v13, %v601_v52  ;;  %vm611_vm3 = vcmp.ne.s32.totalorder %v1199_v13, %v602_v53  ;;  %vm916_vm7 = vcmp.lt.s32.totalorder %v914_v62, 64 }
  0x4e   : > { %vm612_vm4 = vmpackc.low %vm611_vm3, %vm610_vm2  ;;  %v613_v21 = vsel %vm605_vm1, %v560_v11, 0  ;;  %v615_v22 = vsel %vm605_vm1, %v561_v15, 0 }
  0x4f   : > { %730 = vmatpush.bf16.msra.mxu0 %v1355_v63  ;;  %1388 = vmatpush.bf16.msra.mxu3 %v1355_v63  ;;  %v614_v23 = vsel %vm612_vm4, %v562_v18, 0  ;;  %v635_v24 = vshrl.u32 %v613_v21, 16  ;;  %v637_v25 = vshll.u32 %v613_v21, 16  ;;  %v816_v29 = vrot.slane %v613_v21, 1 }
  0x50   : > { %797 = vmatpush.bf16.msra.mxu1 %v1347_v0  ;;  %v642_v28 = vshll.u32 %v614_v23, 16  ;;  %v817_v30 = vrot.slane %v614_v23, 1  ;;  %v616_v31 = vsel %vm612_vm4, %v563_v20, 0  ;;  %v647_v34 = vshrl.u32 %v615_v22, 16 }
  0x51   : > { %894 = vmatpush.bf16.msra.mxu2 %v1363_v6  ;;  %v639_v33 = vrot.slane %v637_v25, 1  ;;  %v649_v35 = vshll.u32 %v615_v22, 16  ;;  %v654_v36 = vshll.u32 %v616_v31, 16  ;;  %v819_v45 = vrot.slane %v615_v22, 1 }
  0x52   : > { %v644_v37 = vrot.slane %v642_v28, 1  ;;  %v818_v42 = vsel %vm815_vm6, %v816_v29, %v817_v30  ;;  %v820_v46 = vrot.slane %v616_v31, 1  ;;  %v913_v0 = vadd.s32 %v912_v59, %v1683_v12 }
  0x53   : > { %731 = vmatpush.bf16.msra.mxu0 %v1354_v16  ;;  %1389 = vmatpush.bf16.msra.mxu3 %v1354_v16  ;;  %v640_v38 = vor.u32 %v639_v33, %v635_v24  ;;  %v651_v39 = vrot.slane %v649_v35, 1  ;;  %v656_v40 = vrot.slane %v654_v36, 1 }
  0x54   : > { %798 = vmatpush.bf16.msra.mxu1 %v1346_v17  ;;  %v821_v47 = vsel %vm815_vm6, %v819_v45, %v820_v46  ;;  %vm915_vm8 = vcmp.lt.s32.totalorder %v913_v0, 64 }
  0x55   : > { %895 = vmatpush.bf16.msra.mxu2 %v1362_v19  ;;  %v645_v41 = vsel %vm633_vm5, %v640_v38, %v644_v37  ;;  %v652_v43 = vor.u32 %v651_v39, %v647_v34 }
  0x57   : > { %732 = vmatpush.bf16.msra.mxu0 %v1353_v26  ;;  %1390 = vmatpush.bf16.msra.mxu3 %v1353_v26  ;;  %v657_v44 = vsel %vm633_vm5, %v652_v43, %v656_v40 }
  0x58   : > { %799 = vmatpush.bf16.msra.mxu1 %v1345_v27 }
  0x59   : > { %896 = vmatpush.bf16.msra.mxu2 %v1361_v32 }
  0x5a   : > { %733 = vmatmul.bf16.vlgmr.msra.gmra.mxu0 %v645_v41  ;;  %738 = vmatmul.bf16.vlgmr.msra.gmra.mxu3 %v657_v44 }
  0x5b   : > { %800 = vmatmul.bf16.vlgmr.msra.gmra.mxu1 %v613_v21 }
  0x5c   : > { %897 = vmatmul.bf16.vlgmr.msra.gmra.mxu2 %v818_v42 }
  0x6b   : > { %805 = vmatmul.bf16.gmra.mxu1 %v615_v22 }
  0x6c   : > { %902 = vmatmul.bf16.gmra.mxu2 %v821_v47 }
  0xd7   : > { %v734_v49 = vpop.f32.mrf.mxu0 }
  0xd8   : > { %v801_v48 = vpop.f32.mrf.mxu1 }
  0xd9   : > { %v802_v53 = vadd.f32 %v801_v48, %v734_v49 }
  0xdd   : > { %v739_v61 = vpop.f32.mrf.mxu3 }
  0xdf   : > { %v898_v50 = vpop.f32.mrf.mxu2  ;;  %v736_v52 = vpop.f32.mrf.mxu0 }
  0xe0   : > { %v803_v51 = vpop.f32.mrf.mxu1  ;;  %v908_v56 = vadd.f32 %v898_v50, %v802_v53 }
  0xe1   : > { %v804_v54 = vadd.f32 %v803_v51, %v736_v52 }
  0xe2   : > { %v921_v5 = vsel %vm915_vm8, %v908_v56, 0.0 }
  0xe3   : > { %v935_v9 = vmul.f32 %v921_v5, %v921_v5 }
  0xe5   : > { %v741_v8 = vpop.f32.mrf.mxu3 }
  0xe7   : > { %v900_v55 = vpop.f32.mrf.mxu2 }
  0xe8   : > { %v909_v57 = vadd.f32 %v900_v55, %v804_v54  ;;  %v806_v58 = vpop.f32.mrf.mxu1 }
  0xe9   : > { %v807_v63 = vadd.f32 %v806_v58, %v739_v61 }
  0xea   : > { %v1373_v60 = vpack.c.bf16 %v909_v57, %v908_v56  ;;  %v922_v3 = vsel %vm916_vm7, %v909_v57, 0.0 }
  0xeb   : > { %v936_v7 = vmul.f32 %v922_v3, %v922_v3  ;;  %v925_v10 = vadd.f32 %v922_v3, %v921_v5 }
  0xec   : > { %1374 = vst [vmem:[%s1800_s21] sm:$0xff] %v1373_v60  }
  0xed   : > { %v939_v12 = vadd.f32 %v936_v7, %v935_v9 }
  0xef   : > { %v903_v1 = vpop.f32.mrf.mxu2 }
  0xf0   : > { %v910_v2 = vadd.f32 %v903_v1, %v807_v63  ;;  %v808_v4 = vpop.f32.mrf.mxu1 }
  0xf1   : > { %v809_v14 = vadd.f32 %v808_v4, %v741_v8 }
  0xf2   : > { %v923_v6 = vsel %vm915_vm8, %v910_v2, 0.0 }
  0xf3   : > { %v937_v11 = vmul.f32 %v923_v6, %v923_v6  ;;  %v926_v16 = vadd.f32 %v925_v10, %v923_v6  ;;  %v989_v35 = vld [vmem:[%s1800_s21] sm:$0xff] (%p1631_p4)  }
  0xf4   : > { %990 = vst [vmem:[%s972_s10] sm:$0xff] (%p1631_p4), %v989_v35  }
  0xf5   : > { %v940_v19 = vadd.f32 %v939_v12, %v937_v11 }
  0xf7   : > { %v905_v13 = vpop.f32.mrf.mxu2 }
  0xf8   : > { %v911_v15 = vadd.f32 %v905_v13, %v809_v14 }
  0xfa   : > { %v924_v17 = vsel %vm916_vm7, %v911_v15, 0.0  ;;  %v1378_v18 = vpack.c.bf16 %v911_v15, %v910_v2 }
  0xfb   : > { %v927_v20 = vadd.f32 %v926_v16, %v924_v17  ;;  %v938_v21 = vmul.f32 %v924_v17, %v924_v17 }
  0xfc   : > { %1382 = vst [vmem:[%s1800_s21 + $0x8] sm:$0xff] %v1378_v18  }
  0xfd   : > { %v928_v22 = vrot.slane %v927_v20, 4  ;;  %v941_v23 = vadd.f32 %v940_v19, %v938_v21 }
  0xff   : > { %v929_v24 = vadd.f32 %v928_v22, %v927_v20  ;;  %v942_v25 = vrot.slane %v941_v23, 4 }
 0x101   : > { %v930_v26 = vrot.slane %v929_v24, 2  ;;  %v943_v27 = vadd.f32 %v942_v25, %v941_v23 }
 0x103   : > { %v931_v28 = vadd.f32 %v930_v26, %v929_v24  ;;  %v944_v29 = vrot.slane %v943_v27, 2  ;;  %v993_v36 = vld [vmem:[%s1800_s21 + $0x8] sm:$0xff] (%p1631_p4)  }
 0x104   : > { %994 = vst [vmem:[%s972_s10 + $0x20] sm:$0xff] (%p1631_p4), %v993_v36  }
 0x105   : > { %v932_v30 = vrot.slane %v931_v28, 1  ;;  %v945_v31 = vadd.f32 %v944_v29, %v943_v27 }
 0x107   : > { %v933_v32 = vadd.f32 %v932_v30, %v931_v28  ;;  %v946_v33 = vrot.slane %v945_v31, 1  ;;  %969 = sbr.rel (!%p1631_p4) target bundleno = 268 (0x10c), region = 163 }
 0x109   : > { %934 = vst [vmem:[%s483_s9] sm:$0x1] %v933_v32  ;;  %v947_v34 = vadd.f32 %v946_v33, %v945_v31 }
 0x10b   : > { %948 = vst [vmem:[%s486_s15] sm:$0x1] %v947_v34 }
 0x10c PF: > { %s1872_s27 = sld [smem:[#allocation7_spill]]  ;;  %s1877_s21 = smov %s1482_s22 }
 0x10d   : > { %s1873_s23 = sld [smem:[#allocation10_spill]] }
 0x10e   : > { %s1874_s30 = sld [smem:[#allocation9_spill]] }
 0x10f   : > { %s1875_s25 = sld [smem:[#allocation6_spill]] }
 0x110   : > { %s1876_s26 = sld [smem:[#allocation8_spill]] }
 0x112   : > { %p14_p7 = scmp.ge.s32.totalorder %s1872_s27, 6  }
 0x113   : > { %s1878_s22 = smov %s1873_s23  ;;  %s1879_s23 = smov %s1490_s24 }
 0x114   : > { %s1880_s24 = smov %s1874_s30  ;;  %16 = sbr.rel (!%p14_p7) target bundleno = 4 (0x4), region = 277 }

// kernel: encoder_forward.10
= control target key start
LH: loop header
LB: loop body
LE: loop exit
PB: predicated region body
PF: predicated region fallthrough
CT: control target
= control target key end

     0   :  { %s2108_s0 = inlined_call_operand.vmem [shape: bf16[2,64,128], index: 0, kind: input, shape index: {}, may-alias: {0,1,2}]   ;;  %s2109_s1 = inlined_call_operand.vmem [shape: bf16[2,64,128], index: 1, kind: input, shape index: {}, may-alias: {0,1,2}]   ;;  %s2110_s2 = inlined_call_operand.vmem [shape: bf16[2,64,128], index: 2, kind: input, shape index: {}, may-alias: {0,1,2}]   ;;  %s2111_s3 = inlined_call_operand.vmem [shape: bf16[3,128,128], index: 3, kind: input, shape index: {}]   ;;  %s2112_s4 = inlined_call_operand.vmem [shape: f32[1,1,128], index: 4, kind: input, shape index: {}]   ;;  %s2113_s5 = inlined_call_operand.vmem [shape: f32[1,1,128], index: 5, kind: input, shape index: {}]   ;;  %s2114_s6 = inlined_call_operand.vmem [shape: f32[1,1,128], index: 6, kind: input, shape index: {}]   ;;  %s2115_s7 = inlined_call_operand.vmem [shape: f32[1,1,128], index: 7, kind: input, shape index: {}]   ;;  %s2116_s8 = inlined_call_operand.vmem [shape: bf16[2,64,128], index: 8, kind: output, shape index: {0}]   ;;  %s2117_s9 = inlined_call_operand.vmem [shape: f32[4,1,128], index: 9, kind: output, shape index: {1}]   ;;  %s2118_s10 = inlined_call_operand.vmem [shape: f32[4,1,128], index: 10, kind: output, shape index: {2}]  }
   0x1   :  { %2123 = sst [smem:[#allocation12_spill]] %s2116_s8 }
   0x2   :  { %2124 = sst [smem:[#allocation13_spill]] %s2117_s9 }
   0x3   :  { %2125 = sst [smem:[#allocation14_spill]] %s2118_s10 }
   0x4   :  { %s1757_s13 = smov 0   ;;  %s1759_s14 = smov 0  }
   0x5   :  { %s1761_s15 = smov 0   ;;  %s1763_s16 = smov 0  }
   0x6   :  { %s1765_s17 = smov 0   ;;  %s1767_s18 = smov 0  }
   0x7   :  { %s1769_s19 = smov 0  }
   0x8 LB: > { %2126 = sst [smem:[#allocation6_spill]] %s1696_s18  ;;  %s1793_s20 = sadd.s32 1, %s1700_s19   ;;  %s1700_s19 = sphi %s1769_s19, %s2150_s19   ;;  %s1696_s18 = sphi %s1767_s18, %s2154_s18   ;;  %s1692_s17 = sphi %s1765_s17, %s2159_s17   ;;  %s1688_s16 = sphi %s1763_s16, %s2158_s16   ;;  %s1684_s15 = sphi %s1761_s15, %s2157_s15   ;;  %s1680_s14 = sphi %s1759_s14, %s2156_s14   ;;  %s1676_s13 = sphi %s1757_s13, %s2155_s13  }
   0x9   : > { %2127 = sst [smem:[#allocation7_spill]] %s1793_s20  ;;  %s25_s21 = ssub.s32 %s1700_s19, %s1793_s20 }
   0xa   : > { %s28_s22 = sadd.s32 1, %s1696_s18  ;;  %p26_p0 = scmp.eq.s32.totalorder %s25_s21, 0 }
   0xb   : > { %p35_p1 = scmp.ne.s32.totalorder %s1696_s18, %s1692_s17  ;;  %p36_p2 = scmp.eq.s32.totalorder %s1700_s19, 0 }
   0xc   : > { %s1363_s23 = sshll.u32 %s1700_s19, 1  ;;  %s1815_s28 = sadd.s32 4294967295, %s1700_s19  }
   0xd   : > { %s1803_s24 = scalar_select %p26_p0, %s1696_s18, %s28_s22  }
   0xe   : > { %p1810_p3 = por %p36_p2, %p35_p1  ;;  %s1364_s26 = sadd.s32 4294967295, %s1363_s23 }
   0xf   : > { %2128 = sst [smem:[#allocation8_spill]] %s1803_s24  ;;  %p53_p4 = scmp.gt.s32.totalorder %s1364_s26, 0 }
  0x10   : > { %s1532_s27 = sadd.s32 2, %s1363_s23  ;;  %p69_p6 = scmp.ne.s32.totalorder %s1688_s16, %s1684_s15 }
  0x11   : > { %s1366_s29 = sadd.s32 4294967295, %s1532_s27  ;;  %s2161_s26 = smov (!%p53_p4, %s1364_s26), 0 }
  0x12   : > { %p57_p5 = scmp.gt.s32.totalorder %s1366_s29, 0  ;;  %p87_p7 = scmp.lt.s32.totalorder %s1532_s27, 7 }
  0x13   : > { %s1536_s30 = sadd.s32 2, %s1532_s27  ;;  %s62_s11 = sadd.s32 1, %s1688_s16 }
  0x14   : > { %s2163_s29 = smov (!%p57_p5, %s1366_s29), 0  ;;  %p1824_p8 = por %p69_p6, %p36_p2 }
  0x15   : > { %s59_s21 = ssub.s32 %s2161_s26, %s2163_s29  ;;  %p91_p9 = scmp.lt.s32.totalorder %s1536_s30, 7 }
  0x16   : > { %p60_p10 = scmp.eq.s32.totalorder %s59_s21, 0  ;;  %p103_p11 = scmp.ne.s32.totalorder %s1680_s14, %s1676_s13 }
  0x17   : > { %s2165_s27 = smov (!%p87_p7, %s1532_s27), 7  ;;  %s2167_s30 = smov (!%p91_p9, %s1536_s30), 7 }
  0x18   : > { %s1834_s22 = scalar_select %p60_p10, %s1688_s16, %s62_s11  }
  0x19   : > { %p1838_p12 = por %p103_p11, %p36_p2  ;;  %p238_p13 = scmp.eq.s32.totalorder %s1815_s28, 3 }
  0x1a   : > { %2131 = sst [smem:[#allocation9_spill]] %s1834_s22  ;;  %s93_s24 = ssub.s32 %s2165_s27, %s2167_s30 }
  0x1b   : > { %s96_s20 = sadd.s32 1, %s1680_s14  ;;  %p94_p0 = scmp.eq.s32.totalorder %s93_s24, 0 }
  0x1c   : > { %p1848_p4 = por %p238_p13, %p35_p1  ;;  %p1370_p5 = scmp.ge.s32.totalorder %s1700_s19, 4 }
  0x1d   : > { %s1853_s21 = scalar_select %p94_p0, %s1680_s14, %s96_s20  }
  0x1e   : > { %s2133_s29 = scalar_select %p1848_p4, 1, 0 }
  0x1f   : > { %2135 = sst [smem:[#allocation11_spill]] %s1853_s21  ;;  %327 = sbr.rel (%p1370_p5) target bundleno = 54 (0x36), region = 36 }
  0x20   : > { %2134 = sst [smem:[#allocation10_spill]] %s2133_s29 }
  0x24   : > { %330 = sbr.rel (!%p1810_p3) target bundleno = 42 (0x2a), region = 40  ;;  %s332_s11 = sand.u32 (%p1810_p3), 1, %s1696_s18  }
  0x25   : > { %s1537_s22 = sshll.u32 (%p1810_p3), %s1700_s19, 3  ;;  %s1371_s30 = sshll.u32 (%p1810_p3), %s332_s11, 4 }
  0x26   : > { %s337_s10 = scalar_lea.vmem (%p1810_p3), %s2108_s0, %s1537_s22  ;;  %s334_s29 = scalar_lea.vmem (%p1810_p3), [#allocation2], %s1371_s30 }
  0x27   : > { %v354_v0 = vld [vmem:[%s337_s10] sm:$0xff] (%p1810_p3)  }
  0x28   : > { %v358_v1 = vld [vmem:[%s337_s10 + $0x20] sm:$0xff] (%p1810_p3)   ;;  %355 = vst [vmem:[%s334_s29] sm:$0xff] (%p1810_p3), %v354_v0  }
  0x29   : > { %359 = vst [vmem:[%s334_s29 + $0x8] sm:$0xff] %v358_v1  }
  0x2a PF: > { %393 = sbr.rel (!%p1824_p8) target bundleno = 48 (0x30), region = 81  ;;  %s395_s20 = sand.u32 (%p1824_p8), 1, %s1688_s16  }
  0x2b   : > { %s1377_s25 = sshll.u32 (%p1824_p8), %s2161_s26, 2  ;;  %s1374_s18 = sshll.u32 (%p1824_p8), %s395_s20, 3 }
  0x2c   : > { %s403_s9 = scalar_lea.vmem (%p1824_p8), %s2109_s1, %s1377_s25  ;;  %s397_s8 = scalar_lea.vmem (%p1824_p8), [#allocation3], %s1374_s18 }
  0x2d   : > { %v420_v2 = vld [vmem:[%s403_s9] sm:$0xf] (%p1824_p8) }
  0x2e   : > { %v422_v3 = vld [vmem:[%s403_s9 + $0x20] sm:$0xf] (%p1824_p8)  ;;  %421 = vst [vmem:[%s397_s8] sm:$0xf] (%p1824_p8), %v420_v2 }
  0x2f   : > { %423 = vst [vmem:[%s397_s8 + $0x4] sm:$0xf] %v422_v3 }
  0x30 PF: > { %451 = sbr.rel (!%p1838_p12) target bundleno = 54 (0x36), region = 122  ;;  %s453_s10 = sand.u32 (%p1838_p12), 1, %s1680_s14  }
  0x31   : > { %s1380_s12 = sshll.u32 (%p1838_p12), %s2165_s27, 2  ;;  %s1378_s22 = sshll.u32 (%p1838_p12), %s453_s10, 3 }
  0x32   : > { %s461_s30 = scalar_lea.vmem (%p1838_p12), %s2110_s2, %s1380_s12  ;;  %s455_s21 = scalar_lea.vmem (%p1838_p12), [#allocation4], %s1378_s22 }
  0x33   : > { %v478_v4 = vld [vmem:[%s461_s30] sm:$0xf] (%p1838_p12) }
  0x34   : > { %v480_v5 = vld [vmem:[%s461_s30 + $0x20] sm:$0xf] (%p1838_p12)  ;;  %479 = vst [vmem:[%s455_s21] sm:$0xf] (%p1838_p12), %v478_v4 }
  0x35   : > { %481 = vst [vmem:[%s455_s21 + $0x4] sm:$0xf] %v480_v5 }
  0x36 PF: > { %p1381_p1 = scmp.ge.s32.totalorder %s1700_s19, 1  ;;  %p508_p2 = scmp.lt.s32.totalorder %s1700_s19, 5 }
  0x38   : > { %p509_p3 = pnand %p1381_p1, %p508_p2 }
  0x39   : > { %s522_s22 = sand.u32 (!%p509_p3), 1, %s1684_s15   ;;  %s515_s9 = sand.u32 (!%p509_p3), 1, %s1692_s17  }
  0x3a   : > { %512 = sbr.rel (%p509_p3) target bundleno = 296 (0x128), region = 163  ;;  %s1383_s23 = sshll.u32 (!%p509_p3), %s522_s22, 3 }
  0x3b   : > { %s1916_s11 = sshll.u32 (!%p509_p3), %s515_s9, 4  ;;  %s529_s12 = sand.u32 (!%p509_p3), 1, %s1676_s13  }
  0x3c   : > { %s524_s29 = scalar_lea.vmem (!%p509_p3), [#allocation3], %s1383_s23  ;;  %s1384_s30 = sshll.u32 (!%p509_p3), %s529_s12, 3 }
  0x3d   : > { %s517_s23 = scalar_lea.vmem (!%p509_p3), [#allocation2], %s1916_s11  ;;  %s531_s10 = scalar_lea.vmem (!%p509_p3), [#allocation4], %s1384_s30 }
  0x3e   : > { %s1386_s27 = sshll.u32 (!%p509_p3), %s1815_s28, 4  ;;  %p589_p6 = scmp.lt.s32.totalorder (!%p509_p3), %s1815_s28, 3 }
  0x3f   : > { %v1549_v6 = vld [vmem:[%s2111_s3 + $0x38] sm:$0xff]  ;;  %v1548_v9 = vld [vmem:[%s2111_s3 + $0x30] sm:$0xff]  ;;  %v1547_v12 = vld [vmem:[%s2111_s3 + $0x28] sm:$0xff]  ;;  %v692_v58 = vlaneseq  ;;  %vm685_vm0 = vcmask 1040384   ;;  %vm686_vm1 = vsmask.f32 256 }
  0x40   : > { %v1565_v7 = vld [vmem:[%s2111_s3 + $0xb8] sm:$0xff]  ;;  %977 = vmatpush.bf16.msra.mxu1 %v1549_v6  ;;  %v1564_v10 = vld [vmem:[%s2111_s3 + $0xb0] sm:$0xff]  ;;  %v1563_v13 = vld [vmem:[%s2111_s3 + $0xa8] sm:$0xff]  ;;  %s1395_s20 = sadd.s32 4294967295, %s1386_s27  ;;  %vm998_vm15 = vcmask 1042432   ;;  %s2146_s26 = sld [smem:[#allocation13_spill]] }
  0x41   : > { %v1557_v8 = vld [vmem:[%s2111_s3 + $0x78] sm:$0xff]  ;;  %1088 = vmatpush.bf16.msra.mxu2 %v1565_v7  ;;  %v1556_v11 = vld [vmem:[%s2111_s3 + $0x70] sm:$0xff]  ;;  %v1555_v14 = vld [vmem:[%s2111_s3 + $0x68] sm:$0xff]  ;;  %v1979_v6 = vshrl.u32 %v692_v58, 7  ;;  %s2147_s9 = sld [smem:[#allocation14_spill]]  ;;  %s1566_s13 = sshll.u32 (%p1848_p4), %s1815_s28, 3 }
  0x42   : > { %898 = vmatpush.bf16.msra.mxu0 %v1557_v8  ;;  %1580 = vmatpush.bf16.msra.mxu3 %v1557_v8  ;;  %v595_v15 = vld [vmem:[%s2112_s4] sm:$0x1]  ;;  %v619_v24 = vld [vmem:[%s524_s29] sm:$0x8]  ;;  %v1545_v25 = vld [vmem:[%s2111_s3 + $0x18] sm:$0xff]  ;;  %s2149_s24 = sld [smem:[#allocation12_spill]] (%p1848_p4) }
  0x43   : > { %v597_v16 = vld [vmem:[%s2113_s5] sm:$0x1]  ;;  %v1914_v17 = vmul.f32 0.0078125, %v595_v15  ;;  %v1561_v26 = vld [vmem:[%s2111_s3 + $0x98] sm:$0xff]  ;;  %v620_v28 = vld [vmem:[%s524_s29 + $0x4] sm:$0x8]  ;;  %v629_v33 = vunpack.c.l.b16 %v619_v24 }
  0x44   : > { %978 = vmatpush.bf16.msra.mxu1 %v1548_v9  ;;  %v598_v18 = vmul.f32 0.0078125, %v597_v16  ;;  %v1546_v19 = vld [vmem:[%s2111_s3 + $0x20] sm:$0xff]  ;;  %v1553_v29 = vld [vmem:[%s2111_s3 + $0x58] sm:$0xff]  ;;  %v630_v34 = vunpack.c.l.b16 %v620_v28  ;;  %v1544_v35 = vld [vmem:[%s2111_s3 + $0x10] sm:$0xff]  ;;  %v1989_v15 = vadd.s32 8, %v1979_v6 }
  0x45   : > { %1089 = vmatpush.bf16.msra.mxu2 %v1564_v10  ;;  %v1562_v20 = vld [vmem:[%s2111_s3 + $0xa0] sm:$0xff]  ;;  %v599_v21 = vmul.f32 %v1914_v17, %v1914_v17  ;;  %v1541_v32 = vld [vmem:[%s517_s23 + $0x8] sm:$0xff]  ;;  %v1560_v36 = vld [vmem:[%s2111_s3 + $0x90] sm:$0xff]  ;;  %v631_v40 = vpack.c.b16 %v629_v33, %v629_v33  ;;  %v697_v10 = vstv %s1395_s20 }
  0x46   : > { %899 = vmatpush.bf16.msra.mxu0 %v1556_v11  ;;  %1581 = vmatpush.bf16.msra.mxu3 %v1556_v11  ;;  %v1554_v22 = vld [vmem:[%s2111_s3 + $0x60] sm:$0xff]  ;;  %v1552_v37 = vld [vmem:[%s2111_s3 + $0x50] sm:$0xff]  ;;  %v661_v42 = vshrl.u32 %v1541_v32, 16  ;;  %v632_v43 = vpack.c.b16 %v630_v34, %v630_v34  ;;  %v1543_v44 = vld [vmem:[%s2111_s3 + $0x8] sm:$0xff]  ;;  %v664_v54 = vshll.u32 %v1541_v32, 16 }
  0x47   : > { %v600_v23 = vsub.f32 %v598_v18, %v599_v21  ;;  %v1540_v31 = vld [vmem:[%s517_s23] sm:$0xff]  ;;  %v625_v38 = vld [vmem:[%s531_s10] sm:$0x1]  ;;  %v626_v39 = vld [vmem:[%s531_s10 + $0x4] sm:$0x1]  ;;  %v634_v51 = vshrl.u32 %v631_v40, 16 }
  0x48   : > { %979 = vmatpush.bf16.msra.mxu1 %v1547_v12  ;;  %v654_v41 = vshrl.u32 %v1540_v31, 16  ;;  %v1559_v45 = vld [vmem:[%s2111_s3 + $0x88] sm:$0xff]  ;;  %v673_v46 = vunpack.c.l.b16 %v625_v38  ;;  %v674_v47 = vunpack.c.l.b16 %v626_v39  ;;  %v657_v48 = vshll.u32 %v1540_v31, 16  ;;  %v1542_v57 = vld [vmem:[%s2111_s3] sm:$0xff]  ;;  %vm1975_vm4 = vmand %vm685_vm0, %vm686_vm1  ;;  %s2064_s10 = scalar_lea.vmem [#allocation5], %s1916_s11  ;;  %s1171_s20 = scalar_lea.vmem (%p1848_p4), %s2149_s24, %s1566_s13 }
  0x49   : > { %1090 = vmatpush.bf16.msra.mxu2 %v1563_v13  ;;  %v601_v27 = vmax.f32 %v600_v23, 0.0  ;;  %v1551_v49 = vld [vmem:[%s2111_s3 + $0x48] sm:$0xff]  ;;  %v663_v53 = vrot.slane %v661_v42, 7  ;;  %v638_v56 = vshrl.u32 %v632_v43, 16  ;;  %v1558_v59 = vld [vmem:[%s2111_s3 + $0x80] sm:$0xff]  ;;  %v636_v63 = vrot.slane %v634_v51, 3 }
  0x4a   : > { %900 = vmatpush.bf16.msra.mxu0 %v1555_v14  ;;  %1582 = vmatpush.bf16.msra.mxu3 %v1555_v14  ;;  %v656_v52 = vrot.slane %v654_v41, 7  ;;  %v675_v60 = vpack.c.b16 %v673_v46, %v673_v46  ;;  %v676_v61 = vpack.c.b16 %v674_v47, %v674_v47  ;;  %v1550_v2 = vld [vmem:[%s2111_s3 + $0x40] sm:$0xff]  ;;  %v695_v21 = vadd.s32 16, %v1979_v6  ;;  %s590_s11 = scalar_select %p589_p6, %s1815_s28, 3 }
  0x4b   : > { %v1939_v30 = vadd.f32 1e-05, %v601_v27  ;;  %v666_v1 = vor.u32 %v664_v54, %v663_v53  ;;  %v640_v4 = vrot.slane %v638_v56, 3  ;;  %v613_v12 = vld [vmem:[%s2114_s6] sm:$0x1]  ;;  %v699_v31 = vadd.s32 %v697_v10, %v1989_v15 }
  0x4c   : > { %980 = vmatpush.bf16.msra.mxu1 %v1546_v19  ;;  %v659_v0 = vor.u32 %v657_v48, %v656_v52  ;;  %v678_v7 = vshll.u32 %v675_v60, 16  ;;  %v681_v8 = vshll.u32 %v676_v61, 16  ;;  %v700_v33 = vadd.s32 %v697_v10, %v695_v21  ;;  %s591_s29 = scalar_lea.vmem %s2146_s26, %s590_s11  ;;  %s594_s18 = scalar_lea.vmem %s2147_s9, %s590_s11 }
  0x4d   : > { %1091 = vmatpush.bf16.msra.mxu2 %v1562_v20  ;;  %1644 = vrsqrt.f32 %v1939_v30  ;;  %vm609_vm2 = vweird.f32 %v1939_v30  ;;  %v689_v14 = vsel %vm1975_vm4, %v640_v4, %v666_v1  ;;  %v698_v20 = vadd.s32 %v697_v10, %v1979_v6 }
  0x4e   : > { %901 = vmatpush.bf16.msra.mxu0 %v1554_v22  ;;  %1583 = vmatpush.bf16.msra.mxu3 %v1554_v22  ;;  %v688_v13 = vsel %vm1975_vm4, %v636_v63, %v659_v0  ;;  %v690_v16 = vsel %vm1975_vm4, %v656_v52, %v678_v7  ;;  %v691_v18 = vsel %vm1975_vm4, %v663_v53, %v681_v8  ;;  %v714_v27 = vunpack.c.h.bf16 %v689_v14 }
  0x4f   : > { %v710_v23 = vunpack.c.l.bf16 %v688_v13  ;;  %v711_v24 = vunpack.c.h.bf16 %v688_v13  ;;  %v712_v28 = vunpack.c.l.bf16 %v690_v16  ;;  %vm701_vm6 = vcmp.ge.s32.totalorder %v698_v20, 0 }
  0x50   : > { %981 = vmatpush.bf16.msra.mxu1 %v1545_v25  ;;  %v713_v25 = vunpack.c.l.bf16 %v689_v14  ;;  %vm704_vm7 = vcmp.lt.s32.totalorder %v698_v20, 64  ;;  %vm702_vm8 = vcmp.ge.s32.totalorder %v699_v31, 0  ;;  %vm705_vm9 = vcmp.lt.s32.totalorder %v699_v31, 64 }
  0x51   : > { %1092 = vmatpush.bf16.msra.mxu2 %v1561_v26  ;;  %v615_v26 = vld [vmem:[%s2115_s7] sm:$0x1]  ;;  %vm703_vm10 = vcmp.ge.s32.totalorder %v700_v33, 0  ;;  %vm706_vm11 = vcmp.lt.s32.totalorder %v700_v33, 64  ;;  %vm2003_vm12 = vmand %vm701_vm6, %vm704_vm7  ;;  %vm999_vm0 = vcmask 1046532  }
  0x52   : > { %902 = vmatpush.bf16.msra.mxu0 %v1553_v29  ;;  %1584 = vmatpush.bf16.msra.mxu3 %v1553_v29  ;;  %v715_v29 = vunpack.c.l.bf16 %v691_v18  ;;  %vm708_vm13 = vmand %vm702_vm8, %vm705_vm9  ;;  %vm774_vm1 = vsmask.f32 3328 }
  0x53   : > { %v1645_v50 = vpop.eup %1644  ;;  %vm2007_vm14 = vmand %vm703_vm10, %vm706_vm11 }
  0x54   : > { %982 = vmatpush.bf16.msra.mxu1 %v1544_v35  ;;  %v604_v55 = vmul.f32 %v1645_v50, %v1939_v30  ;;  %vm610_vm3 = vweird.f32 %v1645_v50 }
  0x55   : > { %1093 = vmatpush.bf16.msra.mxu2 %v1560_v36  ;;  %vm611_vm5 = vmor %vm609_vm2, %vm610_vm3  ;;  %vm775_vm2 = vsmask.f32 7440 }
  0x56   : > { %903 = vmatpush.bf16.msra.mxu0 %v1552_v37  ;;  %1585 = vmatpush.bf16.msra.mxu3 %v1552_v37  ;;  %v605_v62 = vmul.f32 %v1645_v50, %v604_v55  ;;  %vm2025_vm3 = vmor %vm998_vm15, %vm999_vm0 }
  0x57   : > { %vm2036_vm4 = vmor %vm774_vm1, %vm775_vm2 }
  0x58   : > { %983 = vmatpush.bf16.msra.mxu1 %v1543_v44  ;;  %v606_v3 = vmul.f32 0.5, %v605_v62 }
  0x59   : > { %1094 = vmatpush.bf16.msra.mxu2 %v1559_v45 }
  0x5a   : > { %904 = vmatpush.bf16.msra.mxu0 %v1551_v49  ;;  %1586 = vmatpush.bf16.msra.mxu3 %v1551_v49  ;;  %v607_v9 = vsub.f32 1.5, %v606_v3 }
  0x5c   : > { %984 = vmatpush.bf16.msra.mxu1 %v1542_v57  ;;  %v608_v11 = vmul.f32 %v1645_v50, %v607_v9 }
  0x5d   : > { %1095 = vmatpush.bf16.msra.mxu2 %v1558_v59 }
  0x5e   : > { %905 = vmatpush.bf16.msra.mxu0 %v1550_v2  ;;  %1587 = vmatpush.bf16.msra.mxu3 %v1550_v2  ;;  %v612_v19 = vsel %vm611_vm5, %v1645_v50, %v608_v11 }
  0x5f   : > { %v614_v22 = vmul.f32 %v613_v12, %v612_v19 }
  0x61   : > { %v616_v30 = vmul.f32 %v614_v22, %v1914_v17  ;;  %v717_v32 = vperm.slane %v614_v22, 0 }
  0x63   : > { %v617_v34 = vsub.f32 %v615_v26, %v616_v30  ;;  %v719_v35 = vmul.f32 %v717_v32, %v710_v23  ;;  %v720_v36 = vmul.f32 %v717_v32, %v711_v24  ;;  %v722_v37 = vmul.f32 %v717_v32, %v713_v25 }
  0x64   : > { %v723_v38 = vmul.f32 %v717_v32, %v714_v27  ;;  %v721_v39 = vmul.f32 %v717_v32, %v712_v28  ;;  %v724_v40 = vmul.f32 %v717_v32, %v715_v29 }
  0x65   : > { %v726_v41 = vperm.slane %v617_v34, 0 }
  0x67   : > { %v728_v42 = vadd.f32 %v726_v41, %v719_v35  ;;  %v729_v43 = vadd.f32 %v726_v41, %v720_v36  ;;  %v731_v44 = vadd.f32 %v726_v41, %v722_v37  ;;  %v732_v45 = vadd.f32 %v726_v41, %v723_v38 }
  0x68   : > { %v730_v46 = vadd.f32 %v726_v41, %v721_v39  ;;  %v733_v47 = vadd.f32 %v726_v41, %v724_v40 }
  0x69   : > { %v734_v48 = vmax.f32 %v728_v42, 0.0  ;;  %v735_v49 = vmax.f32 %v729_v43, 0.0  ;;  %v737_v50 = vmax.f32 %v731_v44, 0.0  ;;  %v738_v51 = vmax.f32 %v732_v45, 0.0 }
  0x6a   : > { %v736_v53 = vmax.f32 %v730_v46, 0.0  ;;  %v739_v54 = vmax.f32 %v733_v47, 0.0 }
  0x6b   : > { %v746_v55 = vsel %vm2003_vm12, %v734_v48, 0.0  ;;  %v747_v56 = vsel %vm708_vm13, %v735_v49, 0.0  ;;  %v749_v57 = vsel %vm2003_vm12, %v737_v50, 0.0  ;;  %v750_v58 = vsel %vm708_vm13, %v738_v51, 0.0 }
  0x6c   : > { %v752_v59 = vpack.c.bf16 %v746_v55, %v746_v55  ;;  %v753_v60 = vpack.c.bf16 %v747_v56, %v747_v56  ;;  %v2015_v61 = vpack.c.bf16 %v749_v57, %v749_v57  ;;  %v2017_v62 = vpack.c.bf16 %v750_v58, %v750_v58 }
  0x6d   : > { %v748_v63 = vsel %vm2007_vm14, %v736_v53, 0.0  ;;  %v751_v0 = vsel %vm2007_vm14, %v739_v54, 0.0 }
  0x6e   : > { %v921_v1 = vunpack.c.l.b16 %v752_v59  ;;  %v922_v2 = vunpack.c.l.b16 %v753_v60  ;;  %v754_v3 = vpack.c.bf16 %v748_v63, %v748_v63  ;;  %v1476_v5 = vrot.slane %v752_v59, 9 }
  0x6f   : > { %v1003_v7 = vrot.slane %v753_v60, 5  ;;  %v778_v8 = vshrl.u32 %v752_v59, 16  ;;  %v781_v9 = vshll.u32 %v752_v59, 16  ;;  %v787_v10 = vshll.u32 %v753_v60, 16 }
  0x70   : > { %v925_v11 = vpack.c.b16 %v922_v2, %v921_v1  ;;  %v1006_v12 = vrot.slane %v754_v3, 5  ;;  %v791_v13 = vshrl.u32 %v753_v60, 16  ;;  %v797_v14 = vshll.u32 %v754_v3, 16 }
  0x71   : > { %v1004_v16 = vsel %vm2025_vm3, %v1476_v5, %v1003_v7  ;;  %v1005_v18 = vrot.slane %v1003_v7, 4  ;;  %v780_v19 = vrot.slane %v778_v8, 4  ;;  %v783_v20 = vrot.slane %v781_v9, 5 }
  0x72   : > { %985 = vmatmul.bf16.vlgmr.msra.gmra.mxu1 %v925_v11  ;;  %v1032_v21 = vunpack.c.l.b16 %v1004_v16  ;;  %v789_v22 = vrot.slane %v787_v10, 5  ;;  %v793_v23 = vrot.slane %v791_v13, 4  ;;  %v799_v24 = vrot.slane %v797_v14, 5 }
  0x73   : > { %v1007_v25 = vsel %vm2025_vm3, %v1005_v18, %v1006_v12  ;;  %v784_v26 = vor.u32 %v783_v20, %v780_v19  ;;  %v757_v27 = vpack.c.bf16 %v751_v0, %v751_v0  ;;  %v802_v28 = vshrl.u32 %v2015_v61, 16 }
  0x74   : > { %v1033_v29 = vunpack.c.l.b16 %v1007_v25  ;;  %v794_v31 = vor.u32 %v793_v23, %v789_v22  ;;  %v805_v32 = vshll.u32 %v2015_v61, 16  ;;  %v811_v33 = vshll.u32 %v2017_v62, 16 }
  0x75   : > { %v785_v34 = vrot.slane %v784_v26, 4  ;;  %v804_v35 = vrot.slane %v802_v28, 4  ;;  %v815_v36 = vshrl.u32 %v2017_v62, 16  ;;  %v821_v37 = vshll.u32 %v757_v27, 16 }
  0x76   : > { %v1036_v38 = vpack.c.b16 %v1033_v29, %v1032_v21  ;;  %v795_v39 = vrot.slane %v794_v31, 4  ;;  %v807_v40 = vrot.slane %v805_v32, 5  ;;  %v813_v41 = vrot.slane %v811_v33, 5 }
  0x77   : > { %v790_v17 = vsel %vm2036_vm4, %v785_v34, %v789_v22  ;;  %v817_v42 = vrot.slane %v815_v36, 4  ;;  %v823_v46 = vrot.slane %v821_v37, 5  ;;  %v1477_v49 = vrot.slane %v2015_v61, 9 }
  0x78   : > { %1096 = vmatmul.bf16.vlgmr.msra.gmra.mxu2 %v1036_v38  ;;  %v800_v43 = vsel %vm2036_vm4, %v795_v39, %v799_v24  ;;  %v842_v44 = vunpack.c.l.b16 %v790_v17  ;;  %v808_v45 = vor.u32 %v807_v40, %v804_v35  ;;  %v1010_v50 = vrot.slane %v2017_v62, 5 }
  0x79   : > { %v843_v47 = vunpack.c.l.b16 %v800_v43  ;;  %v818_v48 = vor.u32 %v817_v42, %v813_v41  ;;  %v923_v52 = vunpack.c.l.b16 %v2015_v61  ;;  %v924_v53 = vunpack.c.l.b16 %v2017_v62 }
  0x7a   : > { %v809_v51 = vrot.slane %v808_v45, 4  ;;  %v1013_v54 = vrot.slane %v757_v27, 5  ;;  %v1012_v57 = vrot.slane %v1010_v50, 4  ;;  %v1011_v63 = vsel %vm2025_vm3, %v1477_v49, %v1010_v50 }
  0x7b   : > { %v846_v55 = vpack.c.b16 %v843_v47, %v842_v44  ;;  %v819_v56 = vrot.slane %v818_v48, 4  ;;  %v926_v62 = vpack.c.b16 %v924_v53, %v923_v52  ;;  %v1034_v2 = vunpack.c.l.b16 %v1011_v63 }
  0x7c   : > { %v814_v58 = vsel %vm2036_vm4, %v809_v51, %v813_v41  ;;  %v1014_v61 = vsel %vm2025_vm3, %v1012_v57, %v1013_v54  ;;  %v1111_v20 = vstv %s1386_s27 }
  0x7d   : > { %906 = vmatmul.bf16.vlgmr.msra.gmra.mxu0 %v846_v55  ;;  %v824_v59 = vsel %vm2036_vm4, %v819_v56, %v823_v46  ;;  %v844_v60 = vunpack.c.l.b16 %v814_v58  ;;  %v1035_v3 = vunpack.c.l.b16 %v1014_v61  ;;  %v1113_v21 = vadd.s32 %v1111_v20, %v1989_v15 }
  0x7e   : > { %v845_v0 = vunpack.c.l.b16 %v824_v59  ;;  %v1112_v24 = vadd.s32 %v1111_v20, %v1979_v6 }
  0x7f   : > { %v1037_v5 = vpack.c.b16 %v1035_v3, %v1034_v2  ;;  %vm1115_vm5 = vcmp.lt.s32.totalorder %v1113_v21, 64 }
  0x80   : > { %v847_v1 = vpack.c.b16 %v845_v0, %v844_v60  ;;  %vm1114_vm6 = vcmp.lt.s32.totalorder %v1112_v24, 64 }
  0x82   : > { %911 = vmatmul.bf16.vlgmr.msra.gmra.mxu3 %v847_v1  ;;  %990 = vmatmul.bf16.gmra.mxu1 %v926_v62 }
  0x88   : > { %1101 = vmatmul.bf16.gmra.mxu2 %v1037_v5 }
  0xef   : > { %v986_v7 = vpop.f32.mrf.mxu1 }
  0xf7   : > { %v988_v9 = vpop.f32.mrf.mxu1 }
  0xfa   : > { %v907_v8 = vpop.f32.mrf.mxu0 }
  0xfb   : > { %v1097_v10 = vpop.f32.mrf.mxu2  ;;  %v987_v11 = vadd.f32 %v986_v7, %v907_v8 }
  0xfd   : > { %v1107_v14 = vadd.f32 %v1097_v10, %v987_v11 }
  0xff   : > { %v991_v18 = vpop.f32.mrf.mxu1  ;;  %v1120_v30 = vsel %vm1114_vm6, %v1107_v14, 0.0 }
 0x100   : > { %v1134_v33 = vmul.f32 %v1120_v30, %v1120_v30 }
 0x102   : > { %v909_v12 = vpop.f32.mrf.mxu0 }
 0x103   : > { %v989_v13 = vadd.f32 %v988_v9, %v909_v12  ;;  %v1099_v4 = vpop.f32.mrf.mxu2 }
 0x105   : > { %v912_v16 = vpop.f32.mrf.mxu3  ;;  %v1108_v19 = vadd.f32 %v1099_v4, %v989_v13 }
 0x106   : > { %v992_v23 = vadd.f32 %v991_v18, %v912_v16 }
 0x107   : > { %v1570_v22 = vpack.c.bf16 %v1108_v19, %v1107_v14  ;;  %v1121_v27 = vsel %vm1115_vm5, %v1108_v19, 0.0  ;;  %v993_v29 = vpop.f32.mrf.mxu1 }
 0x108   : > { %v1135_v15 = vmul.f32 %v1121_v27, %v1121_v27  ;;  %v1124_v6 = vadd.f32 %v1121_v27, %v1120_v30 }
 0x109   : > { %1571 = vst [vmem:[%s2064_s10] sm:$0xff] %v1570_v22  }
 0x10a   : > { %v1138_v37 = vadd.f32 %v1135_v15, %v1134_v33 }
 0x10b   : > { %v1102_v25 = vpop.f32.mrf.mxu2 }
 0x10c   : > { %v1109_v26 = vadd.f32 %v1102_v25, %v992_v23 }
 0x10d   : > { %v914_v28 = vpop.f32.mrf.mxu3 }
 0x10e   : > { %v1122_v31 = vsel %vm1114_vm6, %v1109_v26, 0.0  ;;  %v994_v32 = vadd.f32 %v993_v29, %v914_v28 }
 0x10f   : > { %v1136_v34 = vmul.f32 %v1122_v31, %v1122_v31  ;;  %v1125_v38 = vadd.f32 %v1124_v6, %v1122_v31 }
 0x110   : > { %v1188_v56 = vld [vmem:[%s2064_s10] sm:$0xff] (%p1848_p4)  }
 0x111   : > { %v1139_v41 = vadd.f32 %v1138_v37, %v1136_v34  ;;  %1189 = vst [vmem:[%s1171_s20] sm:$0xff] (%p1848_p4), %v1188_v56  }
 0x113   : > { %v1104_v35 = vpop.f32.mrf.mxu2 }
 0x114   : > { %v1110_v36 = vadd.f32 %v1104_v35, %v994_v32 }
 0x116   : > { %v1123_v39 = vsel %vm1115_vm5, %v1110_v36, 0.0  ;;  %v1575_v40 = vpack.c.bf16 %v1110_v36, %v1109_v26 }
 0x117   : > { %v1126_v17 = vadd.f32 %v1125_v38, %v1123_v39  ;;  %v1137_v42 = vmul.f32 %v1123_v39, %v1123_v39 }
 0x118   : > { %1579 = vst [vmem:[%s2064_s10 + $0x8] sm:$0xff] %v1575_v40  }
 0x119   : > { %v1127_v43 = vrot.slane %v1126_v17, 4  ;;  %v1140_v44 = vadd.f32 %v1139_v41, %v1137_v42 }
 0x11b   : > { %v1128_v45 = vadd.f32 %v1127_v43, %v1126_v17  ;;  %v1141_v46 = vrot.slane %v1140_v44, 4 }
 0x11d   : > { %v1129_v47 = vrot.slane %v1128_v45, 2  ;;  %v1142_v48 = vadd.f32 %v1141_v46, %v1140_v44 }
 0x11f   : > { %v1130_v49 = vadd.f32 %v1129_v47, %v1128_v45  ;;  %v1143_v50 = vrot.slane %v1142_v48, 2  ;;  %v1192_v57 = vld [vmem:[%s2064_s10 + $0x8] sm:$0xff] (%p1848_p4)  }
 0x120   : > { %1193 = vst [vmem:[%s1171_s20 + $0x20] sm:$0xff] (%p1848_p4), %v1192_v57  }
 0x121   : > { %v1131_v51 = vrot.slane %v1130_v49, 1  ;;  %v1144_v52 = vadd.f32 %v1143_v50, %v1142_v48 }
 0x123   : > { %v1132_v53 = vadd.f32 %v1131_v51, %v1130_v49  ;;  %v1145_v54 = vrot.slane %v1144_v52, 1  ;;  %1168 = sbr.rel (!%p1848_p4) target bundleno = 296 (0x128), region = 179 }
 0x125   : > { %1133 = vst [vmem:[%s591_s29] sm:$0x1] %v1132_v53  ;;  %v1146_v55 = vadd.f32 %v1145_v54, %v1144_v52 }
 0x127   : > { %1147 = vst [vmem:[%s594_s18] sm:$0x1] %v1146_v55 }
 0x128 PF: > { %s2150_s19 = sld [smem:[#allocation7_spill]]  ;;  %s2155_s13 = smov %s1680_s14 }
 0x129   : > { %s2151_s25 = sld [smem:[#allocation11_spill]]  ;;  %s2157_s15 = smov %s1688_s16 }
 0x12a   : > { %s2152_s17 = sld [smem:[#allocation9_spill]] }
 0x12b   : > { %s2153_s8 = sld [smem:[#allocation6_spill]] }
 0x12c   : > { %s2154_s18 = sld [smem:[#allocation8_spill]] }
 0x12e   : > { %p18_p7 = scmp.ge.s32.totalorder %s2150_s19, 6  }
 0x12f   : > { %s2156_s14 = smov %s2151_s25 }
 0x130   : > { %s2158_s16 = smov %s2152_s17  ;;  %20 = sbr.rel (!%p18_p7) target bundleno = 8 (0x8), region = 293 }
 0x131   : > { %s2159_s17 = smov %s2153_s8 }

// kernel: encoder_forward.12
= control target key start
LH: loop header
LB: loop body
LE: loop exit
PB: predicated region body
PF: predicated region fallthrough
CT: control target
= control target key end

     0   :  { %s1719_s21 = smov 0   ;;  %s1721_s22 = smov 0   ;;  %s2146_s0 = inlined_call_operand.vmem [shape: bf16[2,48,128], index: 0, kind: input, shape index: {}, may-alias: {0,1,2}]   ;;  %s2147_s1 = inlined_call_operand.vmem [shape: bf16[2,48,128], index: 1, kind: input, shape index: {}, may-alias: {0,1,2}]   ;;  %s2148_s2 = inlined_call_operand.vmem [shape: bf16[2,48,128], index: 2, kind: input, shape index: {}, may-alias: {0,1,2}]   ;;  %s2149_s3 = inlined_call_operand.vmem [shape: bf16[3,128,128], index: 3, kind: input, shape index: {}]   ;;  %s2150_s4 = inlined_call_operand.vmem [shape: bf16[2,48,128], index: 4, kind: output, shape index: {0}]   ;;  %s2151_s5 = inlined_call_operand.vmem [shape: f32[2,1,128], index: 5, kind: output, shape index: {1}]   ;;  %s2152_s6 = inlined_call_operand.vmem [shape: f32[2,1,128], index: 6, kind: output, shape index: {2}]  }
   0x1   :  { %s1723_s23 = smov 0   ;;  %s1725_s24 = smov 0  }
   0x2   :  { %s1727_s25 = smov 0   ;;  %s1729_s26 = smov 0  }
   0x3   :  { %s1731_s27 = smov 0  }
   0x4 LB: > { %s1755_s28 = sadd.s32 1, %s1681_s27   ;;  %s24_s30 = sadd.s32 1, %s1677_s26  ;;  %s1681_s27 = sphi %s1731_s27, %s2178_s27   ;;  %s1677_s26 = sphi %s1729_s26, %s2186_s26   ;;  %s1673_s25 = sphi %s1727_s25, %s2185_s25   ;;  %s1669_s24 = sphi %s1725_s24, %s2184_s24   ;;  %s1665_s23 = sphi %s1723_s23, %s2183_s23   ;;  %s1661_s22 = sphi %s1721_s22, %s2182_s22   ;;  %s1657_s21 = sphi %s1719_s21, %s2181_s21  }
   0x5   : > { %2155 = sst [smem:[#allocation6_spill]] %s1755_s28  ;;  %s21_s29 = ssub.s32 %s1681_s27, %s1755_s28 }
   0x6   : > { %p22_p0 = scmp.eq.s32.totalorder %s21_s29, 0  ;;  %p31_p1 = scmp.ne.s32.totalorder %s1677_s26, %s1673_s25 }
   0x7   : > { %p32_p2 = scmp.eq.s32.totalorder %s1681_s27, 0  ;;  %s47_s7 = smul.u32 3, %s1681_s27 }
   0x8   : > { %s1765_s8 = scalar_select %p22_p0, %s1677_s26, %s24_s30  }
   0x9   : > { %p1772_p3 = por %p32_p2, %p31_p1  ;;  %s1356_s10 = sadd.s32 4294967295, %s47_s7 }
   0xa   : > { %2156 = sst [smem:[#allocation7_spill]] %s1765_s8  ;;  %p49_p4 = scmp.gt.s32.totalorder %s1356_s10, 0 }
   0xb   : > { %s51_s11 = smul.u32 3, %s1755_s28  ;;  %s1778_s12 = sadd.s32 4294967295, %s1681_s27  }
   0xc   : > { %p65_p5 = scmp.ne.s32.totalorder %s1669_s24, %s1665_s23  ;;  %s2188_s10 = smov (!%p49_p4, %s1356_s10), 0 }
   0xd   : > { %s1357_s13 = sadd.s32 4294967295, %s51_s11  ;;  %p83_p8 = scmp.lt.s32.totalorder %s51_s11, 5 }
   0xe   : > { %p1786_p6 = por %p65_p5, %p32_p2  ;;  %p53_p7 = scmp.gt.s32.totalorder %s1357_s13, 0 }
   0xf   : > { %s58_s15 = sadd.s32 1, %s1669_s24  ;;  %s85_s16 = sadd.s32 1, %s1755_s28 }
  0x10   : > { %s2190_s13 = smov (!%p53_p7, %s1357_s13), 0  ;;  %s2192_s11 = smov (!%p83_p8, %s51_s11), 5 }
  0x11   : > { %s55_s17 = ssub.s32 %s2188_s10, %s2190_s13  ;;  %s86_s18 = smul.u32 3, %s85_s16 }
  0x12   : > { %p56_p9 = scmp.eq.s32.totalorder %s55_s17, 0  ;;  %p99_p10 = scmp.ne.s32.totalorder %s1661_s22, %s1657_s21 }
  0x13   : > { %p87_p11 = scmp.lt.s32.totalorder %s86_s18, 5  ;;  %p150_p12 = scmp.eq.s32.totalorder %s1778_s12, 1 }
  0x14   : > { %s1799_s19 = scalar_select %p56_p9, %s1669_s24, %s58_s15  }
  0x15   : > { %s2194_s18 = smov (!%p87_p11, %s86_s18), 5  ;;  %p1803_p13 = por %p99_p10, %p32_p2 }
  0x16   : > { %2159 = sst [smem:[#allocation8_spill]] %s1799_s19  ;;  %p1810_p0 = por %p150_p12, %p31_p1 }
  0x17   : > { %s89_s30 = ssub.s32 %s2192_s11, %s2194_s18  ;;  %s92_s7 = sadd.s32 1, %s1661_s22 }
  0x18   : > { %p90_p4 = scmp.eq.s32.totalorder %s89_s30, 0  ;;  %p1359_p5 = scmp.ge.s32.totalorder %s1681_s27, 2 }
  0x1a   : > { %s1817_s13 = scalar_select %p90_p4, %s1661_s22, %s92_s7  }
  0x1b   : > { %227 = sbr.rel (%p1359_p5) target bundleno = 53 (0x35), region = 20 }
  0x20   : > { %230 = sbr.rel (!%p1772_p3) target bundleno = 41 (0x29), region = 24  ;;  %s232_s15 = sand.u32 (%p1772_p3), 1, %s1677_s26  }
  0x21   : > { %s1515_s16 = smul.u32 (%p1772_p3), 12, %s1681_s27 }
  0x22   : > { %s1568_s17 = smul.u32 (%p1772_p3), 24, %s232_s15 }
  0x23   : > { %s237_s28 = scalar_lea.vmem (%p1772_p3), %s2146_s0, %s1515_s16 }
  0x24   : > { %v254_v0 = vld [vmem:[%s237_s28] sm:$0xff] (%p1772_p3)   ;;  %v258_v1 = vld [vmem:[%s237_s28 + $0x8] sm:$0xf] (%p1772_p3)  ;;  %v260_v2 = vld [vmem:[%s237_s28 + $0x18] sm:$0xff] (%p1772_p3)   ;;  %s234_s18 = scalar_lea.vmem (%p1772_p3), [#allocation2], %s1568_s17 }
  0x25   : > { %255 = vst [vmem:[%s234_s18] sm:$0xff] %v254_v0   ;;  %v264_v3 = vld [vmem:[%s237_s28 + $0x20] sm:$0xf] }
  0x26   : > { %259 = vst [vmem:[%s234_s18 + $0x8] sm:$0xf] %v258_v1 }
  0x27   : > { %261 = vst [vmem:[%s234_s18 + $0xc] sm:$0xff] %v260_v2  }
  0x28   : > { %265 = vst [vmem:[%s234_s18 + $0x14] sm:$0xf] %v264_v3 }
  0x29 PF: > { %301 = sbr.rel (!%p1786_p6) target bundleno = 47 (0x2f), region = 65  ;;  %s303_s9 = sand.u32 (%p1786_p6), 1, %s1669_s24  }
  0x2a   : > { %s1363_s30 = sshll.u32 (%p1786_p6), %s2188_s10, 2  ;;  %s1361_s7 = sshll.u32 (%p1786_p6), %s303_s9, 3 }
  0x2b   : > { %s311_s15 = scalar_lea.vmem (%p1786_p6), %s2147_s1, %s1363_s30  ;;  %s305_s16 = scalar_lea.vmem (%p1786_p6), [#allocation3], %s1361_s7 }
  0x2c   : > { %v328_v4 = vld [vmem:[%s311_s15] sm:$0xf] (%p1786_p6)  ;;  %v330_v5 = vld [vmem:[%s311_s15 + $0x18] sm:$0xf] (%p1786_p6) }
  0x2d   : > { %329 = vst [vmem:[%s305_s16] sm:$0xf] (%p1786_p6), %v328_v4 }
  0x2e   : > { %331 = vst [vmem:[%s305_s16 + $0x4] sm:$0xf] %v330_v5 }
  0x2f PF: > { %359 = sbr.rel (!%p1803_p13) target bundleno = 53 (0x35), region = 106  ;;  %s361_s28 = sand.u32 (%p1803_p13), 1, %s1661_s22  }
  0x30   : > { %s1365_s14 = sshll.u32 (%p1803_p13), %s2192_s11, 2  ;;  %s1364_s17 = sshll.u32 (%p1803_p13), %s361_s28, 3 }
  0x31   : > { %s369_s9 = scalar_lea.vmem (%p1803_p13), %s2148_s2, %s1365_s14  ;;  %s363_s30 = scalar_lea.vmem (%p1803_p13), [#allocation4], %s1364_s17 }
  0x32   : > { %v386_v6 = vld [vmem:[%s369_s9] sm:$0xf] (%p1803_p13)  ;;  %v388_v7 = vld [vmem:[%s369_s9 + $0x18] sm:$0xf] (%p1803_p13) }
  0x33   : > { %387 = vst [vmem:[%s363_s30] sm:$0xf] (%p1803_p13), %v386_v6 }
  0x34   : > { %389 = vst [vmem:[%s363_s30 + $0x4] sm:$0xf] %v388_v7 }
  0x35 PF: > { %p1366_p1 = scmp.ge.s32.totalorder %s1681_s27, 1  ;;  %p416_p2 = scmp.lt.s32.totalorder %s1681_s27, 3 }
  0x37   : > { %p417_p3 = pnand %p1366_p1, %p416_p2 }
  0x38   : > { %s423_s16 = sand.u32 (!%p417_p3), 1, %s1673_s25   ;;  %s430_s18 = sand.u32 (!%p417_p3), 1, %s1665_s23  }
  0x39   : > { %420 = sbr.rel (%p417_p3) target bundleno = 295 (0x127), region = 147  ;;  %s437_s25 = sand.u32 (!%p417_p3), 1, %s1657_s21  }
  0x3a   : > { %s1859_s10 = smul.u32 (!%p417_p3), 24, %s423_s16  ;;  %s1367_s20 = sshll.u32 (!%p417_p3), %s430_s18, 3 }
  0x3b   : > { %s498_s11 = smul.u32 (!%p417_p3), 24, %s1778_s12  ;;  %s1876_s21 = sshll.u32 (!%p417_p3), %s437_s25, 3 }
  0x3c   : > { %s1881_s27 = scalar_lea.vmem (!%p417_p3), [#allocation2], %s1859_s10  ;;  %s432_s7 = scalar_lea.vmem (!%p417_p3), [#allocation3], %s1367_s20 }
  0x3d   : > { %s1377_s28 = sadd.s32 (!%p417_p3), 4294967295, %s498_s11  ;;  %s439_s8 = scalar_lea.vmem (!%p417_p3), [#allocation4], %s1876_s21 }
  0x3e   : > { %v1525_v8 = vld [vmem:[%s2149_s3 + $0x38] sm:$0xff]  ;;  %v1524_v11 = vld [vmem:[%s2149_s3 + $0x30] sm:$0xff]  ;;  %v601_v14 = vlaneseq  ;;  %v1523_v15 = vld [vmem:[%s2149_s3 + $0x28] sm:$0xff]  ;;  %v607_v30 = vstv %s1377_s28  ;;  %vm541_vm0 = vsmask.f32 256  ;;  %vm592_vm1 = vcmask 1040384  }
  0x3f   : > { %v1541_v9 = vld [vmem:[%s2149_s3 + $0xb8] sm:$0xff]  ;;  %926 = vmatpush.bf16.msra.mxu1 %v1525_v8  ;;  %v1540_v12 = vld [vmem:[%s2149_s3 + $0xb0] sm:$0xff]  ;;  %v1539_v16 = vld [vmem:[%s2149_s3 + $0xa8] sm:$0xff]  ;;  %vm596_vm14 = vcmask 1044480   ;;  %s2092_s17 = scalar_lea.vmem [#allocation5], %s1859_s10  ;;  %p489_p6 = scmp.lt.s32.totalorder %s1778_s12, 1 }
  0x40   : > { %v1533_v10 = vld [vmem:[%s2149_s3 + $0x78] sm:$0xff]  ;;  %1050 = vmatpush.bf16.msra.mxu2 %v1541_v9  ;;  %v1532_v13 = vld [vmem:[%s2149_s3 + $0x70] sm:$0xff]  ;;  %v1531_v17 = vld [vmem:[%s2149_s3 + $0x68] sm:$0xff]  ;;  %v1878_v18 = vshrl.u32 %v601_v14, 7 }
  0x41   : > { %848 = vmatpush.bf16.msra.mxu0 %v1533_v10  ;;  %1560 = vmatpush.bf16.msra.mxu3 %v1533_v10  ;;  %v503_v19 = vld [vmem:[%s1881_s27 + $0x8] sm:$0xf]  ;;  %v506_v20 = vld [vmem:[%s1881_s27 + $0x14] sm:$0xf]  ;;  %v499_v24 = vld [vmem:[%s432_s7] sm:$0x8] }
  0x42   : > { %v1522_v21 = vld [vmem:[%s2149_s3 + $0x20] sm:$0xff]  ;;  %v533_v25 = vunpack.c.l.b16 %v503_v19  ;;  %v536_v26 = vunpack.c.l.b16 %v506_v20  ;;  %v500_v27 = vld [vmem:[%s432_s7 + $0x4] sm:$0x8]  ;;  %v1900_v29 = vadd.s32 8, %v1878_v18  ;;  %v1904_v32 = vadd.s32 16, %v1878_v18  ;;  %vm1944_vm4 = vmand %vm592_vm1, %vm541_vm0  ;;  %s490_s10 = scalar_select %p489_p6, %s1778_s12, 1 }
  0x43   : > { %927 = vmatpush.bf16.msra.mxu1 %v1524_v11  ;;  %v1538_v22 = vld [vmem:[%s2149_s3 + $0xa0] sm:$0xff]  ;;  %v1521_v33 = vld [vmem:[%s2149_s3 + $0x18] sm:$0xff]  ;;  %v511_v35 = vunpack.c.l.b16 %v499_v24  ;;  %v605_v36 = vadd.s32 24, %v1878_v18  ;;  %v512_v39 = vunpack.c.l.b16 %v500_v27  ;;  %v608_v42 = vadd.s32 %v607_v30, %v1878_v18  ;;  %v1520_v48 = vld [vmem:[%s2149_s3 + $0x10] sm:$0xff]  ;;  %s1542_s7 = smul.u32 (%p1810_p0), 12, %s1778_s12 }
  0x44   : > { %1051 = vmatpush.bf16.msra.mxu2 %v1540_v12  ;;  %v1530_v23 = vld [vmem:[%s2149_s3 + $0x60] sm:$0xff]  ;;  %v1537_v34 = vld [vmem:[%s2149_s3 + $0x98] sm:$0xff]  ;;  %v1916_v40 = vpack.c.b16 %v533_v25, %v533_v25  ;;  %v1918_v41 = vpack.c.b16 %v536_v26, %v536_v26  ;;  %v609_v46 = vadd.s32 %v607_v30, %v1900_v29  ;;  %v610_v47 = vadd.s32 %v607_v30, %v1904_v32  ;;  %v1536_v49 = vld [vmem:[%s2149_s3 + $0x90] sm:$0xff]  ;;  %s494_s25 = scalar_lea.vmem %s2152_s6, %s490_s10 }
  0x45   : > { %849 = vmatpush.bf16.msra.mxu0 %v1532_v13  ;;  %1561 = vmatpush.bf16.msra.mxu3 %v1532_v13  ;;  %v1897_v28 = vld [vmem:[%s1881_s27] sm:$0xff]  ;;  %v1922_v43 = vld [vmem:[%s1881_s27 + $0xc] sm:$0xff]  ;;  %v513_v50 = vpack.c.b16 %v511_v35, %v511_v35  ;;  %v611_v53 = vadd.s32 %v607_v30, %v605_v36  ;;  %v514_v55 = vpack.c.b16 %v512_v39, %v512_v39  ;;  %vm612_vm2 = vcmp.ge.s32.totalorder %v608_v42, 0  ;;  %s491_s27 = scalar_lea.vmem %s2151_s5, %s490_s10  ;;  %s1156_s20 = scalar_lea.vmem (%p1810_p0), %s2150_s4, %s1542_s7 }
  0x46   : > { %v507_v31 = vld [vmem:[%s439_s8] sm:$0x1]  ;;  %v1529_v37 = vld [vmem:[%s2149_s3 + $0x58] sm:$0xff]  ;;  %v508_v38 = vld [vmem:[%s439_s8 + $0x4] sm:$0x1]  ;;  %v543_v44 = vshrl.u32 %v1897_v28, 16 }
  0x47   : > { %928 = vmatpush.bf16.msra.mxu1 %v1523_v15  ;;  %v578_v45 = vunpack.c.l.b16 %v507_v31  ;;  %v546_v51 = vshll.u32 %v1897_v28, 16  ;;  %v579_v52 = vunpack.c.l.b16 %v508_v38  ;;  %v1528_v54 = vld [vmem:[%s2149_s3 + $0x50] sm:$0xff]  ;;  %v550_v56 = vshrl.u32 %v1916_v40, 16  ;;  %v1519_v62 = vld [vmem:[%s2149_s3 + $0x8] sm:$0xff]  ;;  %v1518_v15 = vld [vmem:[%s2149_s3] sm:$0xff] }
  0x48   : > { %1052 = vmatpush.bf16.msra.mxu2 %v1539_v16  ;;  %v565_v57 = vshrl.u32 %v1918_v41, 16  ;;  %v1939_v58 = vrot.slane %v543_v44, 7  ;;  %v558_v59 = vshrl.u32 %v1922_v43, 16  ;;  %vm613_vm3 = vcmp.ge.s32.totalorder %v609_v46, 0  ;;  %v1535_v63 = vld [vmem:[%s2149_s3 + $0x88] sm:$0xff]  ;;  %v1534_v16 = vld [vmem:[%s2149_s3 + $0x80] sm:$0xff] }
  0x49   : > { %850 = vmatpush.bf16.msra.mxu0 %v1531_v17  ;;  %1562 = vmatpush.bf16.msra.mxu3 %v1531_v17  ;;  %v580_v60 = vpack.c.b16 %v578_v45, %v578_v45  ;;  %vm614_vm5 = vcmp.ge.s32.totalorder %v610_v47, 0  ;;  %vm616_vm6 = vcmp.lt.s32.totalorder %v608_v42, 32  ;;  %vm617_vm7 = vcmp.lt.s32.totalorder %v609_v46, 32  ;;  %v1527_v3 = vld [vmem:[%s2149_s3 + $0x48] sm:$0xff] }
  0x4a   : > { %vm618_vm8 = vcmp.lt.s32.totalorder %v610_v47, 32  ;;  %v516_v0 = vshrl.u32 %v513_v50, 16  ;;  %v581_v1 = vpack.c.b16 %v579_v52, %v579_v52  ;;  %vm615_vm9 = vcmp.ge.s32.totalorder %v611_v53, 0  ;;  %vm1955_vm11 = vmand %vm612_vm2, %vm616_vm6 }
  0x4b   : > { %929 = vmatpush.bf16.msra.mxu1 %v1522_v21  ;;  %vm619_vm10 = vcmp.lt.s32.totalorder %v611_v53, 32  ;;  %v552_v4 = vrot.slane %v550_v56, 7  ;;  %v553_v5 = vshll.u32 %v1916_v40, 16  ;;  %v567_v6 = vrot.slane %v565_v57, 7  ;;  %vm1966_vm12 = vmand %vm613_vm3, %vm617_vm7 }
  0x4c   : > { %1053 = vmatpush.bf16.msra.mxu2 %v1538_v22  ;;  %v568_v7 = vshll.u32 %v1918_v41, 16  ;;  %v520_v9 = vshrl.u32 %v514_v55, 16  ;;  %v560_v10 = vrot.slane %v558_v59, 7  ;;  %v561_v11 = vshll.u32 %v1922_v43, 16  ;;  %vm1973_vm13 = vmand %vm614_vm5, %vm618_vm8  ;;  %v1526_v22 = vld [vmem:[%s2149_s3 + $0x40] sm:$0xff] }
  0x4d   : > { %851 = vmatpush.bf16.msra.mxu0 %v1530_v23  ;;  %1563 = vmatpush.bf16.msra.mxu3 %v1530_v23  ;;  %v583_v13 = vshll.u32 %v580_v60, 16  ;;  %vm1979_vm15 = vmand %vm615_vm9, %vm619_vm10  ;;  %v548_v17 = vor.u32 %v546_v51, %v1939_v58  ;;  %v587_v19 = vshll.u32 %v581_v1, 16  ;;  %vm597_vm1 = vsmask.f32 4352 }
  0x4e   : > { %vm632_vm2 = vmpackc.low %vm1955_vm11, %vm1955_vm11  ;;  %v1683_v20 = vmov 0   ;;  %v518_v23 = vrot.slane %v516_v0, 3  ;;  %v555_v24 = vor.u32 %v553_v5, %v552_v4  ;;  %v570_v25 = vor.u32 %v568_v7, %v567_v6 }
  0x4f   : > { %930 = vmatpush.bf16.msra.mxu1 %v1521_v33  ;;  %v648_v21 = vunpack.c.l.b16 %v1683_v20  ;;  %vm633_vm3 = vmpackc.low %vm1966_vm12, %vm1966_vm12  ;;  %v636_v26 = vsel %vm632_vm2, 65537, %v1683_v20  ;;  %v522_v27 = vrot.slane %v520_v9, 3  ;;  %v563_v28 = vor.u32 %v561_v11, %v560_v10 }
  0x50   : > { %1054 = vmatpush.bf16.msra.mxu2 %v1537_v34  ;;  %vm634_vm5 = vmpackc.low %vm1973_vm13, %vm1973_vm13  ;;  %v637_v30 = vsel %vm633_vm3, 65537, %v1683_v20  ;;  %v640_v31 = vunpack.c.l.b16 %v636_v26  ;;  %v585_v33 = vrot.slane %v583_v13, 4  ;;  %v649_v36 = vunpack.c.h.b16 %v1683_v20 }
  0x51   : > { %852 = vmatpush.bf16.msra.mxu0 %v1529_v37  ;;  %1564 = vmatpush.bf16.msra.mxu3 %v1529_v37  ;;  %vm635_vm6 = vmpackc.low %vm1979_vm15, %vm1979_vm15  ;;  %v638_v34 = vsel %vm634_vm5, 65537, %v1683_v20  ;;  %v641_v35 = vunpack.c.l.b16 %v637_v30  ;;  %v589_v37 = vrot.slane %v587_v19, 4  ;;  %v556_v41 = vsel %vm541_vm0, %v1939_v58, %v555_v24 }
  0x52   : > { %v639_v38 = vsel %vm635_vm6, 65537, %v1683_v20  ;;  %v642_v39 = vunpack.c.l.b16 %v638_v34  ;;  %v1378_v40 = vunpack.i.l.s16 %v640_v31  ;;  %v571_v42 = vsel %vm541_vm0, %v560_v10, %v570_v25  ;;  %vm2010_vm7 = vmand %vm596_vm14, %vm597_vm1 }
  0x53   : > { %931 = vmatpush.bf16.msra.mxu1 %v1520_v48  ;;  %v643_v44 = vunpack.c.l.b16 %v639_v38  ;;  %v1379_v45 = vunpack.i.l.s16 %v641_v35  ;;  %v594_v46 = vsel %vm1944_vm4, %v518_v23, %v548_v17  ;;  %v595_v47 = vsel %vm1944_vm4, %v522_v27, %v563_v28 }
  0x54   : > { %1055 = vmatpush.bf16.msra.mxu2 %v1536_v49  ;;  %vm650_vm8 = vcmp.ne.s32.totalorder %v1378_v40, %v648_v21  ;;  %v1380_v48 = vunpack.i.l.s16 %v642_v39  ;;  %v599_v50 = vsel %vm2010_vm7, %v556_v41, %v585_v33  ;;  %v600_v51 = vsel %vm2010_vm7, %v571_v42, %v589_v37 }
  0x55   : > { %853 = vmatpush.bf16.msra.mxu0 %v1528_v54  ;;  %1565 = vmatpush.bf16.msra.mxu3 %v1528_v54  ;;  %vm651_vm9 = vcmp.ne.s32.totalorder %v1379_v45, %v649_v36  ;;  %v1381_v49 = vunpack.i.l.s16 %v643_v44  ;;  %vm950_vm12 = vcmask 1042432   ;;  %vm951_vm4 = vcmask 1046532  }
  0x56   : > { %vm652_vm0 = vmpackc.low %vm651_vm9, %vm650_vm8  ;;  %vm657_vm10 = vcmp.ne.s32.totalorder %v1380_v48, %v648_v21  ;;  %vm700_vm14 = vsmask.f32 3328  ;;  %vm701_vm15 = vsmask.f32 7440 }
  0x57   : > { %932 = vmatpush.bf16.msra.mxu1 %v1519_v62  ;;  %vm658_vm11 = vcmp.ne.s32.totalorder %v1381_v49, %v649_v36  ;;  %v660_v52 = vsel %vm652_vm0, %v594_v46, 0  ;;  %v662_v53 = vsel %vm652_vm0, %v595_v47, 0  ;;  %vm2045_vm1 = vmor %vm950_vm12, %vm951_vm4 }
  0x58   : > { %1056 = vmatpush.bf16.msra.mxu2 %v1535_v63  ;;  %vm659_vm13 = vmpackc.low %vm658_vm11, %vm657_vm10  ;;  %v668_v54 = vunpack.c.l.b16 %v660_v52  ;;  %v669_v55 = vunpack.c.h.b16 %v660_v52  ;;  %v2022_v56 = vunpack.c.l.b16 %v662_v53  ;;  %v2024_v57 = vunpack.c.h.b16 %v662_v53 }
  0x59   : > { %854 = vmatpush.bf16.msra.mxu0 %v1527_v3  ;;  %1566 = vmatpush.bf16.msra.mxu3 %v1527_v3  ;;  %v661_v58 = vsel %vm659_vm13, %v599_v50, 0  ;;  %v2026_v59 = vsel %vm659_vm13, %v600_v51, 0  ;;  %vm2056_vm2 = vmor %vm700_vm14, %vm701_vm15 }
  0x5a   : > { %v670_v60 = vunpack.c.l.b16 %v661_v58  ;;  %v2029_v61 = vunpack.c.l.b16 %v2026_v59  ;;  %v690_v62 = vunpack.c.h.b16 %v661_v58  ;;  %v691_v63 = vunpack.c.h.b16 %v2026_v59 }
  0x5b   : > { %933 = vmatpush.bf16.msra.mxu1 %v1518_v15  ;;  %v692_v0 = vpack.c.b16 %v668_v54, %v668_v54  ;;  %v693_v1 = vpack.c.b16 %v669_v55, %v669_v55  ;;  %v2034_v2 = vpack.c.b16 %v2022_v56, %v2022_v56  ;;  %v2038_v3 = vpack.c.b16 %v2024_v57, %v2024_v57 }
  0x5c   : > { %1057 = vmatpush.bf16.msra.mxu2 %v1534_v16  ;;  %v694_v4 = vpack.c.b16 %v670_v60, %v670_v60  ;;  %v2040_v5 = vpack.c.b16 %v690_v62, %v690_v62  ;;  %v873_v6 = vpack.c.b16 %v2022_v56, %v670_v60  ;;  %v698_v44 = vpack.c.b16 %v2029_v61, %v2029_v61 }
  0x5d   : > { %855 = vmatpush.bf16.msra.mxu0 %v1526_v22  ;;  %1567 = vmatpush.bf16.msra.mxu3 %v1526_v22  ;;  %v704_v7 = vshrl.u32 %v692_v0, 16  ;;  %v707_v8 = vshll.u32 %v692_v0, 16  ;;  %v717_v9 = vshrl.u32 %v693_v1, 16  ;;  %v1462_v11 = vrot.slane %v692_v0, 9 }
  0x5e   : > { %934 = vmatmul.bf16.vlgmr.msra.gmra.mxu1 %v660_v52  ;;  %v955_v12 = vrot.slane %v693_v1, 5  ;;  %v958_v13 = vrot.slane %v694_v4, 5  ;;  %v713_v14 = vshll.u32 %v693_v1, 16  ;;  %v723_v15 = vshll.u32 %v694_v4, 16 }
  0x5f   : > { %v706_v16 = vrot.slane %v704_v7, 4  ;;  %v709_v17 = vrot.slane %v707_v8, 5  ;;  %v719_v19 = vrot.slane %v717_v9, 4  ;;  %v727_v20 = vshrl.u32 %v694_v4, 16 }
  0x60   : > { %v956_v21 = vsel %vm2045_vm1, %v1462_v11, %v955_v12  ;;  %v957_v22 = vrot.slane %v955_v12, 4  ;;  %v715_v23 = vrot.slane %v713_v14, 5  ;;  %v725_v24 = vrot.slane %v723_v15, 5 }
  0x61   : > { %v990_v25 = vunpack.c.l.b16 %v956_v21  ;;  %v710_v26 = vor.u32 %v709_v17, %v706_v16  ;;  %v729_v27 = vrot.slane %v727_v20, 4  ;;  %v733_v28 = vshll.u32 %v2040_v5, 16 }
  0x62   : > { %v959_v30 = vsel %vm2045_vm1, %v957_v22, %v958_v13  ;;  %v720_v33 = vor.u32 %v719_v19, %v715_v23  ;;  %v738_v34 = vshrl.u32 %v2034_v2, 16  ;;  %v741_v35 = vshll.u32 %v2034_v2, 16 }
  0x63   : > { %v991_v36 = vunpack.c.l.b16 %v959_v30  ;;  %v711_v37 = vrot.slane %v710_v26, 4  ;;  %v730_v38 = vor.u32 %v729_v27, %v725_v24  ;;  %v735_v39 = vrot.slane %v733_v28, 5 }
  0x64   : > { %v721_v40 = vrot.slane %v720_v33, 4  ;;  %v740_v41 = vrot.slane %v738_v34, 4  ;;  %v743_v42 = vrot.slane %v741_v35, 5  ;;  %v747_v43 = vshll.u32 %v2038_v3, 16 }
  0x65   : > { %v996_v45 = vpack.c.b16 %v991_v36, %v990_v25  ;;  %v716_v46 = vsel %vm2056_vm2, %v711_v37, %v715_v23  ;;  %v731_v47 = vrot.slane %v730_v38, 4  ;;  %v960_v54 = vrot.slane %v958_v13, 4 }
  0x66   : > { %v726_v48 = vsel %vm2056_vm2, %v721_v40, %v725_v24  ;;  %v788_v49 = vunpack.c.l.b16 %v716_v46  ;;  %v744_v50 = vor.u32 %v743_v42, %v740_v41  ;;  %v749_v51 = vrot.slane %v747_v43, 5 }
  0x67   : > { %1058 = vmatmul.bf16.vlgmr.msra.gmra.mxu2 %v996_v45  ;;  %v789_v52 = vunpack.c.l.b16 %v726_v48  ;;  %v736_v53 = vsel %vm2056_vm2, %v731_v47, %v735_v39  ;;  %v961_v55 = vrot.slane %v2040_v5, 5  ;;  %v1463_v58 = vrot.slane %v2034_v2, 9 }
  0x68   : > { %v745_v56 = vrot.slane %v744_v50, 4  ;;  %v965_v59 = vrot.slane %v2038_v3, 5  ;;  %v699_v60 = vpack.c.b16 %v691_v63, %v691_v63  ;;  %v790_v0 = vunpack.c.l.b16 %v736_v53 }
  0x69   : > { %v794_v62 = vpack.c.b16 %v789_v52, %v788_v49  ;;  %v751_v1 = vshrl.u32 %v2038_v3, 16  ;;  %v757_v4 = vshll.u32 %v698_v44, 16  ;;  %v761_v8 = vshrl.u32 %v698_v44, 16 }
  0x6a   : > { %v750_v7 = vsel %vm2056_vm2, %v745_v56, %v749_v51  ;;  %v966_v2 = vsel %vm2045_vm1, %v1463_v58, %v965_v59  ;;  %v767_v12 = vshll.u32 %v699_v60, 16  ;;  %v874_v24 = vpack.c.b16 %v2029_v61, %v2024_v57 }
  0x6b   : > { %856 = vmatmul.bf16.vlgmr.msra.gmra.mxu0 %v794_v62  ;;  %v791_v9 = vunpack.c.l.b16 %v750_v7  ;;  %v753_v11 = vrot.slane %v751_v1, 4  ;;  %v759_v5 = vrot.slane %v757_v4, 5  ;;  %v763_v63 = vrot.slane %v761_v8, 4 }
  0x6c   : > { %v993_v16 = vunpack.c.l.b16 %v966_v2  ;;  %v769_v20 = vrot.slane %v767_v12, 5  ;;  %v968_v25 = vrot.slane %v698_v44, 5  ;;  %v967_v28 = vrot.slane %v965_v59, 4 }
  0x6d   : > { %v795_v13 = vpack.c.b16 %v791_v9, %v790_v0  ;;  %v754_v14 = vor.u32 %v753_v11, %v749_v51  ;;  %v764_v3 = vor.u32 %v763_v63, %v759_v5  ;;  %v971_v33 = vrot.slane %v699_v60, 5 }
  0x6e   : > { %939 = vmatmul.bf16.gmra.mxu1 %v873_v6  ;;  %v962_v6 = vsel %vm2045_vm1, %v960_v54, %v961_v55  ;;  %v970_v30 = vrot.slane %v968_v25, 4  ;;  %v969_v35 = vsel %vm2045_vm1, %v967_v28, %v968_v25  ;;  %v1080_v53 = vstv %s498_s11 }
  0x6f   : > { %861 = vmatmul.bf16.vlgmr.msra.gmra.mxu3 %v795_v13  ;;  %v992_v15 = vunpack.c.l.b16 %v962_v6  ;;  %v755_v17 = vrot.slane %v754_v14, 4  ;;  %v765_v19 = vrot.slane %v764_v3, 4  ;;  %v994_v31 = vunpack.c.l.b16 %v969_v35 }
  0x70   : > { %v972_v36 = vsel %vm2045_vm1, %v970_v30, %v971_v33  ;;  %v1082_v55 = vadd.s32 %v1080_v53, %v1900_v29  ;;  %v1081_v60 = vadd.s32 %v1080_v53, %v1878_v18  ;;  %v1083_v62 = vadd.s32 %v1080_v53, %v1904_v32 }
  0x71   : > { %v997_v21 = vpack.c.b16 %v993_v16, %v992_v15  ;;  %v760_v22 = vsel %vm2056_vm2, %v755_v17, %v759_v5  ;;  %v770_v23 = vsel %vm2056_vm2, %v765_v19, %v769_v20  ;;  %v995_v37 = vunpack.c.l.b16 %v972_v36 }
  0x72   : > { %v792_v26 = vunpack.c.l.b16 %v760_v22  ;;  %v793_v27 = vunpack.c.l.b16 %v770_v23  ;;  %vm1085_vm3 = vcmp.lt.s32.totalorder %v1082_v55, 32  ;;  %vm1084_vm5 = vcmp.lt.s32.totalorder %v1081_v60, 32 }
  0x73   : > { %v998_v57 = vpack.c.b16 %v995_v37, %v994_v31  ;;  %vm1086_vm6 = vcmp.lt.s32.totalorder %v1083_v62, 32 }
  0x74   : > { %v796_v34 = vpack.c.b16 %v793_v27, %v792_v26 }
  0x77   : > { %1063 = vmatmul.bf16.gmra.mxu2 %v997_v21 }
  0x7e   : > { %944 = vmatmul.bf16.gmra.mxu1 %v874_v24 }
  0x7f   : > { %866 = vmatmul.bf16.gmra.mxu3 %v796_v34 }
  0x87   : > { %1068 = vmatmul.bf16.gmra.mxu2 %v998_v57 }
  0xdb   : > { %v935_v61 = vpop.f32.mrf.mxu1 }
  0xe3   : > { %v937_v38 = vpop.f32.mrf.mxu1 }
  0xe8   : > { %v857_v39 = vpop.f32.mrf.mxu0 }
  0xe9   : > { %v936_v41 = vadd.f32 %v935_v61, %v857_v39 }
  0xea   : > { %v1059_v40 = vpop.f32.mrf.mxu2 }
  0xeb   : > { %v940_v43 = vpop.f32.mrf.mxu1  ;;  %v1074_v47 = vadd.f32 %v1059_v40, %v936_v41 }
  0xed   : > { %v1093_v11 = vsel %vm1084_vm5, %v1074_v47, 0.0 }
  0xee   : > { %v1111_v18 = vmul.f32 %v1093_v11, %v1093_v11 }
  0xf0   : > { %v859_v42 = vpop.f32.mrf.mxu0 }
  0xf1   : > { %v938_v44 = vadd.f32 %v937_v38, %v859_v42 }
  0xf2   : > { %v862_v45 = vpop.f32.mrf.mxu3  ;;  %v1061_v46 = vpop.f32.mrf.mxu2 }
  0xf3   : > { %v1075_v10 = vadd.f32 %v1061_v46, %v938_v44  ;;  %v942_v50 = vpop.f32.mrf.mxu1  ;;  %v941_v52 = vadd.f32 %v940_v43, %v862_v45 }
  0xf5   : > { %v1546_v48 = vpack.c.bf16 %v1075_v10, %v1074_v47  ;;  %v1094_v8 = vsel %vm1085_vm3, %v1075_v10, 0.0 }
  0xf6   : > { %v1112_v6 = vmul.f32 %v1094_v8, %v1094_v8  ;;  %v1099_v63 = vadd.f32 %v1094_v8, %v1093_v11 }
  0xf7   : > { %1547 = vst [vmem:[%s2092_s17] sm:$0xff] %v1546_v48  }
  0xf8   : > { %v1117_v14 = vadd.f32 %v1112_v6, %v1111_v18 }
  0xfa   : > { %v1064_v49 = vpop.f32.mrf.mxu2  ;;  %v864_v51 = vpop.f32.mrf.mxu3 }
  0xfb   : > { %v943_v54 = vadd.f32 %v942_v50, %v864_v51  ;;  %v1076_v58 = vadd.f32 %v1064_v49, %v941_v52  ;;  %v945_v0 = vpop.f32.mrf.mxu1 }
  0xfd   : > { %v1095_v29 = vsel %vm1086_vm6, %v1076_v58, 0.0 }
  0xfe   : > { %v1113_v32 = vmul.f32 %v1095_v29, %v1095_v29  ;;  %v1100_v3 = vadd.f32 %v1099_v63, %v1095_v29  ;;  %v1173_v44 = vld [vmem:[%s2092_s17] sm:$0xff] (%p1810_p0)  }
  0xff   : > { %1174 = vst [vmem:[%s1156_s20] sm:$0xff] (%p1810_p0), %v1173_v44  }
 0x100   : > { %v1118_v19 = vadd.f32 %v1117_v14, %v1113_v32 }
 0x102   : > { %v1066_v56 = vpop.f32.mrf.mxu2  ;;  %v867_v4 = vpop.f32.mrf.mxu3 }
 0x103   : > { %v1077_v59 = vadd.f32 %v1066_v56, %v943_v54  ;;  %v946_v7 = vadd.f32 %v945_v0, %v867_v4  ;;  %v947_v12 = vpop.f32.mrf.mxu1 }
 0x105   : > { %v1551_v1 = vpack.c.bf16 %v1077_v59, %v1076_v58  ;;  %v1096_v2 = vsel %vm1084_vm5, %v1077_v59, 0.0 }
 0x106   : > { %v1114_v15 = vmul.f32 %v1096_v2, %v1096_v2  ;;  %v1101_v20 = vadd.f32 %v1100_v3, %v1096_v2 }
 0x107   : > { %1558 = vst [vmem:[%s2092_s17 + $0x8] sm:$0xff] %v1551_v1  }
 0x108   : > { %v1119_v24 = vadd.f32 %v1118_v19, %v1114_v15 }
 0x10a   : > { %v1069_v9 = vpop.f32.mrf.mxu2  ;;  %v869_v16 = vpop.f32.mrf.mxu3 }
 0x10b   : > { %v1078_v5 = vadd.f32 %v1069_v9, %v946_v7  ;;  %v948_v17 = vadd.f32 %v947_v12, %v869_v16 }
 0x10d   : > { %v1097_v13 = vsel %vm1085_vm3, %v1078_v5, 0.0 }
 0x10e   : > { %v1115_v21 = vmul.f32 %v1097_v13, %v1097_v13  ;;  %v1102_v25 = vadd.f32 %v1101_v20, %v1097_v13  ;;  %v1177_v45 = vld [vmem:[%s2092_s17 + $0x8] sm:$0xf] (%p1810_p0) }
 0x10f   : > { %1178 = vst [vmem:[%s1156_s20 + $0x8] sm:$0xf] (%p1810_p0), %v1177_v45 }
 0x110   : > { %v1120_v28 = vadd.f32 %v1119_v24, %v1115_v21 }
 0x112   : > { %v1071_v22 = vpop.f32.mrf.mxu2 }
 0x113   : > { %v1079_v23 = vadd.f32 %v1071_v22, %v948_v17 }
 0x115   : > { %v1098_v26 = vsel %vm1086_vm6, %v1079_v23, 0.0  ;;  %v1556_v27 = vpack.c.bf16 %v1079_v23, %v1078_v5 }
 0x116   : > { %v1103_v30 = vadd.f32 %v1102_v25, %v1098_v26  ;;  %v1116_v33 = vmul.f32 %v1098_v26, %v1098_v26 }
 0x117   : > { %1559 = vst [vmem:[%s2092_s17 + $0x10] sm:$0xff] %v1556_v27  }
 0x118   : > { %v1104_v34 = vrot.slane %v1103_v30, 4  ;;  %v1121_v35 = vadd.f32 %v1120_v28, %v1116_v33 }
 0x11a   : > { %v1105_v36 = vadd.f32 %v1104_v34, %v1103_v30  ;;  %v1122_v31 = vrot.slane %v1121_v35, 4 }
 0x11c   : > { %v1106_v37 = vrot.slane %v1105_v36, 2  ;;  %v1123_v57 = vadd.f32 %v1122_v31, %v1121_v35 }
 0x11e   : > { %v1107_v61 = vadd.f32 %v1106_v37, %v1105_v36  ;;  %v1124_v38 = vrot.slane %v1123_v57, 2  ;;  %v1179_v46 = vld [vmem:[%s2092_s17 + $0xc] sm:$0xff] (%p1810_p0)   ;;  %v1183_v47 = vld [vmem:[%s2092_s17 + $0x14] sm:$0xf] (%p1810_p0) }
 0x11f   : > { %1180 = vst [vmem:[%s1156_s20 + $0x18] sm:$0xff] (%p1810_p0), %v1179_v46  }
 0x120   : > { %v1108_v39 = vrot.slane %v1107_v61, 1  ;;  %v1125_v40 = vadd.f32 %v1124_v38, %v1123_v57  ;;  %1184 = vst [vmem:[%s1156_s20 + $0x20] sm:$0xf] (%p1810_p0), %v1183_v47 }
 0x122   : > { %v1109_v41 = vadd.f32 %v1108_v39, %v1107_v61  ;;  %v1126_v42 = vrot.slane %v1125_v40, 1  ;;  %1153 = sbr.rel (!%p1810_p0) target bundleno = 295 (0x127), region = 163 }
 0x124   : > { %1110 = vst [vmem:[%s491_s27] sm:$0x1] %v1109_v41  ;;  %v1127_v43 = vadd.f32 %v1126_v42, %v1125_v40 }
 0x126   : > { %1128 = vst [vmem:[%s494_s25] sm:$0x1] %v1127_v43 }
 0x127 PF: > { %s2178_s27 = sld [smem:[#allocation6_spill]]  ;;  %s2181_s21 = smov %s1661_s22 }
 0x128   : > { %s2179_s29 = sld [smem:[#allocation8_spill]]  ;;  %s2182_s22 = smov %s1817_s13 }
 0x129   : > { %s2180_s12 = sld [smem:[#allocation7_spill]]  ;;  %s2183_s23 = smov %s1669_s24 }
 0x12a   : > { %s2185_s25 = smov %s1677_s26 }
 0x12d   : > { %p14_p7 = scmp.ge.s32.totalorder %s2178_s27, 4  }
 0x12e   : > { %s2184_s24 = smov %s2179_s29 }
 0x12f   : > { %s2186_s26 = smov %s2180_s12  ;;  %16 = sbr.rel (!%p14_p7) target bundleno = 4 (0x4), region = 277 }

// kernel: encoder_forward.14
= control target key start
LH: loop header
LB: loop body
LE: loop exit
PB: predicated region body
PF: predicated region fallthrough
CT: control target
= control target key end

     0   :  { %s754_s21 = smov 0   ;;  %s756_s22 = smov 0   ;;  %s867_s0 = inlined_call_operand.vmem [shape: bf16[2,48,128], index: 0, kind: input, shape index: {}]   ;;  %s868_s1 = inlined_call_operand.vmem [shape: f32[1,1,128], index: 1, kind: input, shape index: {}]   ;;  %s869_s2 = inlined_call_operand.vmem [shape: f32[1,1,128], index: 2, kind: input, shape index: {}]   ;;  %s870_s3 = inlined_call_operand.vmem [shape: f32[1,1,128], index: 3, kind: input, shape index: {}]   ;;  %s871_s4 = inlined_call_operand.vmem [shape: f32[1,1,128], index: 4, kind: input, shape index: {}]   ;;  %s872_s5 = inlined_call_operand.vmem [shape: f32[2,48,128], index: 5, kind: output, shape index: {0}]   ;;  %s873_s6 = inlined_call_operand.vmem [shape: bf16[2,16,128], index: 6, kind: output, shape index: {1}]  }
   0x1   :  { %s758_s23 = smov 0  }
   0x2 LB: > { %s770_s24 = sadd.s32 4294967295, %s717_s23   ;;  %s773_s25 = sadd.s32 1, %s717_s23   ;;  %s717_s23 = sphi %s758_s23, %s877_s23   ;;  %s713_s22 = sphi %s756_s22, %s876_s22   ;;  %s709_s21 = sphi %s754_s21, %s875_s21  }
   0x3   : > { %s21_s26 = ssub.s32 %s717_s23, %s773_s25  ;;  %s24_s27 = sadd.s32 1, %s713_s22 }
   0x4   : > { %p22_p0 = scmp.eq.s32.totalorder %s21_s26, 0  ;;  %p31_p1 = scmp.ne.s32.totalorder %s713_s22, %s709_s21 }
   0x5   : > { %p32_p2 = scmp.eq.s32.totalorder %s717_s23, 0  ;;  %p145_p3 = scmp.eq.s32.totalorder %s770_s24, 1 }
   0x6   : > { %s783_s28 = scalar_select %p22_p0, %s713_s22, %s24_s27  }
   0x7   : > { %p33_p4 = por %p32_p2, %p31_p1  ;;  %p785_p5 = por %p145_p3, %p31_p1 }
   0x8   : > { %p631_p6 = scmp.ge.s32.totalorder %s717_s23, 2 }
   0xa   : > { %205 = sbr.rel (%p631_p6) target bundleno = 24 (0x18), region = 32 }
   0xf   : > { %208 = sbr.rel (!%p33_p4) target bundleno = 24 (0x18), region = 36  ;;  %s210_s30 = sand.u32 (%p33_p4), 1, %s713_s22  }
  0x10   : > { %s645_s7 = smul.u32 (%p33_p4), 12, %s717_s23 }
  0x11   : > { %s666_s8 = smul.u32 (%p33_p4), 24, %s210_s30 }
  0x12   : > { %s215_s11 = scalar_lea.vmem (%p33_p4), %s867_s0, %s645_s7 }
  0x13   : > { %v232_v0 = vld [vmem:[%s215_s11] sm:$0xff] (%p33_p4)   ;;  %v236_v1 = vld [vmem:[%s215_s11 + $0x8] sm:$0xf] (%p33_p4)  ;;  %v238_v2 = vld [vmem:[%s215_s11 + $0x18] sm:$0xff] (%p33_p4)   ;;  %s212_s12 = scalar_lea.vmem (%p33_p4), [#allocation2], %s666_s8 }
  0x14   : > { %233 = vst [vmem:[%s212_s12] sm:$0xff] %v232_v0   ;;  %v242_v3 = vld [vmem:[%s215_s11 + $0x20] sm:$0xf] }
  0x15   : > { %237 = vst [vmem:[%s212_s12 + $0x8] sm:$0xf] %v236_v1 }
  0x16   : > { %239 = vst [vmem:[%s212_s12 + $0xc] sm:$0xff] %v238_v2  }
  0x17   : > { %243 = vst [vmem:[%s212_s12 + $0x14] sm:$0xf] %v242_v3 }
  0x18 PF: > { %p633_p7 = scmp.ge.s32.totalorder %s717_s23, 1  ;;  %p278_p8 = scmp.lt.s32.totalorder %s717_s23, 3 }
  0x1a   : > { %p279_p9 = pnand %p633_p7, %p278_p8 }
  0x1b   : > { %s804_s17 = sand.u32 (!%p279_p9), 1, %s709_s21   ;;  %s382_s20 = smul.u32 (!%p279_p9), 24, %s770_s24 }
  0x1c   : > { %282 = sbr.rel (%p279_p9) target bundleno = 104 (0x68), region = 77  ;;  %s634_s8 = sshll.u32 (!%p279_p9), %s804_s17, 3 }
  0x1d   : > { %s667_s18 = smul.u32 (!%p279_p9), 24, %s804_s17  ;;  %s316_s9 = scalar_lea.vmem (!%p279_p9), [#allocation4], %s634_s8 }
  0x1e   : > { %s668_s30 = smul.u32 (!%p279_p9), 48, %s804_s17 }
  0x1f   : > { %s287_s19 = scalar_lea.vmem (!%p279_p9), [#allocation2], %s667_s18 }
  0x20   : > { %s820_s7 = scalar_lea.vmem (!%p279_p9), [#allocation3], %s668_s30 }
  0x21   : > { %v319_v4 = vld [vmem:[%s868_s1] sm:$0x1]  ;;  %v378_v15 = vlaneseq  ;;  %v665_v23 = vld [vmem:[%s287_s19 + $0x10] sm:$0xff]   ;;  %v383_v28 = vstv %s382_s20  ;;  %s440_s12 = scalar_lea.vmem (%p785_p5), %s872_s5, %s382_s20 }
  0x22   : > { %v321_v5 = vld [vmem:[%s869_s2] sm:$0x1]  ;;  %v320_v6 = vmul.f32 0.015625, %v319_v4  ;;  %v657_v34 = vunpack.c.l.bf16 %v665_v23  ;;  %v658_v35 = vunpack.c.h.bf16 %v665_v23 }
  0x23   : > { %v322_v7 = vmul.f32 0.015625, %v321_v5  ;;  %v379_v18 = vshrl.u32 %v378_v15, 7  ;;  %v648_v19 = vld [vmem:[%s287_s19] sm:$0xff]   ;;  %v664_v22 = vld [vmem:[%s287_s19 + $0x8] sm:$0xff]  }
  0x24   : > { %v323_v8 = vmul.f32 %v320_v6, %v320_v6  ;;  %v337_v21 = vld [vmem:[%s870_s3] sm:$0x1]  ;;  %v649_v25 = vunpack.c.l.bf16 %v648_v19  ;;  %v650_v29 = vunpack.c.h.bf16 %v648_v19  ;;  %v653_v30 = vunpack.c.l.bf16 %v664_v22 }
  0x25   : > { %v380_v26 = vadd.s32 8, %v379_v18  ;;  %v339_v31 = vld [vmem:[%s871_s4] sm:$0x1]  ;;  %v381_v32 = vadd.s32 16, %v379_v18  ;;  %v654_v33 = vunpack.c.h.bf16 %v664_v22  ;;  %v384_v38 = vadd.s32 %v383_v28, %v379_v18 }
  0x26   : > { %v324_v9 = vsub.f32 %v322_v7, %v323_v8 }
  0x27   : > { %v385_v39 = vadd.s32 %v383_v28, %v380_v26  ;;  %v386_v44 = vadd.s32 %v383_v28, %v381_v32  ;;  %vm387_vm3 = vcmp.lt.s32.totalorder %v384_v38, 32 }
  0x28   : > { %v325_v10 = vmax.f32 %v324_v9, 0.0 }
  0x29   : > { %vm388_vm4 = vcmp.lt.s32.totalorder %v385_v39, 32  ;;  %vm389_vm5 = vcmp.lt.s32.totalorder %v386_v44, 32 }
  0x2a   : > { %v326_v11 = vadd.f32 1e-05, %v325_v10 }
  0x2c   : > { %693 = vrsqrt.f32 %v326_v11  ;;  %vm333_vm0 = vweird.f32 %v326_v11 }
  0x32   : > { %v694_v12 = vpop.eup %693 }
  0x33   : > { %v328_v13 = vmul.f32 %v694_v12, %v326_v11  ;;  %vm334_vm1 = vweird.f32 %v694_v12 }
  0x34   : > { %vm335_vm2 = vmor %vm333_vm0, %vm334_vm1 }
  0x35   : > { %v329_v14 = vmul.f32 %v694_v12, %v328_v13 }
  0x37   : > { %v330_v16 = vmul.f32 0.5, %v329_v14 }
  0x39   : > { %v331_v17 = vsub.f32 1.5, %v330_v16 }
  0x3b   : > { %v332_v20 = vmul.f32 %v694_v12, %v331_v17 }
  0x3d   : > { %v336_v24 = vsel %vm335_vm2, %v694_v12, %v332_v20 }
  0x3e   : > { %v338_v27 = vmul.f32 %v337_v21, %v336_v24 }
  0x40   : > { %v340_v36 = vmul.f32 %v338_v27, %v320_v6  ;;  %v355_v37 = vperm.slane %v338_v27, 0 }
  0x42   : > { %v341_v40 = vsub.f32 %v339_v31, %v340_v36  ;;  %v357_v41 = vmul.f32 %v649_v25, %v355_v37  ;;  %v358_v42 = vmul.f32 %v650_v29, %v355_v37  ;;  %v359_v43 = vmul.f32 %v653_v30, %v355_v37 }
  0x43   : > { %v360_v45 = vmul.f32 %v654_v33, %v355_v37  ;;  %v361_v46 = vmul.f32 %v657_v34, %v355_v37  ;;  %v362_v47 = vmul.f32 %v658_v35, %v355_v37 }
  0x44   : > { %v364_v48 = vperm.slane %v341_v40, 0 }
  0x46   : > { %v366_v49 = vadd.f32 %v364_v48, %v357_v41  ;;  %v367_v50 = vadd.f32 %v364_v48, %v358_v42  ;;  %v368_v51 = vadd.f32 %v364_v48, %v359_v43  ;;  %v369_v52 = vadd.f32 %v364_v48, %v360_v45 }
  0x47   : > { %v370_v53 = vadd.f32 %v364_v48, %v361_v46  ;;  %v371_v54 = vadd.f32 %v364_v48, %v362_v47 }
  0x48   : > { %v372_v55 = vmax.f32 %v366_v49, 0.0  ;;  %v373_v56 = vmax.f32 %v367_v50, 0.0  ;;  %v374_v57 = vmax.f32 %v368_v51, 0.0  ;;  %v375_v58 = vmax.f32 %v369_v52, 0.0 }
  0x49   : > { %v376_v59 = vmax.f32 %v370_v53, 0.0  ;;  %v377_v60 = vmax.f32 %v371_v54, 0.0 }
  0x4a   : > { %v396_v61 = vsel %vm387_vm3, %v372_v55, 0.0  ;;  %v397_v62 = vsel %vm388_vm4, %v373_v56, 0.0  ;;  %v398_v63 = vsel %vm389_vm5, %v374_v57, 0.0  ;;  %v399_v0 = vsel %vm387_vm3, %v375_v58, 0.0 }
  0x4b   : > { %402 = vst [vmem:[%s820_s7] sm:$0xff] %v396_v61  ;;  %v400_v1 = vsel %vm388_vm4, %v376_v59, 0.0  ;;  %v401_v2 = vsel %vm389_vm5, %v377_v60, 0.0 }
  0x4c   : > { %403 = vst [vmem:[%s820_s7 + $0x8] sm:$0xff] %v397_v62 }
  0x4d   : > { %404 = vst [vmem:[%s820_s7 + $0x10] sm:$0xff] %v398_v63 }
  0x4e   : > { %405 = vst [vmem:[%s820_s7 + $0x18] sm:$0xff] %v399_v0 }
  0x4f   : > { %406 = vst [vmem:[%s820_s7 + $0x20] sm:$0xff] %v400_v1 }
  0x50   : > { %407 = vst [vmem:[%s820_s7 + $0x28] sm:$0xff] %v401_v2 }
  0x52   : > { %v479_v14 = vld [vmem:[%s820_s7] sm:$0xff] (%p785_p5) }
  0x53   : > { %v481_v15 = vld [vmem:[%s820_s7 + $0x8] sm:$0xff] (%p785_p5)  ;;  %480 = vst [vmem:[%s440_s12] sm:$0xff] (%p785_p5), %v479_v14 }
  0x54   : > { %v408_v3 = vld [vmem:[%s820_s7] ss:$3 sm:$0xff]  ;;  %v636_v4 = vld [vmem:[%s820_s7 + $0x1] ss:$3 sm:$0xff]  ;;  %v638_v8 = vld [vmem:[%s820_s7 + $0x2] ss:$3 sm:$0xff] }
  0x55   : > { %v415_v5 = vmax.f32 %v408_v3, %v636_v4  ;;  %v483_v16 = vld [vmem:[%s820_s7 + $0x10] sm:$0xff] (%p785_p5)  ;;  %v485_v17 = vld [vmem:[%s820_s7 + $0x18] sm:$0xff] (%p785_p5)  ;;  %482 = vst [vmem:[%s440_s12 + $0x8] sm:$0xff] (%p785_p5), %v481_v15 }
  0x56   : > { %v487_v18 = vld [vmem:[%s820_s7 + $0x20] sm:$0xff] (%p785_p5)  ;;  %484 = vst [vmem:[%s440_s12 + $0x10] sm:$0xff] (%p785_p5), %v483_v16 }
  0x57   : > { %v635_v6 = vld [vmem:[%s820_s7 + $0x18] ss:$3 sm:$0xff]  ;;  %v637_v7 = vld [vmem:[%s820_s7 + $0x19] ss:$3 sm:$0xff]  ;;  %v421_v10 = vmax.f32 %v415_v5, %v638_v8  ;;  %v639_v11 = vld [vmem:[%s820_s7 + $0x1a] ss:$3 sm:$0xff] }
  0x58   : > { %v416_v9 = vmax.f32 %v635_v6, %v637_v7  ;;  %v489_v19 = vld [vmem:[%s820_s7 + $0x28] sm:$0xff] (%p785_p5)  ;;  %486 = vst [vmem:[%s440_s12 + $0x30] sm:$0xff] (%p785_p5), %v485_v17 }
  0x59   : > { %488 = vst [vmem:[%s440_s12 + $0x38] sm:$0xff] (%p785_p5), %v487_v18 }
  0x5a   : > { %v422_v12 = vmax.f32 %v416_v9, %v639_v11  ;;  %437 = sbr.rel (!%p785_p5) target bundleno = 95 (0x5f), region = 85  ;;  %490 = vst [vmem:[%s440_s12 + $0x40] sm:$0xff] (%p785_p5), %v489_v19 }
  0x5c   : > { %v662_v13 = vpack.c.bf16 %v422_v12, %v421_v10 }
  0x5e   : > { %663 = vst [vmem:[%s316_s9] sm:$0xff] %v662_v13  }
  0x5f PF: > { %496 = sbr.rel (!%p785_p5) target bundleno = 104 (0x68), region = 123  ;;  %s642_s13 = sshll.u32 (%p785_p5), %s770_s24, 2 }
  0x60   : > { %s498_s16 = scalar_lea.vmem (%p785_p5), %s873_s6, %s642_s13 }
  0x65   : > { %v515_v20 = vld [vmem:[%s316_s9] sm:$0xf]  ;;  %v517_v21 = vld [vmem:[%s316_s9 + $0x4] sm:$0xf] }
  0x66   : > { %516 = vst [vmem:[%s498_s16] sm:$0xf] %v515_v20 }
  0x67   : > { %518 = vst [vmem:[%s498_s16 + $0x8] sm:$0xf] %v517_v21 }
  0x68 PF: > { %p14_p10 = scmp.ge.s32.totalorder %s773_s25, 4   ;;  %s875_s21 = smov %s713_s22 }
  0x69   : > { %s876_s22 = smov %s783_s28  ;;  %s877_s23 = smov %s773_s25 }
  0x6a   :  { %16 = sbr.rel (!%p14_p10) target bundleno = 2 (0x2), region = 212 }

// kernel: encoder_forward.15
= control target key start
LH: loop header
LB: loop body
LE: loop exit
PB: predicated region body
PF: predicated region fallthrough
CT: control target
= control target key end

     0   :  { %v211_v3 = vlaneseq  ;;  %v817_v23 = vmov 0   ;;  %vm818_vm4 = vmmov 0   ;;  %vm204_vm6 = vcmask 1040384   ;;  %s1008_s0 = inlined_call_operand.vmem [shape: bf16[2,16,128], index: 0, kind: input, shape index: {}, may-alias: {0,1,2}]   ;;  %s1009_s1 = inlined_call_operand.vmem [shape: bf16[2,16,128], index: 1, kind: input, shape index: {}, may-alias: {0,1,2}]   ;;  %s1010_s2 = inlined_call_operand.vmem [shape: bf16[2,16,128], index: 2, kind: input, shape index: {}, may-alias: {0,1,2}]   ;;  %s1011_s3 = inlined_call_operand.vmem [shape: bf16[3,128,128], index: 3, kind: input, shape index: {}]   ;;  %s1012_s4 = inlined_call_operand.vmem [shape: bf16[2,16,128], index: 4, kind: output, shape index: {0}]   ;;  %s1013_s5 = inlined_call_operand.vmem [shape: f32[1,1,128], index: 5, kind: output, shape index: {1}]   ;;  %s1014_s6 = inlined_call_operand.vmem [shape: f32[1,1,128], index: 6, kind: output, shape index: {2}]  }
   0x1   :  { %v787_v0 = vld [vmem:[%s1011_s3 + $0x78] sm:$0xff]  ;;  %v786_v4 = vld [vmem:[%s1011_s3 + $0x70] sm:$0xff]  ;;  %v785_v10 = vld [vmem:[%s1011_s3 + $0x68] sm:$0xff]  ;;  %v248_v35 = vunpack.c.l.b16 %v817_v23  ;;  %v249_v39 = vunpack.c.h.b16 %v817_v23  ;;  %vm205_vm7 = vsmask.f32 256  ;;  %vm462_vm15 = vcmask 1046528  }
   0x2   :  { %v779_v1 = vld [vmem:[%s1011_s3 + $0x38] sm:$0xff]  ;;  %372 = vmatpush.bf16.msra.mxu0 %v787_v0  ;;  %v778_v5 = vld [vmem:[%s1011_s3 + $0x30] sm:$0xff]  ;;  %v212_v6 = vshrl.u32 %v211_v3, 7  ;;  %807 = vmatpush.bf16.msra.mxu3 %v787_v0  ;;  %v777_v11 = vld [vmem:[%s1011_s3 + $0x28] sm:$0xff] }
   0x3   :  { %v795_v2 = vld [vmem:[%s1011_s3 + $0xb8] sm:$0xff]  ;;  %439 = vmatpush.bf16.msra.mxu1 %v779_v1  ;;  %v794_v7 = vld [vmem:[%s1011_s3 + $0xb0] sm:$0xff]  ;;  %v793_v13 = vld [vmem:[%s1011_s3 + $0xa8] sm:$0xff] }
   0x4   :  { %536 = vmatpush.bf16.msra.mxu2 %v795_v2  ;;  %v872_v8 = vadd.s32 8, %v212_v6  ;;  %v217_v9 = vadd.s32 4294967295, %v212_v6  ;;  %v784_v14 = vld [vmem:[%s1011_s3 + $0x60] sm:$0xff]  ;;  %v40_v18 = vld [vmem:[%s1009_s1 + $0x8] sm:$0xf]  ;;  %vm237_vm5 = vmpackc.low %vm818_vm4, %vm818_vm4 }
   0x5   :  { %v38_v15 = vld [vmem:[%s1009_s1] sm:$0xf]  ;;  %v628_v16 = vld [vmem:[%s1010_s2 + $0x4] sm:$0xf]  ;;  %v629_v19 = vld [vmem:[%s1010_s2 + $0xc] sm:$0xf] }
   0x6   :  { %373 = vmatpush.bf16.msra.mxu0 %v786_v4  ;;  %v218_v12 = vadd.s32 4294967295, %v872_v8  ;;  %808 = vmatpush.bf16.msra.mxu3 %v786_v4  ;;  %vm220_vm0 = vcmp.ge.s32.totalorder %v217_v9, 0  ;;  %v896_v17 = vld [vmem:[%s1008_s0] sm:$0xff]  ;;  %39 = vst [vmem:[#allocation2] sm:$0xf] %v38_v15  ;;  %v910_v21 = vld [vmem:[%s1008_s0 + $0x8] sm:$0xff]  ;;  %vm939_vm12 = vmand %vm204_vm6, %vm205_vm7 }
   0x7   :  { %440 = vmatpush.bf16.msra.mxu1 %v778_v5  ;;  %v776_v20 = vld [vmem:[%s1011_s3 + $0x20] sm:$0xff]  ;;  %92 = vst [vmem:[#allocation3] sm:$0xf] %v628_v16  ;;  %vm235_vm2 = vmpackc.low %vm220_vm0, %vm220_vm0  ;;  %v173_v27 = vshrl.u32 %v896_v17, 16  ;;  %v240_v28 = vsel %vm237_vm5, 65537, %v817_v23  ;;  %v783_v30 = vld [vmem:[%s1011_s3 + $0x58] sm:$0xff] }
   0x8   :  { %537 = vmatpush.bf16.msra.mxu2 %v794_v7  ;;  %vm224_vm1 = vcmp.lt.s32.totalorder %v218_v12, 11  ;;  %v792_v22 = vld [vmem:[%s1011_s3 + $0xa0] sm:$0xff]  ;;  %v238_v24 = vsel %vm235_vm2, 65537, %v817_v23  ;;  %41 = vst [vmem:[#allocation2 + $0x4] sm:$0xf] %v40_v18  ;;  %v775_v31 = vld [vmem:[%s1011_s3 + $0x18] sm:$0xff]  ;;  %v243_v32 = vunpack.c.l.b16 %v240_v28 }
   0x9   :  { %vm236_vm3 = vmpackc.low %vm224_vm1, %vm224_vm1  ;;  %v241_v26 = vunpack.c.l.b16 %v238_v24  ;;  %94 = vst [vmem:[#allocation3 + $0x4] sm:$0xf] %v629_v19  ;;  %v180_v33 = vshrl.u32 %v910_v21, 16  ;;  %v791_v34 = vld [vmem:[%s1011_s3 + $0x98] sm:$0xff]  ;;  %v175_v43 = vrot.slane %v173_v27, 7  ;;  %v176_v44 = vshll.u32 %v896_v17, 16 }
   0xa   :  { %374 = vmatpush.bf16.msra.mxu0 %v785_v10  ;;  %809 = vmatpush.bf16.msra.mxu3 %v785_v10  ;;  %v239_v25 = vsel %vm236_vm3, 65537, %v817_v23  ;;  %v640_v40 = vunpack.i.l.s16 %v243_v32  ;;  %v782_v45 = vld [vmem:[%s1011_s3 + $0x50] sm:$0xff]  ;;  %v183_v50 = vshll.u32 %v910_v21, 16  ;;  %v781_v61 = vld [vmem:[%s1011_s3 + $0x48] sm:$0xff]  ;;  %v788_v19 = vld [vmem:[%s1011_s3 + $0x80] sm:$0xff]  ;;  %vm563_vm1 = vcmp.lt.s32.totalorder %v872_v8, 11 }
   0xb   :  { %441 = vmatpush.bf16.msra.mxu1 %v777_v11  ;;  %v242_v29 = vunpack.c.l.b16 %v239_v25  ;;  %v638_v37 = vunpack.i.l.s16 %v241_v26  ;;  %v774_v46 = vld [vmem:[%s1011_s3 + $0x10] sm:$0xff]  ;;  %v182_v49 = vrot.slane %v180_v33, 7  ;;  %v178_v58 = vor.u32 %v176_v44, %v175_v43  ;;  %v773_v62 = vld [vmem:[%s1011_s3 + $0x8] sm:$0xff] }
   0xc   :  { %538 = vmatpush.bf16.msra.mxu2 %v793_v13  ;;  %v790_v51 = vld [vmem:[%s1011_s3 + $0x90] sm:$0xff]  ;;  %vm257_vm8 = vcmp.ne.s32.totalorder %v640_v40, %v248_v35  ;;  %vm258_vm9 = vcmp.ne.s32.totalorder %v640_v40, %v249_v39  ;;  %v789_v2 = vld [vmem:[%s1011_s3 + $0x88] sm:$0xff]  ;;  %v780_v13 = vld [vmem:[%s1011_s3 + $0x40] sm:$0xff]  ;;  %vm280_vm0 = vsmask.f32 7424 }
   0xd   :  { %v138_v36 = vld [vmem:[#allocation2] sm:$0x8]  ;;  %v639_v38 = vunpack.i.l.s16 %v242_v29  ;;  %vm250_vm10 = vcmp.ne.s32.totalorder %v638_v37, %v248_v35  ;;  %vm951_vm13 = vmpackc.low %vm258_vm9, %vm257_vm8  ;;  %v185_v6 = vor.u32 %v183_v50, %v182_v49 }
   0xe   :  { %375 = vmatpush.bf16.msra.mxu0 %v784_v14  ;;  %810 = vmatpush.bf16.msra.mxu3 %v784_v14  ;;  %v144_v41 = vld [vmem:[#allocation3] sm:$0x1]  ;;  %v148_v42 = vunpack.c.l.b16 %v138_v36  ;;  %v772_v14 = vld [vmem:[%s1011_s3] sm:$0xff] }
   0xf   :  { %442 = vmatpush.bf16.msra.mxu1 %v776_v20  ;;  %v192_v47 = vunpack.c.l.b16 %v144_v41  ;;  %v139_v48 = vld [vmem:[#allocation2 + $0x4] sm:$0x8]  ;;  %vm251_vm11 = vcmp.ne.s32.totalorder %v639_v38, %v249_v39 }
  0x10   :  { %539 = vmatpush.bf16.msra.mxu2 %v792_v22  ;;  %v150_v52 = vpack.c.b16 %v148_v42, %v148_v42  ;;  %v145_v53 = vld [vmem:[#allocation3 + $0x4] sm:$0x1]  ;;  %v149_v54 = vunpack.c.l.b16 %v139_v48  ;;  %vm960_vm14 = vmpackc.low %vm251_vm11, %vm250_vm10 }
  0x11   :  { %v194_v55 = vpack.c.b16 %v192_v47, %v192_v47  ;;  %v193_v56 = vunpack.c.l.b16 %v145_v53 }
  0x12   :  { %376 = vmatpush.bf16.msra.mxu0 %v783_v30  ;;  %811 = vmatpush.bf16.msra.mxu3 %v783_v30  ;;  %v153_v57 = vshrl.u32 %v150_v52, 16  ;;  %v151_v60 = vpack.c.b16 %v149_v54, %v149_v54 }
  0x13   :  { %443 = vmatpush.bf16.msra.mxu1 %v775_v31  ;;  %v197_v63 = vshll.u32 %v194_v55, 16  ;;  %v195_v1 = vpack.c.b16 %v193_v56, %v193_v56 }
  0x14   :  { %540 = vmatpush.bf16.msra.mxu2 %v791_v34  ;;  %v155_v3 = vrot.slane %v153_v57, 3  ;;  %v157_v5 = vshrl.u32 %v151_v60, 16 }
  0x15   :  { %v209_v7 = vsel %vm939_vm12, %v175_v43, %v197_v63  ;;  %v200_v9 = vshll.u32 %v195_v1, 16 }
  0x16   :  { %377 = vmatpush.bf16.msra.mxu0 %v782_v45  ;;  %812 = vmatpush.bf16.msra.mxu3 %v782_v45  ;;  %v207_v10 = vsel %vm939_vm12, %v155_v3, %v178_v58  ;;  %v261_v11 = vsel %vm951_vm13, %v209_v7, 0  ;;  %v159_v12 = vrot.slane %v157_v5, 3 }
  0x17   :  { %444 = vmatpush.bf16.msra.mxu1 %v774_v46  ;;  %v260_v15 = vsel %vm960_vm14, %v207_v10, 0  ;;  %v289_v16 = vshll.u32 %v261_v11, 16  ;;  %v464_v17 = vrot.slane %v261_v11, 1  ;;  %v210_v18 = vsel %vm939_vm12, %v182_v49, %v200_v9 }
  0x18   :  { %541 = vmatpush.bf16.msra.mxu2 %v790_v51  ;;  %v282_v20 = vshrl.u32 %v260_v15, 16  ;;  %v284_v21 = vshll.u32 %v260_v15, 16  ;;  %v463_v22 = vrot.slane %v260_v15, 1  ;;  %v208_v23 = vsel %vm939_vm12, %v159_v12, %v185_v6 }
  0x19   :  { %v262_v24 = vsel %vm960_vm14, %v208_v23, 0  ;;  %v263_v25 = vsel %vm951_vm13, %v210_v18, 0  ;;  %v291_v27 = vrot.slane %v289_v16, 1 }
  0x1a   :  { %378 = vmatpush.bf16.msra.mxu0 %v781_v61  ;;  %813 = vmatpush.bf16.msra.mxu3 %v781_v61  ;;  %v286_v26 = vrot.slane %v284_v21, 1  ;;  %v294_v28 = vshrl.u32 %v262_v24, 16  ;;  %v296_v29 = vshll.u32 %v262_v24, 16  ;;  %v301_v30 = vshll.u32 %v263_v25, 16 }
  0x1b   :  { %445 = vmatpush.bf16.msra.mxu1 %v773_v62  ;;  %v465_v32 = vsel %vm462_vm15, %v463_v22, %v464_v17  ;;  %v466_v38 = vrot.slane %v262_v24, 1  ;;  %v467_v39 = vrot.slane %v263_v25, 1 }
  0x1c   :  { %542 = vmatpush.bf16.msra.mxu2 %v789_v2  ;;  %v287_v31 = vor.u32 %v286_v26, %v282_v20  ;;  %v298_v33 = vrot.slane %v296_v29, 1  ;;  %v303_v34 = vrot.slane %v301_v30, 1 }
  0x1d   :  { %v468_v40 = vsel %vm462_vm15, %v466_v38, %v467_v39 }
  0x1e   :  { %379 = vmatpush.bf16.msra.mxu0 %v780_v13  ;;  %814 = vmatpush.bf16.msra.mxu3 %v780_v13  ;;  %v292_v35 = vsel %vm280_vm0, %v287_v31, %v291_v27  ;;  %v299_v36 = vor.u32 %v298_v33, %v294_v28 }
  0x1f   :  { %446 = vmatpush.bf16.msra.mxu1 %v772_v14 }
  0x20   :  { %543 = vmatpush.bf16.msra.mxu2 %v788_v19  ;;  %v304_v37 = vsel %vm280_vm0, %v299_v36, %v303_v34 }
  0x21   :  { %380 = vmatmul.bf16.vlgmr.msra.gmra.mxu0 %v292_v35  ;;  %385 = vmatmul.bf16.vlgmr.msra.gmra.mxu3 %v304_v37 }
  0x22   :  { %447 = vmatmul.bf16.vlgmr.msra.gmra.mxu1 %v260_v15 }
  0x23   :  { %544 = vmatmul.bf16.vlgmr.msra.gmra.mxu2 %v465_v32 }
  0x32   :  { %452 = vmatmul.bf16.gmra.mxu1 %v262_v24 }
  0x33   :  { %549 = vmatmul.bf16.gmra.mxu2 %v468_v40 }
  0x9e   :  { %v381_v42 = vpop.f32.mrf.mxu0 }
  0x9f   :  { %v448_v41 = vpop.f32.mrf.mxu1 }
  0xa0   :  { %v449_v46 = vadd.f32 %v448_v41, %v381_v42 }
  0xa4   :  { %v386_v53 = vpop.f32.mrf.mxu3 }
  0xa6   :  { %v545_v43 = vpop.f32.mrf.mxu2  ;;  %v383_v45 = vpop.f32.mrf.mxu0 }
  0xa7   :  { %v450_v44 = vpop.f32.mrf.mxu1  ;;  %v555_v49 = vadd.f32 %v545_v43, %v449_v46 }
  0xa8   :  { %v451_v47 = vadd.f32 %v450_v44, %v383_v45 }
  0xa9   :  { %v582_v62 = vmul.f32 %v555_v49, %v555_v49 }
  0xac   :  { %v388_v60 = vpop.f32.mrf.mxu3 }
  0xae   :  { %v547_v48 = vpop.f32.mrf.mxu2 }
  0xaf   :  { %v556_v50 = vadd.f32 %v547_v48, %v451_v47  ;;  %v453_v51 = vpop.f32.mrf.mxu1 }
  0xb0   :  { %v454_v54 = vadd.f32 %v453_v51, %v386_v53 }
  0xb1   :  { %v799_v52 = vpack.c.bf16 %v556_v50, %v555_v49  ;;  %v569_v56 = vsel %vm563_vm1, %v556_v50, 0.0 }
  0xb2   :  { %v583_v59 = vmul.f32 %v569_v56, %v569_v56  ;;  %v572_v63 = vadd.f32 %v569_v56, %v555_v49 }
  0xb3   :  { %800 = vst [vmem:[%s1012_s4] sm:$0xff] %v799_v52  }
  0xb4   :  { %v586_v3 = vadd.f32 %v583_v59, %v582_v62 }
  0xb6   :  { %v550_v55 = vpop.f32.mrf.mxu2 }
  0xb7   :  { %v557_v57 = vadd.f32 %v550_v55, %v454_v54  ;;  %v455_v58 = vpop.f32.mrf.mxu1 }
  0xb8   :  { %v456_v61 = vadd.f32 %v455_v58, %v388_v60 }
  0xb9   :  { %v584_v0 = vmul.f32 %v557_v57, %v557_v57  ;;  %v573_v4 = vadd.f32 %v572_v63, %v557_v57 }
  0xbb   :  { %v587_v7 = vadd.f32 %v586_v3, %v584_v0 }
  0xbe   :  { %v552_v1 = vpop.f32.mrf.mxu2 }
  0xbf   :  { %v558_v2 = vadd.f32 %v552_v1, %v456_v61 }
  0xc1   :  { %v571_v5 = vsel %vm563_vm1, %v558_v2, 0.0  ;;  %v804_v6 = vpack.c.bf16 %v558_v2, %v557_v57 }
  0xc2   :  { %v574_v9 = vadd.f32 %v573_v4, %v571_v5  ;;  %v585_v10 = vmul.f32 %v571_v5, %v571_v5 }
  0xc3   :  { %806 = vst [vmem:[%s1012_s4 + $0x8] sm:$0xff] %v804_v6  }
  0xc4   :  { %v575_v11 = vrot.slane %v574_v9, 4  ;;  %v588_v12 = vadd.f32 %v587_v7, %v585_v10 }
  0xc6   :  { %v576_v13 = vadd.f32 %v575_v11, %v574_v9  ;;  %v589_v14 = vrot.slane %v588_v12, 4 }
  0xc8   :  { %v577_v15 = vrot.slane %v576_v13, 2  ;;  %v590_v16 = vadd.f32 %v589_v14, %v588_v12 }
  0xca   :  { %v578_v17 = vadd.f32 %v577_v15, %v576_v13  ;;  %v591_v18 = vrot.slane %v590_v16, 2 }
  0xcc   :  { %v579_v19 = vrot.slane %v578_v17, 1  ;;  %v592_v20 = vadd.f32 %v591_v18, %v590_v16 }
  0xce   :  { %v580_v8 = vadd.f32 %v579_v19, %v578_v17  ;;  %v593_v21 = vrot.slane %v592_v20, 1 }
  0xd0   :  { %581 = vst [vmem:[%s1013_s5] sm:$0x1] %v580_v8  ;;  %v594_v22 = vadd.f32 %v593_v21, %v592_v20 }
  0xd2   :  { %595 = vst [vmem:[%s1014_s6] sm:$0x1] %v594_v22 }

// kernel: encoder_forward.16
= control target key start
LH: loop header
LB: loop body
LE: loop exit
PB: predicated region body
PF: predicated region fallthrough
CT: control target
= control target key end

     0   :  { %vm236_vm0 = vcmask 1040384   ;;  %vm237_vm1 = vsmask.f32 256  ;;  %v243_v55 = vlaneseq  ;;  %vm549_vm8 = vcmask 1042432   ;;  %s1136_s0 = inlined_call_operand.vmem [shape: bf16[2,16,128], index: 0, kind: input, shape index: {}, may-alias: {0,1,2}]   ;;  %s1137_s1 = inlined_call_operand.vmem [shape: bf16[2,16,128], index: 1, kind: input, shape index: {}, may-alias: {0,1,2}]   ;;  %s1138_s2 = inlined_call_operand.vmem [shape: bf16[2,16,128], index: 2, kind: input, shape index: {}, may-alias: {0,1,2}]   ;;  %s1139_s3 = inlined_call_operand.vmem [shape: bf16[3,128,128], index: 3, kind: input, shape index: {}]   ;;  %s1140_s4 = inlined_call_operand.vmem [shape: f32[1,1,128], index: 4, kind: input, shape index: {}]   ;;  %s1141_s5 = inlined_call_operand.vmem [shape: f32[1,1,128], index: 5, kind: input, shape index: {}]   ;;  %s1142_s6 = inlined_call_operand.vmem [shape: f32[1,1,128], index: 6, kind: input, shape index: {}]   ;;  %s1143_s7 = inlined_call_operand.vmem [shape: f32[1,1,128], index: 7, kind: input, shape index: {}]   ;;  %s1144_s8 = inlined_call_operand.vmem [shape: bf16[2,16,128], index: 8, kind: output, shape index: {0}]   ;;  %s1145_s9 = inlined_call_operand.vmem [shape: f32[1,1,128], index: 9, kind: output, shape index: {1}]   ;;  %s1146_s10 = inlined_call_operand.vmem [shape: f32[1,1,128], index: 10, kind: output, shape index: {2}]  }
   0x1   :  { %v880_v0 = vld [vmem:[%s1139_s3 + $0x38] sm:$0xff]  ;;  %v879_v3 = vld [vmem:[%s1139_s3 + $0x30] sm:$0xff]  ;;  %v878_v6 = vld [vmem:[%s1139_s3 + $0x28] sm:$0xff]  ;;  %vm550_vm9 = vcmask 1046532   ;;  %vm325_vm11 = vsmask.f32 3328 }
   0x2   :  { %v896_v1 = vld [vmem:[%s1139_s3 + $0xb8] sm:$0xff]  ;;  %528 = vmatpush.bf16.msra.mxu1 %v880_v0  ;;  %v895_v4 = vld [vmem:[%s1139_s3 + $0xb0] sm:$0xff]  ;;  %v894_v7 = vld [vmem:[%s1139_s3 + $0xa8] sm:$0xff]  ;;  %v244_v0 = vshrl.u32 %v243_v55, 7  ;;  %vm326_vm12 = vsmask.f32 7440 }
   0x3   :  { %v888_v2 = vld [vmem:[%s1139_s3 + $0x78] sm:$0xff]  ;;  %639 = vmatpush.bf16.msra.mxu2 %v896_v1  ;;  %v887_v5 = vld [vmem:[%s1139_s3 + $0x70] sm:$0xff]  ;;  %v886_v8 = vld [vmem:[%s1139_s3 + $0x68] sm:$0xff] }
   0x4   :  { %449 = vmatpush.bf16.msra.mxu0 %v888_v2  ;;  %908 = vmatpush.bf16.msra.mxu3 %v888_v2  ;;  %v42_v9 = vld [vmem:[%s1137_s1] sm:$0xf]  ;;  %v44_v10 = vld [vmem:[%s1137_s1 + $0x8] sm:$0xf]  ;;  %v876_v20 = vld [vmem:[%s1139_s3 + $0x18] sm:$0xff] }
   0x5   :  { %43 = vst [vmem:[#allocation2] sm:$0xf] %v42_v9  ;;  %v146_v11 = vld [vmem:[%s1140_s4] sm:$0x1]  ;;  %v892_v21 = vld [vmem:[%s1139_s3 + $0x98] sm:$0xff]  ;;  %v872_v28 = vld [vmem:[%s1136_s0 + $0x8] sm:$0xff] }
   0x6   :  { %529 = vmatpush.bf16.msra.mxu1 %v879_v3  ;;  %45 = vst [vmem:[#allocation2 + $0x4] sm:$0xf] %v44_v10  ;;  %v1013_v12 = vmul.f32 0.045454547, %v146_v11  ;;  %v148_v13 = vld [vmem:[%s1141_s5] sm:$0x1]  ;;  %vm238_vm4 = vmand %vm236_vm0, %vm237_vm1 }
   0x7   :  { %640 = vmatpush.bf16.msra.mxu2 %v895_v4  ;;  %v877_v14 = vld [vmem:[%s1139_s3 + $0x20] sm:$0xff]  ;;  %v149_v16 = vmul.f32 0.045454547, %v148_v13  ;;  %v884_v22 = vld [vmem:[%s1139_s3 + $0x58] sm:$0xff]  ;;  %v875_v29 = vld [vmem:[%s1139_s3 + $0x10] sm:$0xff]  ;;  %v212_v35 = vshrl.u32 %v872_v28, 16 }
   0x8   :  { %450 = vmatpush.bf16.msra.mxu0 %v887_v5  ;;  %909 = vmatpush.bf16.msra.mxu3 %v887_v5  ;;  %v893_v15 = vld [vmem:[%s1139_s3 + $0xa0] sm:$0xff]  ;;  %v150_v18 = vmul.f32 %v1013_v12, %v1013_v12  ;;  %v891_v30 = vld [vmem:[%s1139_s3 + $0x90] sm:$0xff]  ;;  %v874_v36 = vld [vmem:[%s1139_s3 + $0x8] sm:$0xff]  ;;  %v215_v45 = vshll.u32 %v872_v28, 16 }
   0x9   :  { %v885_v17 = vld [vmem:[%s1139_s3 + $0x60] sm:$0xff]  ;;  %v883_v33 = vld [vmem:[%s1139_s3 + $0x50] sm:$0xff]  ;;  %v890_v37 = vld [vmem:[%s1139_s3 + $0x88] sm:$0xff]  ;;  %v214_v44 = vrot.slane %v212_v35, 7 }
   0xa   :  { %530 = vmatpush.bf16.msra.mxu1 %v878_v6  ;;  %v151_v19 = vsub.f32 %v149_v16, %v150_v18  ;;  %v871_v27 = vld [vmem:[%s1136_s0] sm:$0xff]  ;;  %v882_v40 = vld [vmem:[%s1139_s3 + $0x48] sm:$0xff]  ;;  %v249_v16 = vadd.s32 4294967295, %v244_v0  ;;  %vm1087_vm10 = vmor %vm549_vm8, %vm550_vm9 }
   0xb   :  { %641 = vmatpush.bf16.msra.mxu2 %v894_v7  ;;  %v205_v34 = vshrl.u32 %v871_v27, 16  ;;  %v208_v43 = vshll.u32 %v871_v27, 16  ;;  %v873_v46 = vld [vmem:[%s1139_s3] sm:$0xff]  ;;  %v217_v54 = vor.u32 %v215_v45, %v214_v44  ;;  %v1077_v7 = vadd.s32 8, %v244_v0  ;;  %vm1102_vm13 = vmor %vm325_vm11, %vm326_vm12 }
   0xc   :  { %451 = vmatpush.bf16.msra.mxu0 %v886_v8  ;;  %910 = vmatpush.bf16.msra.mxu3 %v886_v8  ;;  %v152_v23 = vmax.f32 %v151_v19, 0.0  ;;  %v170_v24 = vld [vmem:[#allocation2] sm:$0x8]  ;;  %v164_v61 = vld [vmem:[%s1142_s6] sm:$0x1]  ;;  %vm252_vm6 = vcmp.ge.s32.totalorder %v249_v16, 0 }
   0xd   :  { %v171_v25 = vld [vmem:[#allocation2 + $0x4] sm:$0x8]  ;;  %v180_v31 = vunpack.c.l.b16 %v170_v24  ;;  %v207_v42 = vrot.slane %v205_v34, 7  ;;  %v166_v6 = vld [vmem:[%s1143_s7] sm:$0x1]  ;;  %v920_v34 = vmov 0.0|0.0  }
   0xe   :  { %531 = vmatpush.bf16.msra.mxu1 %v877_v14  ;;  %v153_v26 = vadd.f32 1e-05, %v152_v23  ;;  %v181_v32 = vunpack.c.l.b16 %v171_v25  ;;  %v889_v50 = vld [vmem:[%s1139_s3 + $0x80] sm:$0xff]  ;;  %v1083_v35 = vrot.slane %v920_v34, 5  ;;  %v921_v0 = vmov 0  }
   0xf   :  { %642 = vmatpush.bf16.msra.mxu2 %v893_v15  ;;  %v182_v38 = vpack.c.b16 %v180_v31, %v180_v31  ;;  %v881_v52 = vld [vmem:[%s1139_s3 + $0x40] sm:$0xff]  ;;  %v210_v53 = vor.u32 %v208_v43, %v207_v42  ;;  %vm666_vm14 = vcmp.lt.s32.totalorder %v1077_v7, 11 }
  0x10   :  { %452 = vmatpush.bf16.msra.mxu0 %v885_v17  ;;  %911 = vmatpush.bf16.msra.mxu3 %v885_v17  ;;  %918 = vrsqrt.f32 %v153_v26  ;;  %v183_v39 = vpack.c.b16 %v181_v32, %v181_v32  ;;  %vm160_vm2 = vweird.f32 %v153_v26  ;;  %v250_v17 = vadd.s32 4294967295, %v1077_v7 }
  0x11   :  { %v185_v48 = vshrl.u32 %v182_v38, 16 }
  0x12   :  { %532 = vmatpush.bf16.msra.mxu1 %v876_v20  ;;  %v189_v49 = vshrl.u32 %v183_v39, 16  ;;  %vm256_vm7 = vcmp.lt.s32.totalorder %v250_v17, 11 }
  0x13   :  { %643 = vmatpush.bf16.msra.mxu2 %v892_v21  ;;  %v187_v57 = vrot.slane %v185_v48, 3 }
  0x14   :  { %453 = vmatpush.bf16.msra.mxu0 %v884_v22  ;;  %912 = vmatpush.bf16.msra.mxu3 %v884_v22  ;;  %v191_v58 = vrot.slane %v189_v49, 3 }
  0x15   :  { %v239_v62 = vsel %vm238_vm4, %v187_v57, %v210_v53 }
  0x16   :  { %533 = vmatpush.bf16.msra.mxu1 %v875_v29  ;;  %v919_v41 = vpop.eup %918  ;;  %v240_v63 = vsel %vm238_vm4, %v191_v58, %v217_v54  ;;  %v261_v3 = vunpack.c.l.bf16 %v239_v62  ;;  %v262_v4 = vunpack.c.h.bf16 %v239_v62 }
  0x17   :  { %644 = vmatpush.bf16.msra.mxu2 %v891_v30  ;;  %v155_v47 = vmul.f32 %v919_v41, %v153_v26  ;;  %vm161_vm3 = vweird.f32 %v919_v41  ;;  %v264_v5 = vunpack.c.l.bf16 %v240_v63  ;;  %v265_v8 = vunpack.c.h.bf16 %v240_v63 }
  0x18   :  { %454 = vmatpush.bf16.msra.mxu0 %v883_v33  ;;  %913 = vmatpush.bf16.msra.mxu3 %v883_v33  ;;  %vm162_vm5 = vmor %vm160_vm2, %vm161_vm3 }
  0x19   :  { %v156_v51 = vmul.f32 %v919_v41, %v155_v47 }
  0x1a   :  { %534 = vmatpush.bf16.msra.mxu1 %v874_v36 }
  0x1b   :  { %645 = vmatpush.bf16.msra.mxu2 %v890_v37  ;;  %v157_v56 = vmul.f32 0.5, %v156_v51 }
  0x1c   :  { %455 = vmatpush.bf16.msra.mxu0 %v882_v40  ;;  %914 = vmatpush.bf16.msra.mxu3 %v882_v40 }
  0x1d   :  { %v158_v59 = vsub.f32 1.5, %v157_v56 }
  0x1e   :  { %535 = vmatpush.bf16.msra.mxu1 %v873_v46 }
  0x1f   :  { %646 = vmatpush.bf16.msra.mxu2 %v889_v50  ;;  %v159_v60 = vmul.f32 %v919_v41, %v158_v59 }
  0x20   :  { %456 = vmatpush.bf16.msra.mxu0 %v881_v52  ;;  %915 = vmatpush.bf16.msra.mxu3 %v881_v52 }
  0x21   :  { %v163_v1 = vsel %vm162_vm5, %v919_v41, %v159_v60 }
  0x22   :  { %v165_v2 = vmul.f32 %v164_v61, %v163_v1  ;;  %v350_v1 = vrot.slane %v921_v0, 5 }
  0x24   :  { %v167_v9 = vmul.f32 %v165_v2, %v1013_v12  ;;  %v268_v10 = vperm.slane %v165_v2, 0 }
  0x26   :  { %v168_v11 = vsub.f32 %v166_v6, %v167_v9  ;;  %v270_v13 = vmul.f32 %v268_v10, %v261_v3  ;;  %v271_v14 = vmul.f32 %v268_v10, %v262_v4  ;;  %v273_v15 = vmul.f32 %v268_v10, %v264_v5 }
  0x27   :  { %v274_v18 = vmul.f32 %v268_v10, %v265_v8 }
  0x28   :  { %v277_v19 = vperm.slane %v168_v11, 0 }
  0x2a   :  { %v279_v20 = vadd.f32 %v277_v19, %v270_v13  ;;  %v280_v21 = vadd.f32 %v277_v19, %v271_v14  ;;  %v282_v22 = vadd.f32 %v277_v19, %v273_v15  ;;  %v283_v23 = vadd.f32 %v277_v19, %v274_v18 }
  0x2c   :  { %v285_v24 = vmax.f32 %v279_v20, 0.0  ;;  %v286_v25 = vmax.f32 %v280_v21, 0.0  ;;  %v288_v26 = vmax.f32 %v282_v22, 0.0  ;;  %v289_v12 = vmax.f32 %v283_v23, 0.0 }
  0x2e   :  { %v297_v27 = vsel %vm252_vm6, %v285_v24, 0.0  ;;  %v298_v28 = vsel %vm256_vm7, %v286_v25, 0.0  ;;  %v300_v29 = vsel %vm252_vm6, %v288_v26, 0.0  ;;  %v301_v30 = vsel %vm256_vm7, %v289_v12, 0.0 }
  0x2f   :  { %v303_v31 = vpack.c.bf16 %v297_v27, %v297_v27  ;;  %v304_v32 = vpack.c.bf16 %v298_v28, %v298_v28  ;;  %v1081_v33 = vpack.c.bf16 %v300_v29, %v300_v29  ;;  %v1085_v36 = vpack.c.bf16 %v301_v30, %v301_v30 }
  0x31   :  { %v472_v38 = vunpack.c.l.b16 %v303_v31  ;;  %v473_v39 = vunpack.c.l.b16 %v304_v32  ;;  %v821_v40 = vrot.slane %v303_v31, 9  ;;  %v554_v41 = vrot.slane %v304_v32, 5 }
  0x32   :  { %v329_v42 = vshrl.u32 %v303_v31, 16  ;;  %v332_v43 = vshll.u32 %v303_v31, 16  ;;  %v338_v44 = vshll.u32 %v304_v32, 16  ;;  %v342_v45 = vshrl.u32 %v304_v32, 16 }
  0x33   :  { %v476_v46 = vpack.c.b16 %v473_v39, %v472_v38  ;;  %v555_v47 = vsel %vm1087_vm10, %v821_v40, %v554_v41  ;;  %v556_v48 = vrot.slane %v554_v41, 4  ;;  %v353_v49 = vshrl.u32 %v1081_v33, 16 }
  0x34   :  { %v583_v50 = vunpack.c.l.b16 %v555_v47  ;;  %v331_v51 = vrot.slane %v329_v42, 4  ;;  %v334_v52 = vrot.slane %v332_v43, 5  ;;  %v340_v53 = vrot.slane %v338_v44, 5 }
  0x35   :  { %536 = vmatmul.bf16.vlgmr.msra.gmra.mxu1 %v476_v46  ;;  %v558_v54 = vsel %vm1087_vm10, %v556_v48, %v1083_v35  ;;  %v344_v55 = vrot.slane %v342_v45, 4  ;;  %v355_v56 = vrot.slane %v353_v49, 4  ;;  %v356_v57 = vshll.u32 %v1081_v33, 16 }
  0x36   :  { %v584_v58 = vunpack.c.l.b16 %v558_v54  ;;  %v335_v59 = vor.u32 %v334_v52, %v331_v51  ;;  %v362_v60 = vshll.u32 %v1085_v36, 16  ;;  %v366_v61 = vshrl.u32 %v1085_v36, 16 }
  0x37   :  { %v345_v63 = vor.u32 %v344_v55, %v340_v53  ;;  %v358_v2 = vrot.slane %v356_v57, 5  ;;  %v561_v13 = vrot.slane %v1085_v36, 5  ;;  %v822_v17 = vrot.slane %v1081_v33, 9 }
  0x38   :  { %v587_v3 = vpack.c.b16 %v584_v58, %v583_v50  ;;  %v336_v4 = vrot.slane %v335_v59, 4  ;;  %v364_v5 = vrot.slane %v362_v60, 5  ;;  %v368_v6 = vrot.slane %v366_v61, 4 }
  0x39   :  { %v346_v8 = vrot.slane %v345_v63, 4  ;;  %v359_v9 = vor.u32 %v358_v2, %v355_v56  ;;  %v563_v20 = vrot.slane %v561_v13, 4  ;;  %v474_v22 = vunpack.c.l.b16 %v1081_v33 }
  0x3a   :  { %647 = vmatmul.bf16.vlgmr.msra.gmra.mxu2 %v587_v3  ;;  %v341_v10 = vsel %vm1102_vm13, %v336_v4, %v340_v53  ;;  %v369_v11 = vor.u32 %v368_v6, %v364_v5  ;;  %v475_v23 = vunpack.c.l.b16 %v1085_v36  ;;  %v562_v27 = vsel %vm1087_vm10, %v822_v17, %v561_v13 }
  0x3b   :  { %v351_v14 = vsel %vm1102_vm13, %v346_v8, %v350_v1  ;;  %v393_v15 = vunpack.c.l.b16 %v341_v10  ;;  %v360_v16 = vrot.slane %v359_v9, 4  ;;  %v565_v28 = vsel %vm1087_vm10, %v563_v20, %v1083_v35 }
  0x3c   :  { %v394_v18 = vunpack.c.l.b16 %v351_v14  ;;  %v370_v19 = vrot.slane %v369_v11, 4  ;;  %v477_v30 = vpack.c.b16 %v475_v23, %v474_v22  ;;  %v585_v31 = vunpack.c.l.b16 %v562_v27 }
  0x3d   :  { %v365_v21 = vsel %vm1102_vm13, %v360_v16, %v364_v5  ;;  %v586_v32 = vunpack.c.l.b16 %v565_v28 }
  0x3e   :  { %v397_v24 = vpack.c.b16 %v394_v18, %v393_v15  ;;  %v375_v25 = vsel %vm1102_vm13, %v370_v19, %v350_v1  ;;  %v395_v26 = vunpack.c.l.b16 %v365_v21 }
  0x3f   :  { %v396_v12 = vunpack.c.l.b16 %v375_v25  ;;  %v588_v33 = vpack.c.b16 %v586_v32, %v585_v31 }
  0x40   :  { %457 = vmatmul.bf16.vlgmr.msra.gmra.mxu0 %v397_v24 }
  0x41   :  { %v398_v29 = vpack.c.b16 %v396_v12, %v395_v26 }
  0x43   :  { %462 = vmatmul.bf16.vlgmr.msra.gmra.mxu3 %v398_v29 }
  0x45   :  { %541 = vmatmul.bf16.gmra.mxu1 %v477_v30 }
  0x4a   :  { %652 = vmatmul.bf16.gmra.mxu2 %v588_v33 }
  0xb2   :  { %v537_v34 = vpop.f32.mrf.mxu1 }
  0xba   :  { %v539_v36 = vpop.f32.mrf.mxu1 }
  0xbd   :  { %v458_v38 = vpop.f32.mrf.mxu0  ;;  %v648_v39 = vpop.f32.mrf.mxu2 }
  0xbe   :  { %v538_v40 = vadd.f32 %v537_v34, %v458_v38 }
  0xc0   :  { %v658_v35 = vadd.f32 %v648_v39, %v538_v40 }
  0xc2   :  { %v542_v37 = vpop.f32.mrf.mxu1  ;;  %v685_v55 = vmul.f32 %v658_v35, %v658_v35 }
  0xc5   :  { %v460_v41 = vpop.f32.mrf.mxu0  ;;  %v650_v42 = vpop.f32.mrf.mxu2 }
  0xc6   :  { %v540_v43 = vadd.f32 %v539_v36, %v460_v41  ;;  %v463_v44 = vpop.f32.mrf.mxu3 }
  0xc7   :  { %v543_v47 = vadd.f32 %v542_v37, %v463_v44 }
  0xc8   :  { %v659_v45 = vadd.f32 %v650_v42, %v540_v43 }
  0xca   :  { %v900_v46 = vpack.c.bf16 %v659_v45, %v658_v35  ;;  %v672_v49 = vsel %vm666_vm14, %v659_v45, 0.0  ;;  %v544_v51 = vpop.f32.mrf.mxu1 }
  0xcb   :  { %v686_v53 = vmul.f32 %v672_v49, %v672_v49  ;;  %v675_v56 = vadd.f32 %v672_v49, %v658_v35 }
  0xcc   :  { %901 = vst [vmem:[%s1144_s8] sm:$0xff] %v900_v46  }
  0xcd   :  { %v653_v48 = vpop.f32.mrf.mxu2  ;;  %v689_v60 = vadd.f32 %v686_v53, %v685_v55 }
  0xce   :  { %v465_v50 = vpop.f32.mrf.mxu3  ;;  %v660_v52 = vadd.f32 %v653_v48, %v543_v47 }
  0xcf   :  { %v545_v54 = vadd.f32 %v544_v51, %v465_v50 }
  0xd0   :  { %v687_v57 = vmul.f32 %v660_v52, %v660_v52  ;;  %v676_v61 = vadd.f32 %v675_v56, %v660_v52 }
  0xd2   :  { %v690_v0 = vadd.f32 %v689_v60, %v687_v57 }
  0xd5   :  { %v655_v58 = vpop.f32.mrf.mxu2 }
  0xd6   :  { %v661_v59 = vadd.f32 %v655_v58, %v545_v54 }
  0xd8   :  { %v674_v62 = vsel %vm666_vm14, %v661_v59, 0.0  ;;  %v905_v63 = vpack.c.bf16 %v661_v59, %v660_v52 }
  0xd9   :  { %v677_v1 = vadd.f32 %v676_v61, %v674_v62  ;;  %v688_v2 = vmul.f32 %v674_v62, %v674_v62 }
  0xda   :  { %907 = vst [vmem:[%s1144_s8 + $0x8] sm:$0xff] %v905_v63  }
  0xdb   :  { %v678_v7 = vrot.slane %v677_v1, 4  ;;  %v691_v3 = vadd.f32 %v690_v0, %v688_v2 }
  0xdd   :  { %v679_v4 = vadd.f32 %v678_v7, %v677_v1  ;;  %v692_v5 = vrot.slane %v691_v3, 4 }
  0xdf   :  { %v680_v6 = vrot.slane %v679_v4, 2  ;;  %v693_v8 = vadd.f32 %v692_v5, %v691_v3 }
  0xe1   :  { %v681_v9 = vadd.f32 %v680_v6, %v679_v4  ;;  %v694_v10 = vrot.slane %v693_v8, 2 }
  0xe3   :  { %v682_v11 = vrot.slane %v681_v9, 1  ;;  %v695_v13 = vadd.f32 %v694_v10, %v693_v8 }
  0xe5   :  { %v683_v14 = vadd.f32 %v682_v11, %v681_v9  ;;  %v696_v15 = vrot.slane %v695_v13, 1 }
  0xe7   :  { %684 = vst [vmem:[%s1145_s9] sm:$0x1] %v683_v14  ;;  %v697_v16 = vadd.f32 %v696_v15, %v695_v13 }
  0xe9   :  { %698 = vst [vmem:[%s1146_s10] sm:$0x1] %v697_v16 }

// kernel: encoder_forward.17
= control target key start
LH: loop header
LB: loop body
LE: loop exit
PB: predicated region body
PF: predicated region fallthrough
CT: control target
= control target key end

     0   :  { %v69_v16 = vlaneseq  ;;  %s165_s1 = inlined_call_operand.vmem [shape: f32[1,1,128], index: 1, kind: input, shape index: {}]   ;;  %s166_s2 = inlined_call_operand.vmem [shape: f32[1,1,128], index: 2, kind: input, shape index: {}]   ;;  %s167_s0 = inlined_call_operand.vmem [shape: bf16[2,16,128], index: 0, kind: input, shape index: {}]   ;;  %s168_s3 = inlined_call_operand.vmem [shape: f32[1,1,128], index: 3, kind: input, shape index: {}]   ;;  %s169_s4 = inlined_call_operand.vmem [shape: f32[1,1,128], index: 4, kind: input, shape index: {}]   ;;  %s170_s5 = inlined_call_operand.vmem [shape: f32[2,16,128], index: 5, kind: output, shape index: {}]  }
   0x1   :  { %v20_v0 = vld [vmem:[%s165_s1] sm:$0x1]  ;;  %v102_v17 = vld [vmem:[%s167_s0 + $0x8] sm:$0xff]  }
   0x2   :  { %v22_v1 = vld [vmem:[%s166_s2] sm:$0x1]  ;;  %v21_v2 = vmul.f32 0.045454547, %v20_v0  ;;  %v100_v22 = vunpack.c.l.bf16 %v102_v17  ;;  %v70_v24 = vshrl.u32 %v69_v16, 7  ;;  %v101_v25 = vunpack.c.h.bf16 %v102_v17 }
   0x3   :  { %v23_v3 = vmul.f32 0.045454547, %v22_v1  ;;  %v38_v14 = vld [vmem:[%s168_s3] sm:$0x1] }
   0x4   :  { %v24_v4 = vmul.f32 %v21_v2, %v21_v2  ;;  %v95_v15 = vld [vmem:[%s167_s0] sm:$0xff]   ;;  %v71_v32 = vadd.s32 8, %v70_v24 }
   0x5   :  { %v96_v20 = vunpack.c.l.bf16 %v95_v15  ;;  %v97_v21 = vunpack.c.h.bf16 %v95_v15  ;;  %v40_v23 = vld [vmem:[%s169_s4] sm:$0x1] }
   0x6   :  { %v25_v5 = vsub.f32 %v23_v3, %v24_v4  ;;  %vm77_vm3 = vcmp.lt.s32.totalorder %v71_v32, 11 }
   0x8   :  { %v26_v6 = vmax.f32 %v25_v5, 0.0 }
   0xa   :  { %v27_v7 = vadd.f32 1e-05, %v26_v6 }
   0xc   :  { %103 = vrsqrt.f32 %v27_v7  ;;  %vm34_vm0 = vweird.f32 %v27_v7 }
  0x12   :  { %v104_v8 = vpop.eup %103 }
  0x13   :  { %v29_v9 = vmul.f32 %v104_v8, %v27_v7  ;;  %vm35_vm1 = vweird.f32 %v104_v8 }
  0x14   :  { %vm36_vm2 = vmor %vm34_vm0, %vm35_vm1 }
  0x15   :  { %v30_v10 = vmul.f32 %v104_v8, %v29_v9 }
  0x17   :  { %v31_v11 = vmul.f32 0.5, %v30_v10 }
  0x19   :  { %v32_v12 = vsub.f32 1.5, %v31_v11 }
  0x1b   :  { %v33_v13 = vmul.f32 %v104_v8, %v32_v12 }
  0x1d   :  { %v37_v18 = vsel %vm36_vm2, %v104_v8, %v33_v13 }
  0x1e   :  { %v39_v19 = vmul.f32 %v38_v14, %v37_v18 }
  0x20   :  { %v41_v26 = vmul.f32 %v39_v19, %v21_v2  ;;  %v52_v27 = vperm.slane %v39_v19, 0 }
  0x22   :  { %v42_v28 = vsub.f32 %v40_v23, %v41_v26  ;;  %v54_v29 = vmul.f32 %v96_v20, %v52_v27  ;;  %v55_v30 = vmul.f32 %v97_v21, %v52_v27  ;;  %v56_v31 = vmul.f32 %v100_v22, %v52_v27 }
  0x23   :  { %v57_v33 = vmul.f32 %v101_v25, %v52_v27 }
  0x24   :  { %v59_v34 = vperm.slane %v42_v28, 0 }
  0x26   :  { %v61_v35 = vadd.f32 %v59_v34, %v54_v29  ;;  %v62_v36 = vadd.f32 %v59_v34, %v55_v30  ;;  %v63_v37 = vadd.f32 %v59_v34, %v56_v31  ;;  %v64_v38 = vadd.f32 %v59_v34, %v57_v33 }
  0x28   :  { %v65_v39 = vmax.f32 %v61_v35, 0.0  ;;  %v66_v40 = vmax.f32 %v62_v36, 0.0  ;;  %v67_v41 = vmax.f32 %v63_v37, 0.0  ;;  %v68_v42 = vmax.f32 %v64_v38, 0.0 }
  0x2a   :  { %86 = vst [vmem:[%s170_s5] sm:$0xff] %v65_v39  ;;  %v83_v43 = vsel %vm77_vm3, %v66_v40, 0.0  ;;  %v85_v44 = vsel %vm77_vm3, %v68_v42, 0.0 }
  0x2b   :  { %87 = vst [vmem:[%s170_s5 + $0x8] sm:$0xff] %v83_v43 }
  0x2c   :  { %88 = vst [vmem:[%s170_s5 + $0x10] sm:$0xff] %v67_v41 }
  0x2d   :  { %89 = vst [vmem:[%s170_s5 + $0x18] sm:$0xff] %v85_v44 }

// kernel: encoder_forward.13
= control target key start
LH: loop header
LB: loop body
LE: loop exit
PB: predicated region body
PF: predicated region fallthrough
CT: control target
= control target key end

     0   :  { %s2299_s0 = inlined_call_operand.vmem [shape: bf16[2,48,128], index: 0, kind: input, shape index: {}, may-alias: {0,1,2}]   ;;  %s2300_s1 = inlined_call_operand.vmem [shape: bf16[2,48,128], index: 1, kind: input, shape index: {}, may-alias: {0,1,2}]   ;;  %s2301_s2 = inlined_call_operand.vmem [shape: bf16[2,48,128], index: 2, kind: input, shape index: {}, may-alias: {0,1,2}]   ;;  %s2302_s3 = inlined_call_operand.vmem [shape: bf16[3,128,128], index: 3, kind: input, shape index: {}]   ;;  %s2303_s4 = inlined_call_operand.vmem [shape: f32[1,1,128], index: 4, kind: input, shape index: {}]   ;;  %s2304_s5 = inlined_call_operand.vmem [shape: f32[1,1,128], index: 5, kind: input, shape index: {}]   ;;  %s2305_s6 = inlined_call_operand.vmem [shape: f32[1,1,128], index: 6, kind: input, shape index: {}]   ;;  %s2306_s7 = inlined_call_operand.vmem [shape: f32[1,1,128], index: 7, kind: input, shape index: {}]   ;;  %s2307_s8 = inlined_call_operand.vmem [shape: bf16[2,48,128], index: 8, kind: output, shape index: {0}]   ;;  %s2308_s9 = inlined_call_operand.vmem [shape: f32[2,1,128], index: 9, kind: output, shape index: {1}]   ;;  %s2309_s10 = inlined_call_operand.vmem [shape: f32[2,1,128], index: 10, kind: output, shape index: {2}]  }
   0x1   :  { %2313 = sst [smem:[#allocation10_spill]] %s2307_s8 }
   0x2   :  { %2314 = sst [smem:[#allocation11_spill]] %s2308_s9 }
   0x3   :  { %2315 = sst [smem:[#allocation12_spill]] %s2309_s10 }
   0x4   :  { %s1879_s13 = smov 0   ;;  %s1881_s14 = smov 0  }
   0x5   :  { %s1883_s15 = smov 0   ;;  %s1885_s16 = smov 0  }
   0x6   :  { %s1887_s17 = smov 0   ;;  %s1889_s18 = smov 0  }
   0x7   :  { %s1891_s19 = smov 0  }
   0x8 LB: > { %s1915_s20 = sadd.s32 1, %s1822_s19   ;;  %s28_s22 = sadd.s32 1, %s1818_s18  ;;  %s1822_s19 = sphi %s1891_s19, %s2340_s19   ;;  %s1818_s18 = sphi %s1889_s18, %s2348_s18   ;;  %s1814_s17 = sphi %s1887_s17, %s2347_s17   ;;  %s1810_s16 = sphi %s1885_s16, %s2346_s16   ;;  %s1806_s15 = sphi %s1883_s15, %s2345_s15   ;;  %s1802_s14 = sphi %s1881_s14, %s2344_s14   ;;  %s1798_s13 = sphi %s1879_s13, %s2343_s13  }
   0x9   : > { %2316 = sst [smem:[#allocation6_spill]] %s1915_s20  ;;  %s25_s21 = ssub.s32 %s1822_s19, %s1915_s20 }
   0xa   : > { %p26_p0 = scmp.eq.s32.totalorder %s25_s21, 0  ;;  %p35_p1 = scmp.ne.s32.totalorder %s1818_s18, %s1814_s17 }
   0xb   : > { %p36_p2 = scmp.eq.s32.totalorder %s1822_s19, 0  ;;  %s51_s23 = smul.u32 3, %s1822_s19 }
   0xc   : > { %s1925_s24 = scalar_select %p26_p0, %s1818_s18, %s28_s22  }
   0xd   : > { %p1932_p3 = por %p36_p2, %p35_p1  ;;  %s1500_s26 = sadd.s32 4294967295, %s51_s23 }
   0xe   : > { %2317 = sst [smem:[#allocation7_spill]] %s1925_s24  ;;  %p53_p4 = scmp.gt.s32.totalorder %s1500_s26, 0 }
   0xf   : > { %s55_s27 = smul.u32 3, %s1915_s20  ;;  %s1938_s28 = sadd.s32 4294967295, %s1822_s19  }
  0x10   : > { %p69_p5 = scmp.ne.s32.totalorder %s1810_s16, %s1806_s15  ;;  %s2350_s26 = smov (!%p53_p4, %s1500_s26), 0 }
  0x11   : > { %s1501_s29 = sadd.s32 4294967295, %s55_s27  ;;  %p87_p8 = scmp.lt.s32.totalorder %s55_s27, 5 }
  0x12   : > { %p1946_p6 = por %p69_p5, %p36_p2  ;;  %p57_p7 = scmp.gt.s32.totalorder %s1501_s29, 0 }
  0x13   : > { %s62_s11 = sadd.s32 1, %s1810_s16  ;;  %s89_s12 = sadd.s32 1, %s1915_s20 }
  0x14   : > { %s2352_s29 = smov (!%p57_p7, %s1501_s29), 0  ;;  %s2354_s27 = smov (!%p87_p8, %s55_s27), 5 }
  0x15   : > { %s59_s21 = ssub.s32 %s2350_s26, %s2352_s29  ;;  %s90_s22 = smul.u32 3, %s89_s12 }
  0x16   : > { %p60_p9 = scmp.eq.s32.totalorder %s59_s21, 0  ;;  %p103_p10 = scmp.ne.s32.totalorder %s1802_s14, %s1798_s13 }
  0x17   : > { %p91_p11 = scmp.lt.s32.totalorder %s90_s22, 5  ;;  %p238_p12 = scmp.eq.s32.totalorder %s1938_s28, 1 }
  0x18   : > { %s1959_s23 = scalar_select %p60_p9, %s1810_s16, %s62_s11  }
  0x19   : > { %s2356_s22 = smov (!%p91_p11, %s90_s22), 5  ;;  %p1963_p13 = por %p103_p10, %p36_p2 }
  0x1a   : > { %2320 = sst [smem:[#allocation8_spill]] %s1959_s23  ;;  %p1970_p0 = por %p238_p12, %p35_p1 }
  0x1b   : > { %s93_s8 = ssub.s32 %s2354_s27, %s2356_s22  ;;  %s96_s29 = sadd.s32 1, %s1802_s14 }
  0x1c   : > { %s2322_s20 = scalar_select %p1970_p0, 1, 0 }
  0x1d   : > { %p94_p4 = scmp.eq.s32.totalorder %s93_s8, 0  ;;  %p1503_p5 = scmp.ge.s32.totalorder %s1822_s19, 2 }
  0x1e   : > { %2323 = sst [smem:[#allocation9_spill]] %s2322_s20 }
  0x1f   : > { %s1977_s12 = scalar_select %p94_p4, %s1802_s14, %s96_s29  }
  0x20   : > { %327 = sbr.rel (%p1503_p5) target bundleno = 58 (0x3a), region = 36 }
  0x25   : > { %330 = sbr.rel (!%p1932_p3) target bundleno = 46 (0x2e), region = 40  ;;  %s332_s11 = sand.u32 (%p1932_p3), 1, %s1818_s18  }
  0x26   : > { %s1655_s21 = smul.u32 (%p1932_p3), 12, %s1822_s19 }
  0x27   : > { %s1708_s23 = smul.u32 (%p1932_p3), 24, %s332_s11 }
  0x28   : > { %s337_s20 = scalar_lea.vmem (%p1932_p3), %s2299_s0, %s1655_s21 }
  0x29   : > { %v354_v0 = vld [vmem:[%s337_s20] sm:$0xff] (%p1932_p3)   ;;  %v358_v1 = vld [vmem:[%s337_s20 + $0x8] sm:$0xf] (%p1932_p3)  ;;  %v360_v2 = vld [vmem:[%s337_s20 + $0x18] sm:$0xff] (%p1932_p3)   ;;  %s334_s8 = scalar_lea.vmem (%p1932_p3), [#allocation2], %s1708_s23 }
  0x2a   : > { %355 = vst [vmem:[%s334_s8] sm:$0xff] %v354_v0   ;;  %v364_v3 = vld [vmem:[%s337_s20 + $0x20] sm:$0xf] }
  0x2b   : > { %359 = vst [vmem:[%s334_s8 + $0x8] sm:$0xf] %v358_v1 }
  0x2c   : > { %361 = vst [vmem:[%s334_s8 + $0xc] sm:$0xff] %v360_v2  }
  0x2d   : > { %365 = vst [vmem:[%s334_s8 + $0x14] sm:$0xf] %v364_v3 }
  0x2e PF: > { %401 = sbr.rel (!%p1946_p6) target bundleno = 52 (0x34), region = 81  ;;  %s403_s25 = sand.u32 (%p1946_p6), 1, %s1810_s16  }
  0x2f   : > { %s1507_s22 = sshll.u32 (%p1946_p6), %s2350_s26, 2  ;;  %s1505_s29 = sshll.u32 (%p1946_p6), %s403_s25, 3 }
  0x30   : > { %s411_s11 = scalar_lea.vmem (%p1946_p6), %s2300_s1, %s1507_s22  ;;  %s405_s23 = scalar_lea.vmem (%p1946_p6), [#allocation3], %s1505_s29 }
  0x31   : > { %v428_v4 = vld [vmem:[%s411_s11] sm:$0xf] (%p1946_p6)  ;;  %v430_v5 = vld [vmem:[%s411_s11 + $0x18] sm:$0xf] (%p1946_p6) }
  0x32   : > { %429 = vst [vmem:[%s405_s23] sm:$0xf] (%p1946_p6), %v428_v4 }
  0x33   : > { %431 = vst [vmem:[%s405_s23 + $0x4] sm:$0xf] %v430_v5 }
  0x34 PF: > { %459 = sbr.rel (!%p1963_p13) target bundleno = 58 (0x3a), region = 122  ;;  %s461_s20 = sand.u32 (%p1963_p13), 1, %s1802_s14  }
  0x35   : > { %s1509_s30 = sshll.u32 (%p1963_p13), %s2354_s27, 2  ;;  %s1508_s21 = sshll.u32 (%p1963_p13), %s461_s20, 3 }
  0x36   : > { %s469_s25 = scalar_lea.vmem (%p1963_p13), %s2301_s2, %s1509_s30  ;;  %s463_s22 = scalar_lea.vmem (%p1963_p13), [#allocation4], %s1508_s21 }
  0x37   : > { %v486_v6 = vld [vmem:[%s469_s25] sm:$0xf] (%p1963_p13)  ;;  %v488_v7 = vld [vmem:[%s469_s25 + $0x18] sm:$0xf] (%p1963_p13) }
  0x38   : > { %487 = vst [vmem:[%s463_s22] sm:$0xf] (%p1963_p13), %v486_v6 }
  0x39   : > { %489 = vst [vmem:[%s463_s22 + $0x4] sm:$0xf] %v488_v7 }
  0x3a PF: > { %p1510_p1 = scmp.ge.s32.totalorder %s1822_s19, 1  ;;  %p516_p2 = scmp.lt.s32.totalorder %s1822_s19, 3 }
  0x3c   : > { %p517_p3 = pnand %p1510_p1, %p516_p2 }
  0x3d   : > { %s523_s10 = sand.u32 (!%p517_p3), 1, %s1814_s17   ;;  %s530_s11 = sand.u32 (!%p517_p3), 1, %s1806_s15  }
  0x3e   : > { %520 = sbr.rel (%p517_p3) target bundleno = 316 (0x13c), region = 163  ;;  %s1511_s25 = sshll.u32 (!%p517_p3), %s530_s11, 3 }
  0x3f   : > { %s2020_s8 = smul.u32 (!%p517_p3), 24, %s523_s10  ;;  %s537_s30 = sand.u32 (!%p517_p3), 1, %s1798_s13  }
  0x40   : > { %s532_s13 = scalar_lea.vmem (!%p517_p3), [#allocation3], %s1511_s25  ;;  %s2055_s24 = sshll.u32 (!%p517_p3), %s537_s30, 3 }
  0x41   : > { %s2044_s21 = scalar_lea.vmem (!%p517_p3), [#allocation2], %s2020_s8  ;;  %s539_s19 = scalar_lea.vmem (!%p517_p3), [#allocation4], %s2055_s24 }
  0x42   : > { %s626_s22 = smul.u32 (!%p517_p3), 24, %s1938_s28  ;;  %s2245_s29 = scalar_lea.vmem (!%p517_p3), [#allocation5], %s2020_s8 }
  0x43   : > { %v1665_v8 = vld [vmem:[%s2302_s3 + $0x38] sm:$0xff]  ;;  %v1664_v11 = vld [vmem:[%s2302_s3 + $0x30] sm:$0xff]  ;;  %v1663_v14 = vld [vmem:[%s2302_s3 + $0x28] sm:$0xff]  ;;  %v729_v54 = vlaneseq  ;;  %vm669_vm0 = vsmask.f32 256  ;;  %vm720_vm1 = vcmask 1040384  }
  0x44   : > { %v1681_v9 = vld [vmem:[%s2302_s3 + $0xb8] sm:$0xff]  ;;  %1068 = vmatpush.bf16.msra.mxu1 %v1665_v8  ;;  %v1680_v12 = vld [vmem:[%s2302_s3 + $0xb0] sm:$0xff]  ;;  %v1679_v15 = vld [vmem:[%s2302_s3 + $0xa8] sm:$0xff]  ;;  %s1521_s25 = sadd.s32 4294967295, %s626_s22  ;;  %vm724_vm2 = vcmask 1044480   ;;  %vm1094_vm13 = vcmask 1042432  }
  0x45   : > { %v1673_v10 = vld [vmem:[%s2302_s3 + $0x78] sm:$0xff]  ;;  %1194 = vmatpush.bf16.msra.mxu2 %v1681_v9  ;;  %v1672_v13 = vld [vmem:[%s2302_s3 + $0x70] sm:$0xff]  ;;  %v1671_v16 = vld [vmem:[%s2302_s3 + $0x68] sm:$0xff]  ;;  %v2102_v7 = vshrl.u32 %v729_v54, 7  ;;  %v2104_v8 = vstv %s1521_s25  ;;  %vm725_vm3 = vsmask.f32 4352 }
  0x46   : > { %978 = vmatpush.bf16.msra.mxu0 %v1673_v10  ;;  %1700 = vmatpush.bf16.msra.mxu3 %v1673_v10  ;;  %v603_v17 = vld [vmem:[%s2303_s4] sm:$0x1]  ;;  %v627_v25 = vld [vmem:[%s532_s13] sm:$0x8]  ;;  %v628_v29 = vld [vmem:[%s532_s13 + $0x4] sm:$0x8] }
  0x47   : > { %v605_v18 = vld [vmem:[%s2304_s5] sm:$0x1]  ;;  %v2041_v19 = vmul.f32 0.015625, %v603_v17  ;;  %v639_v30 = vunpack.c.l.b16 %v627_v25  ;;  %v1661_v31 = vld [vmem:[%s2302_s3 + $0x18] sm:$0xff]  ;;  %v640_v36 = vunpack.c.l.b16 %v628_v29  ;;  %v2073_v39 = vld [vmem:[%s2044_s21 + $0xc] sm:$0xff]  ;;  %vm1095_vm14 = vcmask 1046532  }
  0x48   : > { %1069 = vmatpush.bf16.msra.mxu1 %v1664_v11  ;;  %v606_v20 = vmul.f32 0.015625, %v605_v18  ;;  %v631_v21 = vld [vmem:[%s2044_s21 + $0x8] sm:$0xf]  ;;  %v1677_v32 = vld [vmem:[%s2302_s3 + $0x98] sm:$0xff]  ;;  %v635_v40 = vld [vmem:[%s539_s19] sm:$0x1] }
  0x49   : > { %1195 = vmatpush.bf16.msra.mxu2 %v1680_v12  ;;  %v1662_v22 = vld [vmem:[%s2302_s3 + $0x20] sm:$0xff]  ;;  %v607_v24 = vmul.f32 %v2041_v19, %v2041_v19  ;;  %v661_v27 = vunpack.c.l.b16 %v631_v21  ;;  %v1669_v35 = vld [vmem:[%s2302_s3 + $0x58] sm:$0xff]  ;;  %v641_v41 = vpack.c.b16 %v639_v30, %v639_v30  ;;  %v1660_v42 = vld [vmem:[%s2302_s3 + $0x10] sm:$0xff]  ;;  %v642_v46 = vpack.c.b16 %v640_v36, %v640_v36  ;;  %p597_p6 = scmp.lt.s32.totalorder %s1938_s28, 1  ;;  %s2336_s10 = sld [smem:[#allocation11_spill]] }
  0x4a   : > { %979 = vmatpush.bf16.msra.mxu0 %v1672_v13  ;;  %1701 = vmatpush.bf16.msra.mxu3 %v1672_v13  ;;  %v1678_v23 = vld [vmem:[%s2302_s3 + $0xa0] sm:$0xff]  ;;  %v1676_v43 = vld [vmem:[%s2302_s3 + $0x90] sm:$0xff]  ;;  %v706_v48 = vunpack.c.l.b16 %v635_v40  ;;  %v686_v50 = vshrl.u32 %v2073_v39, 16  ;;  %v1659_v55 = vld [vmem:[%s2302_s3 + $0x8] sm:$0xff]  ;;  %v689_v3 = vshll.u32 %v2073_v39, 16  ;;  %s2337_s20 = sld [smem:[#allocation12_spill]] }
  0x4b   : > { %v1670_v26 = vld [vmem:[%s2302_s3 + $0x60] sm:$0xff]  ;;  %v608_v28 = vsub.f32 %v606_v20, %v607_v24  ;;  %v666_v37 = vpack.c.b16 %v661_v27, %v661_v27  ;;  %v1668_v45 = vld [vmem:[%s2302_s3 + $0x50] sm:$0xff]  ;;  %v644_v52 = vshrl.u32 %v641_v41, 16  ;;  %v1675_v56 = vld [vmem:[%s2302_s3 + $0x88] sm:$0xff]  ;;  %v648_v61 = vshrl.u32 %v642_v46, 16  ;;  %s598_s8 = scalar_select %p597_p6, %s1938_s28, 1 }
  0x4c   : > { %1070 = vmatpush.bf16.msra.mxu1 %v1663_v14  ;;  %v1656_v34 = vld [vmem:[%s2044_s21] sm:$0xff]  ;;  %v634_v49 = vld [vmem:[%s2044_s21 + $0x14] sm:$0xf]  ;;  %v708_v58 = vpack.c.b16 %v706_v48, %v706_v48  ;;  %v688_v2 = vrot.slane %v686_v50, 7  ;;  %vm2118_vm6 = vmand %vm720_vm1, %vm669_vm0  ;;  %s1682_s30 = smul.u32 (%p1970_p0), 12, %s1938_s28  ;;  %s2339_s17 = sld [smem:[#allocation10_spill]] (%p1970_p0) }
  0x4d   : > { %1196 = vmatpush.bf16.msra.mxu2 %v1679_v15  ;;  %v609_v33 = vmax.f32 %v608_v28, 0.0  ;;  %v671_v44 = vshrl.u32 %v1656_v34, 16  ;;  %v678_v47 = vshrl.u32 %v666_v37, 16  ;;  %v636_v51 = vld [vmem:[%s539_s19 + $0x4] sm:$0x1]  ;;  %v674_v53 = vshll.u32 %v1656_v34, 16  ;;  %vm726_vm7 = vmand %vm724_vm2, %vm725_vm3 }
  0x4e   : > { %980 = vmatpush.bf16.msra.mxu0 %v1671_v16  ;;  %1702 = vmatpush.bf16.msra.mxu3 %v1671_v16  ;;  %v664_v59 = vunpack.c.l.b16 %v634_v49  ;;  %v707_v60 = vunpack.c.l.b16 %v636_v51  ;;  %v681_v63 = vshll.u32 %v666_v37, 16  ;;  %v1667_v0 = vld [vmem:[%s2302_s3 + $0x48] sm:$0xff]  ;;  %v1658_v9 = vld [vmem:[%s2302_s3] sm:$0xff]  ;;  %v646_v10 = vrot.slane %v644_v52, 3 }
  0x4f   : > { %v2070_v38 = vadd.f32 1e-05, %v609_v33  ;;  %v673_v57 = vrot.slane %v671_v44, 7  ;;  %v680_v62 = vrot.slane %v678_v47, 7  ;;  %v1674_v12 = vld [vmem:[%s2302_s3 + $0x80] sm:$0xff]  ;;  %v711_v13 = vshll.u32 %v708_v58, 16  ;;  %s599_s25 = scalar_lea.vmem %s2336_s10, %s598_s8 }
  0x50   : > { %1071 = vmatpush.bf16.msra.mxu1 %v1662_v22  ;;  %v668_v4 = vpack.c.b16 %v664_v59, %v664_v59  ;;  %v709_v5 = vpack.c.b16 %v707_v60, %v707_v60  ;;  %v650_v15 = vrot.slane %v648_v61, 3  ;;  %v691_v18 = vor.u32 %v689_v3, %v688_v2  ;;  %v1666_v20 = vld [vmem:[%s2302_s3 + $0x40] sm:$0xff]  ;;  %s602_s11 = scalar_lea.vmem %s2337_s20, %s598_s8 }
  0x51   : > { %1197 = vmatpush.bf16.msra.mxu2 %v1678_v23  ;;  %1766 = vrsqrt.f32 %v2070_v38  ;;  %v676_v11 = vor.u32 %v674_v53, %v673_v57  ;;  %v683_v16 = vor.u32 %v681_v63, %v680_v62  ;;  %vm617_vm4 = vweird.f32 %v2070_v38  ;;  %v621_v34 = vld [vmem:[%s2305_s6] sm:$0x1] }
  0x52   : > { %981 = vmatpush.bf16.msra.mxu0 %v1670_v26  ;;  %1703 = vmatpush.bf16.msra.mxu3 %v1670_v26  ;;  %v693_v17 = vshrl.u32 %v668_v4, 16  ;;  %v696_v21 = vshll.u32 %v668_v4, 16  ;;  %v715_v22 = vshll.u32 %v709_v5, 16  ;;  %v2123_v26 = vadd.s32 8, %v2102_v7  ;;  %v623_v48 = vld [vmem:[%s2306_s7] sm:$0x1]  ;;  %s1300_s13 = scalar_lea.vmem (%p1970_p0), %s2339_s17, %s1682_s30 }
  0x53   : > { %v713_v27 = vrot.slane %v711_v13, 4  ;;  %v684_v30 = vsel %vm669_vm0, %v673_v57, %v683_v16  ;;  %v723_v36 = vsel %vm2118_vm6, %v650_v15, %v691_v18 }
  0x54   : > { %1072 = vmatpush.bf16.msra.mxu1 %v1661_v31  ;;  %v695_v24 = vrot.slane %v693_v17, 7  ;;  %v717_v28 = vrot.slane %v715_v22, 4  ;;  %v736_v31 = vadd.s32 %v2104_v8, %v2102_v7  ;;  %v737_v39 = vadd.s32 %v2104_v8, %v2123_v26 }
  0x55   : > { %1198 = vmatpush.bf16.msra.mxu2 %v1677_v32  ;;  %v727_v40 = vsel %vm726_vm7, %v684_v30, %v713_v27  ;;  %v756_v47 = vunpack.c.l.bf16 %v723_v36  ;;  %v757_v49 = vunpack.c.h.bf16 %v723_v36 }
  0x56   : > { %982 = vmatpush.bf16.msra.mxu0 %v1669_v35  ;;  %1704 = vmatpush.bf16.msra.mxu3 %v1669_v35  ;;  %v698_v32 = vor.u32 %v696_v21, %v695_v24  ;;  %v722_v35 = vsel %vm2118_vm6, %v646_v10, %v676_v11  ;;  %vm740_vm9 = vcmp.ge.s32.totalorder %v736_v31, 0  ;;  %v754_v50 = vunpack.c.l.bf16 %v727_v40 }
  0x57   : > { %v1767_v1 = vpop.eup %1766  ;;  %v753_v46 = vunpack.c.h.bf16 %v722_v35  ;;  %v755_v51 = vunpack.c.h.bf16 %v727_v40  ;;  %vm741_vm10 = vcmp.ge.s32.totalorder %v737_v39, 0  ;;  %vm744_vm11 = vcmp.lt.s32.totalorder %v736_v31, 32 }
  0x58   : > { %1073 = vmatpush.bf16.msra.mxu1 %v1660_v42  ;;  %v612_v6 = vmul.f32 %v1767_v1, %v2070_v38  ;;  %vm618_vm5 = vweird.f32 %v1767_v1  ;;  %v699_v37 = vsel %vm669_vm0, %v688_v2, %v698_v32  ;;  %v2144_v42 = vadd.s32 16, %v2102_v7  ;;  %vm2156_vm3 = vmand %vm740_vm9, %vm744_vm11 }
  0x59   : > { %1199 = vmatpush.bf16.msra.mxu2 %v1676_v43  ;;  %vm619_vm8 = vmor %vm617_vm4, %vm618_vm5  ;;  %v728_v41 = vsel %vm726_vm7, %v699_v37, %v717_v28  ;;  %v733_v43 = vadd.s32 24, %v2102_v7  ;;  %vm745_vm12 = vcmp.lt.s32.totalorder %v737_v39, 32  ;;  %vm830_vm6 = vsmask.f32 3328 }
  0x5a   : > { %983 = vmatpush.bf16.msra.mxu0 %v1668_v45  ;;  %1705 = vmatpush.bf16.msra.mxu3 %v1668_v45  ;;  %v613_v14 = vmul.f32 %v1767_v1, %v612_v6  ;;  %v752_v45 = vunpack.c.l.bf16 %v722_v35  ;;  %v758_v52 = vunpack.c.l.bf16 %v728_v41  ;;  %vm2162_vm4 = vmand %vm741_vm10, %vm745_vm12  ;;  %vm831_vm7 = vsmask.f32 7440 }
  0x5b   : > { %v739_v57 = vadd.s32 %v2104_v8, %v733_v43  ;;  %vm2196_vm9 = vmor %vm1094_vm13, %vm1095_vm14 }
  0x5c   : > { %1074 = vmatpush.bf16.msra.mxu1 %v1659_v55  ;;  %v614_v23 = vmul.f32 0.5, %v613_v14  ;;  %v759_v55 = vunpack.c.h.bf16 %v728_v41  ;;  %vm2209_vm10 = vmor %vm830_vm6, %vm831_vm7 }
  0x5d   : > { %1200 = vmatpush.bf16.msra.mxu2 %v1675_v56  ;;  %v738_v56 = vadd.s32 %v2104_v8, %v2144_v42  ;;  %vm743_vm1 = vcmp.ge.s32.totalorder %v739_v57, 0  ;;  %vm747_vm2 = vcmp.lt.s32.totalorder %v739_v57, 32 }
  0x5e   : > { %984 = vmatpush.bf16.msra.mxu0 %v1667_v0  ;;  %1706 = vmatpush.bf16.msra.mxu3 %v1667_v0  ;;  %v615_v29 = vsub.f32 1.5, %v614_v23 }
  0x5f   : > { %vm742_vm15 = vcmp.ge.s32.totalorder %v738_v56, 0  ;;  %vm746_vm0 = vcmp.lt.s32.totalorder %v738_v56, 32 }
  0x60   : > { %1075 = vmatpush.bf16.msra.mxu1 %v1658_v9  ;;  %v616_v33 = vmul.f32 %v1767_v1, %v615_v29  ;;  %vm2168_vm5 = vmand %vm742_vm15, %vm746_vm0 }
  0x61   : > { %1201 = vmatpush.bf16.msra.mxu2 %v1674_v12 }
  0x62   : > { %985 = vmatpush.bf16.msra.mxu0 %v1666_v20  ;;  %1707 = vmatpush.bf16.msra.mxu3 %v1666_v20  ;;  %v620_v38 = vsel %vm619_vm8, %v1767_v1, %v616_v33  ;;  %vm751_vm8 = vmand %vm743_vm1, %vm747_vm2 }
  0x63   : > { %v622_v44 = vmul.f32 %v621_v34, %v620_v38 }
  0x65   : > { %v624_v53 = vmul.f32 %v622_v44, %v2041_v19  ;;  %v761_v54 = vperm.slane %v622_v44, 0 }
  0x67   : > { %v625_v58 = vsub.f32 %v623_v48, %v624_v53  ;;  %v763_v59 = vmul.f32 %v761_v54, %v752_v45  ;;  %v764_v60 = vmul.f32 %v761_v54, %v753_v46  ;;  %v767_v61 = vmul.f32 %v761_v54, %v756_v47 }
  0x68   : > { %v768_v62 = vmul.f32 %v761_v54, %v757_v49  ;;  %v765_v63 = vmul.f32 %v761_v54, %v754_v50  ;;  %v766_v0 = vmul.f32 %v761_v54, %v755_v51  ;;  %v769_v1 = vmul.f32 %v761_v54, %v758_v52 }
  0x69   : > { %v772_v2 = vperm.slane %v625_v58, 0  ;;  %v770_v19 = vmul.f32 %v761_v54, %v759_v55 }
  0x6b   : > { %v774_v4 = vadd.f32 %v772_v2, %v763_v59  ;;  %v775_v5 = vadd.f32 %v772_v2, %v764_v60  ;;  %v778_v6 = vadd.f32 %v772_v2, %v767_v61  ;;  %v779_v8 = vadd.f32 %v772_v2, %v768_v62 }
  0x6c   : > { %v776_v10 = vadd.f32 %v772_v2, %v765_v63  ;;  %v777_v11 = vadd.f32 %v772_v2, %v766_v0  ;;  %v780_v12 = vadd.f32 %v772_v2, %v769_v1  ;;  %v781_v13 = vadd.f32 %v772_v2, %v770_v19 }
  0x6d   : > { %v782_v14 = vmax.f32 %v774_v4, 0.0  ;;  %v783_v15 = vmax.f32 %v775_v5, 0.0  ;;  %v786_v16 = vmax.f32 %v778_v6, 0.0  ;;  %v787_v17 = vmax.f32 %v779_v8, 0.0 }
  0x6e   : > { %v784_v20 = vmax.f32 %v776_v10, 0.0  ;;  %v785_v21 = vmax.f32 %v777_v11, 0.0  ;;  %v788_v22 = vmax.f32 %v780_v12, 0.0  ;;  %v789_v23 = vmax.f32 %v781_v13, 0.0 }
  0x6f   : > { %v798_v24 = vsel %vm2156_vm3, %v782_v14, 0.0  ;;  %v799_v25 = vsel %vm2162_vm4, %v783_v15, 0.0  ;;  %v802_v27 = vsel %vm2156_vm3, %v786_v16, 0.0  ;;  %v803_v28 = vsel %vm2162_vm4, %v787_v17, 0.0 }
  0x70   : > { %v806_v29 = vpack.c.bf16 %v798_v24, %v798_v24  ;;  %v807_v30 = vpack.c.bf16 %v799_v25, %v799_v25  ;;  %v2182_v31 = vpack.c.bf16 %v802_v27, %v802_v27  ;;  %v2184_v32 = vpack.c.bf16 %v803_v28, %v803_v28 }
  0x71   : > { %v800_v33 = vsel %vm2168_vm5, %v784_v20, 0.0  ;;  %v801_v34 = vsel %vm751_vm8, %v785_v21, 0.0  ;;  %v804_v35 = vsel %vm2168_vm5, %v788_v22, 0.0  ;;  %v2190_v36 = vsel %vm751_vm8, %v789_v23, 0.0 }
  0x72   : > { %v1008_v37 = vunpack.c.l.b16 %v806_v29  ;;  %v1009_v39 = vunpack.c.l.b16 %v807_v30  ;;  %v2192_v40 = vpack.c.bf16 %v800_v33, %v800_v33  ;;  %v1602_v38 = vrot.slane %v806_v29, 9 }
  0x73   : > { %v1099_v43 = vrot.slane %v807_v30, 5  ;;  %v834_v44 = vshrl.u32 %v806_v29, 16  ;;  %v837_v45 = vshll.u32 %v806_v29, 16  ;;  %v843_v46 = vshll.u32 %v807_v30, 16 }
  0x74   : > { %v1014_v47 = vpack.c.b16 %v1009_v39, %v1008_v37  ;;  %v1102_v48 = vrot.slane %v2192_v40, 5  ;;  %v847_v49 = vshrl.u32 %v807_v30, 16  ;;  %v853_v50 = vshll.u32 %v2192_v40, 16 }
  0x75   : > { %v1100_v51 = vsel %vm2196_vm9, %v1602_v38, %v1099_v43  ;;  %v1101_v52 = vrot.slane %v1099_v43, 4  ;;  %v836_v53 = vrot.slane %v834_v44, 4  ;;  %v839_v54 = vrot.slane %v837_v45, 5 }
  0x76   : > { %1076 = vmatmul.bf16.vlgmr.msra.gmra.mxu1 %v1014_v47  ;;  %v1134_v55 = vunpack.c.l.b16 %v1100_v51  ;;  %v845_v56 = vrot.slane %v843_v46, 5  ;;  %v849_v57 = vrot.slane %v847_v49, 4  ;;  %v855_v58 = vrot.slane %v853_v50, 5 }
  0x77   : > { %v1103_v59 = vsel %vm2196_vm9, %v1101_v52, %v1102_v48  ;;  %v840_v60 = vor.u32 %v839_v54, %v836_v53  ;;  %v809_v61 = vpack.c.bf16 %v801_v34, %v801_v34  ;;  %v857_v62 = vshrl.u32 %v2192_v40, 16 }
  0x78   : > { %v1135_v63 = vunpack.c.l.b16 %v1103_v59  ;;  %v850_v1 = vor.u32 %v849_v57, %v845_v56  ;;  %v868_v2 = vshrl.u32 %v2182_v31, 16  ;;  %v871_v19 = vshll.u32 %v2182_v31, 16 }
  0x79   : > { %v841_v3 = vrot.slane %v840_v60, 4  ;;  %v859_v4 = vrot.slane %v857_v62, 4  ;;  %v863_v5 = vshll.u32 %v809_v61, 16  ;;  %v877_v6 = vshll.u32 %v2184_v32, 16 }
  0x7a   : > { %v1140_v8 = vpack.c.b16 %v1135_v63, %v1134_v55  ;;  %v851_v9 = vrot.slane %v850_v1, 4  ;;  %v870_v10 = vrot.slane %v868_v2, 4  ;;  %v873_v11 = vrot.slane %v871_v19, 5 }
  0x7b   : > { %v846_v12 = vsel %vm2209_vm10, %v841_v3, %v845_v56  ;;  %v860_v13 = vor.u32 %v859_v4, %v855_v58  ;;  %v865_v14 = vrot.slane %v863_v5, 5  ;;  %v879_v15 = vrot.slane %v877_v6, 5 }
  0x7c   : > { %1202 = vmatmul.bf16.vlgmr.msra.gmra.mxu2 %v1140_v8  ;;  %v856_v16 = vsel %vm2209_vm10, %v851_v9, %v855_v58  ;;  %v918_v17 = vunpack.c.l.b16 %v846_v12  ;;  %v874_v18 = vor.u32 %v873_v11, %v870_v10  ;;  %v1010_v20 = vunpack.c.l.b16 %v2192_v40 }
  0x7d   : > { %v919_v21 = vunpack.c.l.b16 %v856_v16  ;;  %v861_v22 = vrot.slane %v860_v13, 4  ;;  %v1011_v23 = vunpack.c.l.b16 %v2182_v31  ;;  %v1104_v24 = vrot.slane %v1102_v48, 4 }
  0x7e   : > { %v875_v25 = vrot.slane %v874_v18, 4  ;;  %v1105_v27 = vrot.slane %v809_v61, 5  ;;  %v1603_v28 = vrot.slane %v2182_v31, 9  ;;  %v1109_v29 = vrot.slane %v2184_v32, 5 }
  0x7f   : > { %v924_v30 = vpack.c.b16 %v919_v21, %v918_v17  ;;  %v866_v33 = vsel %vm2209_vm10, %v861_v22, %v865_v14  ;;  %v812_v34 = vpack.c.bf16 %v804_v35, %v804_v35  ;;  %v813_v31 = vpack.c.bf16 %v2190_v36, %v2190_v36 }
  0x80   : > { %v880_v37 = vsel %vm2209_vm10, %v875_v25, %v879_v15  ;;  %v920_v39 = vunpack.c.l.b16 %v866_v33  ;;  %v1106_v40 = vsel %vm2196_vm9, %v1104_v24, %v1105_v27  ;;  %v1110_v43 = vsel %vm2196_vm9, %v1603_v28, %v1109_v29 }
  0x81   : > { %986 = vmatmul.bf16.vlgmr.msra.gmra.mxu0 %v924_v30  ;;  %v921_v38 = vunpack.c.l.b16 %v880_v37  ;;  %v1015_v44 = vpack.c.b16 %v1011_v23, %v1010_v20  ;;  %v881_v45 = vshrl.u32 %v2184_v32, 16  ;;  %v887_v46 = vshll.u32 %v812_v34, 16 }
  0x82   : > { %v891_v35 = vshrl.u32 %v812_v34, 16  ;;  %v1136_v48 = vunpack.c.l.b16 %v1106_v40  ;;  %v897_v49 = vshll.u32 %v813_v31, 16  ;;  %v1137_v50 = vunpack.c.l.b16 %v1110_v43 }
  0x83   : > { %v925_v47 = vpack.c.b16 %v921_v38, %v920_v39  ;;  %v883_v51 = vrot.slane %v881_v45, 4  ;;  %v889_v52 = vrot.slane %v887_v46, 5  ;;  %v1112_v59 = vrot.slane %v812_v34, 5 }
  0x84   : > { %v893_v53 = vrot.slane %v891_v35, 4  ;;  %v899_v56 = vrot.slane %v897_v49, 5  ;;  %v1141_v57 = vpack.c.b16 %v1137_v50, %v1136_v48  ;;  %v1111_v62 = vrot.slane %v1109_v29, 4 }
  0x85   : > { %991 = vmatmul.bf16.vlgmr.msra.gmra.mxu3 %v925_v47  ;;  %v884_v54 = vor.u32 %v883_v51, %v879_v15  ;;  %v1114_v2 = vrot.slane %v1112_v59, 4  ;;  %v1115_v19 = vrot.slane %v813_v31, 5  ;;  %v1012_v3 = vunpack.c.l.b16 %v2184_v32 }
  0x86   : > { %1081 = vmatmul.bf16.gmra.mxu1 %v1015_v44  ;;  %v894_v55 = vor.u32 %v893_v53, %v889_v52  ;;  %v1013_v4 = vunpack.c.l.b16 %v812_v34  ;;  %v1113_v6 = vsel %vm2196_vm9, %v1111_v62, %v1112_v59  ;;  %v1224_v29 = vstv %s626_s22 }
  0x87   : > { %v885_v58 = vrot.slane %v884_v54, 4  ;;  %v1116_v8 = vsel %vm2196_vm9, %v1114_v2, %v1115_v19  ;;  %v1138_v10 = vunpack.c.l.b16 %v1113_v6  ;;  %v1226_v33 = vadd.s32 %v1224_v29, %v2123_v26 }
  0x88   : > { %v895_v36 = vrot.slane %v894_v55, 4  ;;  %v1016_v9 = vpack.c.b16 %v1013_v4, %v1012_v3  ;;  %v1139_v0 = vunpack.c.l.b16 %v1116_v8  ;;  %v1225_v40 = vadd.s32 %v1224_v29, %v2102_v7 }
  0x89   : > { %v890_v60 = vsel %vm2209_vm10, %v885_v58, %v889_v52  ;;  %v1227_v38 = vadd.s32 %v1224_v29, %v2144_v42  ;;  %vm1229_vm11 = vcmp.lt.s32.totalorder %v1226_v33, 32 }
  0x8a   : > { %v900_v61 = vsel %vm2209_vm10, %v895_v36, %v899_v56  ;;  %v922_v63 = vunpack.c.l.b16 %v890_v60  ;;  %v1142_v11 = vpack.c.b16 %v1139_v0, %v1138_v10  ;;  %vm1228_vm12 = vcmp.lt.s32.totalorder %v1225_v40, 32 }
  0x8b   : > { %v923_v1 = vunpack.c.l.b16 %v900_v61  ;;  %vm1230_vm13 = vcmp.lt.s32.totalorder %v1227_v38, 32 }
  0x8c   : > { %1207 = vmatmul.bf16.gmra.mxu2 %v1141_v57 }
  0x8d   : > { %v926_v5 = vpack.c.b16 %v923_v1, %v922_v63 }
  0x95   : > { %996 = vmatmul.bf16.gmra.mxu3 %v926_v5 }
  0x96   : > { %1086 = vmatmul.bf16.gmra.mxu1 %v1016_v9 }
  0x9c   : > { %1212 = vmatmul.bf16.gmra.mxu2 %v1142_v11 }
  0xf3   : > { %v1077_v12 = vpop.f32.mrf.mxu1 }
  0xfb   : > { %v1079_v13 = vpop.f32.mrf.mxu1 }
  0xfe   : > { %v987_v14 = vpop.f32.mrf.mxu0 }
  0xff   : > { %v1203_v32 = vpop.f32.mrf.mxu2  ;;  %v1078_v15 = vadd.f32 %v1077_v12, %v987_v14 }
 0x101   : > { %v1218_v21 = vadd.f32 %v1203_v32, %v1078_v15 }
 0x103   : > { %v1082_v16 = vpop.f32.mrf.mxu1  ;;  %v1237_v47 = vsel %vm1228_vm12, %v1218_v21, 0.0 }
 0x104   : > { %v1255_v7 = vmul.f32 %v1237_v47, %v1237_v47 }
 0x106   : > { %v989_v17 = vpop.f32.mrf.mxu0 }
 0x107   : > { %v1080_v18 = vadd.f32 %v1079_v13, %v989_v17  ;;  %v1205_v20 = vpop.f32.mrf.mxu2 }
 0x108   : > { %v992_v41 = vpop.f32.mrf.mxu3 }
 0x109   : > { %v1219_v22 = vadd.f32 %v1205_v20, %v1080_v18  ;;  %v1083_v28 = vadd.f32 %v1082_v16, %v992_v41 }
 0x10b   : > { %v1686_v23 = vpack.c.bf16 %v1219_v22, %v1218_v21  ;;  %v1084_v24 = vpop.f32.mrf.mxu1  ;;  %v1238_v46 = vsel %vm1229_vm11, %v1219_v22, 0.0 }
 0x10c   : > { %v1256_v49 = vmul.f32 %v1238_v46, %v1238_v46  ;;  %v1243_v51 = vadd.f32 %v1238_v46, %v1237_v47 }
 0x10d   : > { %1687 = vst [vmem:[%s2245_s29] sm:$0xff] %v1686_v23  }
 0x10e   : > { %v1261_v55 = vadd.f32 %v1256_v49, %v1255_v7 }
 0x10f   : > { %v1208_v25 = vpop.f32.mrf.mxu2 }
 0x110   : > { %v994_v27 = vpop.f32.mrf.mxu3  ;;  %v1220_v37 = vadd.f32 %v1208_v25, %v1083_v28 }
 0x111   : > { %v1085_v30 = vadd.f32 %v1084_v24, %v994_v27 }
 0x112   : > { %v1239_v26 = vsel %vm1230_vm13, %v1220_v37, 0.0 }
 0x113   : > { %v1087_v31 = vpop.f32.mrf.mxu1  ;;  %v1257_v42 = vmul.f32 %v1239_v26, %v1239_v26  ;;  %v1244_v56 = vadd.f32 %v1243_v51, %v1239_v26 }
 0x114   : > { %v1317_v18 = vld [vmem:[%s2245_s29] sm:$0xff] (%p1970_p0)  }
 0x115   : > { %v1262_v36 = vadd.f32 %v1261_v55, %v1257_v42  ;;  %1318 = vst [vmem:[%s1300_s13] sm:$0xff] (%p1970_p0), %v1317_v18  }
 0x117   : > { %v1210_v34 = vpop.f32.mrf.mxu2 }
 0x118   : > { %v1221_v39 = vadd.f32 %v1210_v34, %v1085_v30  ;;  %v997_v43 = vpop.f32.mrf.mxu3 }
 0x119   : > { %v1088_v45 = vadd.f32 %v1087_v31, %v997_v43 }
 0x11a   : > { %v1691_v44 = vpack.c.bf16 %v1221_v39, %v1220_v37  ;;  %v1240_v50 = vsel %vm1228_vm12, %v1221_v39, 0.0 }
 0x11b   : > { %v1089_v53 = vpop.f32.mrf.mxu1  ;;  %v1258_v57 = vmul.f32 %v1240_v50, %v1240_v50  ;;  %v1245_v59 = vadd.f32 %v1244_v56, %v1240_v50 }
 0x11c   : > { %1698 = vst [vmem:[%s2245_s29 + $0x8] sm:$0xff] %v1691_v44  }
 0x11d   : > { %v1263_v63 = vadd.f32 %v1262_v36, %v1258_v57 }
 0x11f   : > { %v1213_v35 = vpop.f32.mrf.mxu2 }
 0x120   : > { %v1222_v48 = vadd.f32 %v1213_v35, %v1088_v45  ;;  %v999_v52 = vpop.f32.mrf.mxu3 }
 0x121   : > { %v1090_v58 = vadd.f32 %v1089_v53, %v999_v52 }
 0x122   : > { %v1241_v54 = vsel %vm1229_vm11, %v1222_v48, 0.0 }
 0x123   : > { %v1259_v60 = vmul.f32 %v1241_v54, %v1241_v54  ;;  %v1246_v1 = vadd.f32 %v1245_v59, %v1241_v54  ;;  %v1321_v20 = vld [vmem:[%s2245_s29 + $0x8] sm:$0xf] (%p1970_p0) }
 0x124   : > { %1322 = vst [vmem:[%s1300_s13 + $0x8] sm:$0xf] (%p1970_p0), %v1321_v20 }
 0x125   : > { %v1264_v3 = vadd.f32 %v1263_v63, %v1259_v60 }
 0x127   : > { %v1215_v61 = vpop.f32.mrf.mxu2 }
 0x128   : > { %v1223_v62 = vadd.f32 %v1215_v61, %v1090_v58 }
 0x12a   : > { %v1242_v2 = vsel %vm1230_vm13, %v1223_v62, 0.0  ;;  %v1696_v19 = vpack.c.bf16 %v1223_v62, %v1222_v48 }
 0x12b   : > { %v1247_v4 = vadd.f32 %v1246_v1, %v1242_v2  ;;  %v1260_v5 = vmul.f32 %v1242_v2, %v1242_v2 }
 0x12c   : > { %1699 = vst [vmem:[%s2245_s29 + $0x10] sm:$0xff] %v1696_v19  }
 0x12d   : > { %v1248_v6 = vrot.slane %v1247_v4, 4  ;;  %v1265_v8 = vadd.f32 %v1264_v3, %v1260_v5 }
 0x12f   : > { %v1249_v9 = vadd.f32 %v1248_v6, %v1247_v4  ;;  %v1266_v10 = vrot.slane %v1265_v8, 4 }
 0x131   : > { %v1250_v0 = vrot.slane %v1249_v9, 2  ;;  %v1267_v11 = vadd.f32 %v1266_v10, %v1265_v8 }
 0x133   : > { %v1251_v12 = vadd.f32 %v1250_v0, %v1249_v9  ;;  %v1268_v13 = vrot.slane %v1267_v11, 2  ;;  %v1323_v41 = vld [vmem:[%s2245_s29 + $0xc] sm:$0xff] (%p1970_p0)   ;;  %v1327_v21 = vld [vmem:[%s2245_s29 + $0x14] sm:$0xf] (%p1970_p0) }
 0x134   : > { %1324 = vst [vmem:[%s1300_s13 + $0x18] sm:$0xff] (%p1970_p0), %v1323_v41  }
 0x135   : > { %v1252_v14 = vrot.slane %v1251_v12, 1  ;;  %v1269_v32 = vadd.f32 %v1268_v13, %v1267_v11  ;;  %1328 = vst [vmem:[%s1300_s13 + $0x20] sm:$0xf] (%p1970_p0), %v1327_v21 }
 0x137   : > { %v1253_v15 = vadd.f32 %v1252_v14, %v1251_v12  ;;  %v1270_v16 = vrot.slane %v1269_v32, 1  ;;  %1297 = sbr.rel (!%p1970_p0) target bundleno = 316 (0x13c), region = 179 }
 0x139   : > { %1254 = vst [vmem:[%s599_s25] sm:$0x1] %v1253_v15  ;;  %v1271_v17 = vadd.f32 %v1270_v16, %v1269_v32 }
 0x13b   : > { %1272 = vst [vmem:[%s602_s11] sm:$0x1] %v1271_v17 }
 0x13c PF: > { %s2340_s19 = sld [smem:[#allocation6_spill]]  ;;  %s2343_s13 = smov %s1802_s14 }
 0x13d   : > { %s2341_s24 = sld [smem:[#allocation8_spill]]  ;;  %s2344_s14 = smov %s1977_s12 }
 0x13e   : > { %s2342_s28 = sld [smem:[#allocation7_spill]]  ;;  %s2345_s15 = smov %s1810_s16 }
 0x13f   : > { %s2347_s17 = smov %s1818_s18 }
 0x142   : > { %p18_p7 = scmp.ge.s32.totalorder %s2340_s19, 4  }
 0x143   : > { %s2346_s16 = smov %s2341_s24 }
 0x144   : > { %s2348_s18 = smov %s2342_s28  ;;  %20 = sbr.rel (!%p18_p7) target bundleno = 8 (0x8), region = 293 }

</bundles_post_ra>
